<compile_context>
chip_gen: v7x
topology: tpu7x:2x2x1
jax: 0.10.0
libtpu: 0.0.40
codegen_flags: <defaults>
</compile_context>

<pallas_src>
import jax
import jax.numpy as jnp
from jax.experimental import pallas as pl
from jax.experimental.pallas import tpu as pltpu

_EPS = 1e-5
_LANE = 128
_LP = 16  # left zero-pad columns in the conv scratch -> bf16-tile-aligned store


def _vmem_limit_bytes():
    cap = 64 * 1024 * 1024  # conservative fallback (v7x physical VMEM)
    try:
        cap = int(pltpu.get_tpu_info().vmem_capacity_bytes)
    except Exception:
        pass
    return min((cap * 3) // 4, 100 * 1024 * 1024)


# --------------------------------------------------------------------------- #
# in-kernel helpers
# --------------------------------------------------------------------------- #
def _zero_pad_border(pad_scr, H, W):
    """Zero the thin border of the persistent conv scratch (every grid step).

    Re-zeroing per step (instead of a pl.program_id(0)==0 init) keeps the
    kernels correct when the batch axis is "parallel" and split across
    TensorCores.  Scratch layout: (H+2, _LP+W+8, Cp) bf16 with the image
    interior at [1:H+1, _LP:_LP+W, :].  Per-tap reads touch rows [0, H+2) and
    columns [_LP-1, _LP+W], so only rows 0 / H+1 and columns _LP-1 / _LP+W
    need zeros.
    """
    Hp, Wp, Cp = pad_scr.shape
    pad_scr[0:1, :, :] = jnp.zeros((1, Wp, Cp), pad_scr.dtype)
    pad_scr[H + 1:H + 2, :, :] = jnp.zeros((1, Wp, Cp), pad_scr.dtype)
    pad_scr[:, _LP - 1:_LP, :] = jnp.zeros((Hp, 1, Cp), pad_scr.dtype)
    pad_scr[:, _LP + W:_LP + W + 1, :] = jnp.zeros((Hp, 1, Cp), pad_scr.dtype)


def _conv3x3(x_bf16, w_ref, pad_scr):
    """3x3 / stride-1 / pad-1 conv of one (H, W, Cp) bf16 image tile.

    Nine per-tap (H*W, Cp) x (Cp, Cp) bf16 MXU matmuls accumulated in f32
    (no im2col staging buffer).  `pad_scr` border must already hold zeros.
    Returns the (H*W, Cp) f32 accumulator.
    """
    H, W, Cp = x_bf16.shape
    pad_scr[1:H + 1, _LP:_LP + W, :] = x_bf16  # aligned interior store
    acc = jnp.zeros((H * W, Cp), jnp.float32)
    for ky in range(3):
        for kx in range(3):
            shifted = pad_scr[ky:ky + H, _LP - 1 + kx:_LP - 1 + kx + W, :]
            acc += jnp.dot(shifted.reshape(H * W, Cp), w_ref[ky * 3 + kx],
                           preferred_element_type=jnp.float32)
    return acc


def _channel_stats(acc):
    """Per-channel [sum, sumsq] ((1, Cp) f32 each) of an (M, Cp) f32 tile."""
    return (jnp.sum(acc, axis=0, keepdims=True),
            jnp.sum(acc * acc, axis=0, keepdims=True))


# --------------------------------------------------------------------------- #
# pass A: conv1 + per-block BN1 [sum, sumsq]
# --------------------------------------------------------------------------- #
def _conv1_stats_kernel(x_ref, w_ref, y_ref, s_ref, pad_scr):
    B, H, W, Cp = x_ref.shape
    _zero_pad_border(pad_scr, H, W)
    s_sum = jnp.zeros((1, Cp), jnp.float32)
    s_sq = jnp.zeros((1, Cp), jnp.float32)
    for b in range(B):
        acc = _conv3x3(x_ref[b], w_ref, pad_scr)
        y_ref[b] = acc.reshape(H, W, Cp).astype(y_ref.dtype)
        ps, pq = _channel_stats(acc)
        s_sum += ps
        s_sq += pq
    s_ref[0:1, :] = s_sum
    s_ref[1:2, :] = s_sq


# --------------------------------------------------------------------------- #
# pass B: BN1 (precomputed scale/shift) + ReLU + conv2 + per-block BN2 stats
# --------------------------------------------------------------------------- #
def _bn1_conv2_stats_kernel(y1_ref, sc_ref, sh_ref, w_ref, y2_ref, s_ref,
                            pad_scr):
    B, H, W, Cp = y1_ref.shape
    _zero_pad_border(pad_scr, H, W)
    scale = sc_ref[...].reshape(1, 1, Cp)
    shift = sh_ref[...].reshape(1, 1, Cp)
    s_sum = jnp.zeros((1, Cp), jnp.float32)
    s_sq = jnp.zeros((1, Cp), jnp.float32)
    for b in range(B):
        t = jnp.maximum(y1_ref[b].astype(jnp.float32) * scale + shift, 0.0)
        acc = _conv3x3(t.astype(jnp.bfloat16), w_ref, pad_scr)
        y2_ref[b] = acc.reshape(H, W, Cp).astype(y2_ref.dtype)
        ps, pq = _channel_stats(acc)
        s_sum += ps
        s_sq += pq
    s_ref[0:1, :] = s_sum
    s_ref[1:2, :] = s_sq


# --------------------------------------------------------------------------- #
# pass C: BN2 (precomputed scale/shift) + residual add + final ReLU
# --------------------------------------------------------------------------- #
def _bn2_residual_kernel(y2_ref, sc_ref, sh_ref, x_ref, out_ref):
    B, H, W, C = out_ref.shape
    Cp = y2_ref.shape[-1]
    scale = sc_ref[...].reshape(1, 1, Cp)
    shift = sh_ref[...].reshape(1, 1, Cp)
    for b in range(B):
        z = (y2_ref[b].astype(jnp.float32) * scale + shift
             + x_ref[b].astype(jnp.float32))
        out_ref[b] = jnp.maximum(z, 0.0)[:, :, :C].astype(out_ref.dtype)


# --------------------------------------------------------------------------- #
# wrapper (NCHW in / NCHW out, like the PyTorch module)
# --------------------------------------------------------------------------- #
def res_block_conv3(x_nchw, params, stride=1, batch_block=1):
    """Pallas forward of ResBlockConv3 in training mode (batch-stat BN)."""
    assert stride == 1, "only the stride=1 residual path is implemented"
    w1, b1, g1, be1, w2, b2, g2, be2 = params
    del b1, b2  # conv bias before train-mode (batch-stat) BN is a no-op

    N, Cin, H, W = x_nchw.shape
    Cout = w1.shape[0]
    assert Cin == Cout, "residual add requires in_channels == out_channels"
    assert N % batch_block == 0
    C = Cout
    Cp = ((C + _LANE - 1) // _LANE) * _LANE  # lane-dense channel padding
    NB = N // batch_block
    vmem_limit = _vmem_limit_bytes()

    # NCHW -> NHWC (channels on the 128-lane axis), zero-pad channels, bf16.
    # Zero-padded channels stay exactly zero through conv / BN / residual.
    x = jnp.transpose(x_nchw, (0, 2, 3, 1))
    x = jnp.pad(x, ((0, 0), (0, 0), (0, 0), (0, Cp - C))).astype(jnp.bfloat16)

    def prep_w(w):
        # torch (Cout, Cin, 3, 3) -> (3, 3, Cin, Cout) -> (9, Cp, Cp) bf16
        wk = jnp.transpose(w, (2, 3, 1, 0))
        wk = jnp.pad(wk, ((0, 0), (0, 0), (0, Cp - C), (0, Cp - C)))
        return wk.reshape(9, Cp, Cp).astype(jnp.bfloat16)

    w1k, w2k = prep_w(w1), prep_w(w2)

    def bn_scale_shift(stats_partial, g, be):
        # Reduce per-grid-step partial [sum, sumsq] to global scale/shift (f32).
        s = jnp.sum(stats_partial.astype(jnp.float32), axis=0)  # (2, Cp)
        inv_count = 1.0 / float(N * H * W)
        mean = s[0] * inv_count
        var = jnp.maximum(s[1] * inv_count - mean * mean, 0.0)
        gp = jnp.pad(g.astype(jnp.float32), (0, Cp - C))
        bp = jnp.pad(be.astype(jnp.float32), (0, Cp - C))
        scale = gp * jax.lax.rsqrt(var + _EPS)
        shift = bp - mean * scale
        return scale.reshape(1, Cp), shift.reshape(1, Cp)

    img_spec = pl.BlockSpec((batch_block, H, W, Cp), lambda n: (n, 0, 0, 0))
    out_spec = pl.BlockSpec((batch_block, H, W, C), lambda n: (n, 0, 0, 0))
    stats_spec = pl.BlockSpec((None, 2, Cp), lambda n: (n, 0, 0))
    vec_spec = pl.BlockSpec((1, Cp), lambda n: (0, 0))
    w_spec = pl.BlockSpec((9, Cp, Cp), lambda n: (0, 0, 0))
    pad_scratch = pltpu.VMEM((H + 2, _LP + W + 8, Cp), jnp.bfloat16)

    conv_flops = 2 * N * H * W * 9 * Cp * Cp
    act_bytes = N * H * W * Cp * 2            # one bf16 activation slab
    w_bytes = 9 * Cp * Cp * 2
    stats_bytes = NB * 2 * Cp * 4

    # ---- pass A: conv1 + BN1 partial statistics -----------------------------
    y1, s1p = pl.pallas_call(
        _conv1_stats_kernel,
        grid=(NB,),
        in_specs=[img_spec, w_spec],
        out_specs=(img_spec, stats_spec),
        out_shape=(jax.ShapeDtypeStruct((N, H, W, Cp), jnp.bfloat16),
                   jax.ShapeDtypeStruct((NB, 2, Cp), jnp.float32)),
        scratch_shapes=[pad_scratch],
        compiler_params=pltpu.CompilerParams(
            dimension_semantics=("parallel",),
            vmem_limit_bytes=vmem_limit),
        cost_estimate=pl.CostEstimate(
            flops=conv_flops, transcendentals=0,
            bytes_accessed=2 * act_bytes + w_bytes + stats_bytes),
    )(x, w1k)
    scale1, shift1 = bn_scale_shift(s1p, g1, be1)

    # ---- pass B: BN1 + ReLU + conv2 + BN2 partial statistics ----------------
    y2, s2p = pl.pallas_call(
        _bn1_conv2_stats_kernel,
        grid=(NB,),
        in_specs=[img_spec, vec_spec, vec_spec, w_spec],
        out_specs=(img_spec, stats_spec),
        out_shape=(jax.ShapeDtypeStruct((N, H, W, Cp), jnp.bfloat16),
                   jax.ShapeDtypeStruct((NB, 2, Cp), jnp.float32)),
        scratch_shapes=[pad_scratch],
        compiler_params=pltpu.CompilerParams(
            dimension_semantics=("parallel",),
            vmem_limit_bytes=vmem_limit),
        cost_estimate=pl.CostEstimate(
            flops=conv_flops + 5 * N * H * W * Cp, transcendentals=0,
            bytes_accessed=2 * act_bytes + w_bytes + stats_bytes + 4 * Cp * 4),
    )(y1, scale1, shift1, w2k)
    scale2, shift2 = bn_scale_shift(s2p, g2, be2)

    # ---- pass C: BN2 + residual + ReLU (writes only the real C channels) ----
    out_nhwc = pl.pallas_call(
        _bn2_residual_kernel,
        grid=(NB,),
        in_specs=[img_spec, vec_spec, vec_spec, img_spec],
        out_specs=out_spec,
        out_shape=jax.ShapeDtypeStruct((N, H, W, C), jnp.float32),
        compiler_params=pltpu.CompilerParams(
            dimension_semantics=("parallel",),
            vmem_limit_bytes=vmem_limit),
        cost_estimate=pl.CostEstimate(
            flops=4 * N * H * W * Cp, transcendentals=0,
            bytes_accessed=2 * act_bytes + N * H * W * C * 4 + 4 * Cp * 4),
    )(y2, scale2, shift2, x)

    return jnp.transpose(out_nhwc, (0, 3, 1, 2))  # NHWC -> NCHW


# --------------------------------------------------------------------------- #
# pure-JAX reference (PyTorch train-mode semantics, including the conv biases)
# --------------------------------------------------------------------------- #
def _reference(x_nchw, params):
    w1, b1, g1, be1, w2, b2, g2, be2 = params

    def conv(x, w, b):
        y = jax.lax.conv_general_dilated(
            x, w, window_strides=(1, 1), padding=((1, 1), (1, 1)),
            dimension_numbers=("NCHW", "OIHW", "NCHW"))
        return y + b[None, :, None, None]

    def bn(x, g, be):
        mean = jnp.mean(x, axis=(0, 2, 3), keepdims=True)
        var = jnp.mean((x - mean) ** 2, axis=(0, 2, 3), keepdims=True)
        return ((x - mean) / jnp.sqrt(var + _EPS)
                * g[None, :, None, None] + be[None, :, None, None])

    out = jax.nn.relu(bn(conv(x_nchw, w1, b1), g1, be1))
    out = bn(conv(out, w2, b2), g2, be2)
    out = out + x_nchw
    return jax.nn.relu(out)


if __name__ == "__main__":
    N, C, H, W = 2, 8, 16, 16  # small NCHW input, in_channels == out_channels
    key = jax.random.PRNGKey(0)
    keys = jax.random.split(key, 9)

    x = jax.random.normal(keys[0], (N, C, H, W), jnp.float32)
    w1 = 0.1 * jax.random.normal(keys[1], (C, C, 3, 3), jnp.float32)
    b1 = 0.1 * jax.random.normal(keys[2], (C,), jnp.float32)
    g1 = 1.0 + 0.1 * jax.random.normal(keys[3], (C,), jnp.float32)
    be1 = 0.1 * jax.random.normal(keys[4], (C,), jnp.float32)
    w2 = 0.1 * jax.random.normal(keys[5], (C, C, 3, 3), jnp.float32)
    b2 = 0.1 * jax.random.normal(keys[6], (C,), jnp.float32)
    g2 = 1.0 + 0.1 * jax.random.normal(keys[7], (C,), jnp.float32)
    be2 = 0.1 * jax.random.normal(keys[8], (C,), jnp.float32)
    params = (w1, b1, g1, be1, w2, b2, g2, be2)

    out = jax.block_until_ready(res_block_conv3(x, params, stride=1))
    ref = jax.block_until_ready(_reference(x, params))

    assert out.shape == (N, C, H, W)
    # bf16 inter-pass activations / conv operands (f32 accumulation & stats)
    # -> slightly looser tolerance than a pure-f32 pipeline.
    assert jnp.allclose(out, ref, rtol=3e-2, atol=3e-2), (
        float(jnp.max(jnp.abs(out - ref))))
    print("KERNEL_OK")
</pallas_src>

<mosaic_0001>
module attributes {stable_mosaic.version = 11 : i64} {
  func.func @_conv1_stats_kernel(%arg0: i32, %arg1: memref<1x16x16x128xbf16, #tpu.memory_space<vmem>>, %arg2: memref<9x128x128xbf16, #tpu.memory_space<vmem>>, %arg3: memref<1x16x16x128xbf16, #tpu.memory_space<vmem>>, %arg4: memref<1x2x128xf32, #tpu.memory_space<vmem>>, %arg5: memref<18x40x128xbf16, #tpu.memory_space<vmem>>) attributes {dimension_semantics = [#tpu.dimension_semantics<parallel>], iteration_bounds = array<i64: 2>, scalar_prefetch = 0 : i64, scratch_operands = 1 : i64, tpu.core_type = #tpu.core_type<tc>, window_params = [{transform_indices = @transform_0, window_bounds = array<i64: 1, 16, 16, 128>}, {pipeline_mode = #tpu.pipeline_mode<synchronous>, transform_indices = @transform_1, window_bounds = array<i64: 9, 128, 128>}, {transform_indices = @transform_2, window_bounds = array<i64: 1, 16, 16, 128>}, {transform_indices = @transform_3, window_bounds = array<i64: 1, 2, 128>}]} {
    %cst = arith.constant 0.000000e+00 : bf16
    %0 = vector.broadcast %cst : bf16 to vector<1x40x128xbf16>
    %c0 = arith.constant 0 : index
    %c0_0 = arith.constant 0 : index
    %c0_1 = arith.constant 0 : index
    %1 = vector.load %arg5[%c0, %c0_0, %c0_1] : memref<18x40x128xbf16, #tpu.memory_space<vmem>>, vector<1x40x128xbf16>
    tpu.vector_store %arg5[%c0, %c0_0, %c0_1], %0 {strides = array<i32>} : memref<18x40x128xbf16, #tpu.memory_space<vmem>>, vector<1x40x128xbf16>,
    %cst_2 = arith.constant 0.000000e+00 : bf16
    %2 = vector.broadcast %cst_2 : bf16 to vector<1x40x128xbf16>
    %c17 = arith.constant 17 : index
    %c0_3 = arith.constant 0 : index
    %c0_4 = arith.constant 0 : index
    %3 = vector.load %arg5[%c17, %c0_3, %c0_4] : memref<18x40x128xbf16, #tpu.memory_space<vmem>>, vector<1x40x128xbf16>
    tpu.vector_store %arg5[%c17, %c0_3, %c0_4], %2 {strides = array<i32>} : memref<18x40x128xbf16, #tpu.memory_space<vmem>>, vector<1x40x128xbf16>,
    %cst_5 = arith.constant 0.000000e+00 : bf16
    %4 = vector.broadcast %cst_5 : bf16 to vector<18x1x128xbf16>
    %c0_6 = arith.constant 0 : index
    %c15 = arith.constant 15 : index
    %c0_7 = arith.constant 0 : index
    %5 = vector.load %arg5[%c0_6, %c15, %c0_7] : memref<18x40x128xbf16, #tpu.memory_space<vmem>>, vector<18x1x128xbf16>
    tpu.vector_store %arg5[%c0_6, %c15, %c0_7], %4 {strides = array<i32>} : memref<18x40x128xbf16, #tpu.memory_space<vmem>>, vector<18x1x128xbf16>,
    %cst_8 = arith.constant 0.000000e+00 : bf16
    %6 = vector.broadcast %cst_8 : bf16 to vector<18x1x128xbf16>
    %c0_9 = arith.constant 0 : index
    %c32 = arith.constant 32 : index
    %c0_10 = arith.constant 0 : index
    %7 = vector.load %arg5[%c0_9, %c32, %c0_10] : memref<18x40x128xbf16, #tpu.memory_space<vmem>>, vector<18x1x128xbf16>
    tpu.vector_store %arg5[%c0_9, %c32, %c0_10], %6 {strides = array<i32>} : memref<18x40x128xbf16, #tpu.memory_space<vmem>>, vector<18x1x128xbf16>,
    %cst_11 = arith.constant 0.000000e+00 : f32
    %8 = vector.broadcast %cst_11 : f32 to vector<1x128xf32>
    %cst_12 = arith.constant 0.000000e+00 : f32
    %9 = vector.broadcast %cst_12 : f32 to vector<1x128xf32>
    %c0_13 = arith.constant 0 : index
    %c0_14 = arith.constant 0 : index
    %c0_15 = arith.constant 0 : index
    %c0_16 = arith.constant 0 : index
    %10 = vector.load %arg1[%c0_13, %c0_14, %c0_15, %c0_16] : memref<1x16x16x128xbf16, #tpu.memory_space<vmem>>, vector<1x16x16x128xbf16>
    %11 = vector.shape_cast %10 : vector<1x16x16x128xbf16> to vector<16x16x128xbf16>
    %c1 = arith.constant 1 : index
    %c16 = arith.constant 16 : index
    %c0_17 = arith.constant 0 : index
    %12 = vector.load %arg5[%c1, %c16, %c0_17] : memref<18x40x128xbf16, #tpu.memory_space<vmem>>, vector<16x16x128xbf16>
    tpu.vector_store %arg5[%c1, %c16, %c0_17], %11 {strides = array<i32>} : memref<18x40x128xbf16, #tpu.memory_space<vmem>>, vector<16x16x128xbf16>,
    %cst_18 = arith.constant 0.000000e+00 : f32
    %13 = vector.broadcast %cst_18 : f32 to vector<256x128xf32>
    %c0_19 = arith.constant 0 : index
    %c15_20 = arith.constant 15 : index
    %c0_21 = arith.constant 0 : index
    %14 = vector.load %arg5[%c0_19, %c15_20, %c0_21] : memref<18x40x128xbf16, #tpu.memory_space<vmem>>, vector<16x16x128xbf16>
    %15 = vector.shape_cast %14 : vector<16x16x128xbf16> to vector<256x128xbf16>
    %c0_22 = arith.constant 0 : index
    %c0_23 = arith.constant 0 : index
    %c0_24 = arith.constant 0 : index
    %16 = vector.load %arg2[%c0_22, %c0_23, %c0_24] : memref<9x128x128xbf16, #tpu.memory_space<vmem>>, vector<1x128x128xbf16>
    %17 = vector.shape_cast %16 : vector<1x128x128xbf16> to vector<128x128xbf16>
    %cst_25 = arith.constant dense<0.000000e+00> : vector<256x128xf32>
    %18 = tpu.matmul %15, %17, %cst_25 {dimension_numbers = #tpu.dot_dimension_numbers<[1], [0], [0], [1], [0, 0, 1, 1], [], []>} : vector<256x128xbf16>, vector<128x128xbf16>, vector<256x128xf32> -> vector<256x128xf32>
    %19 = arith.addf %13, %18 : vector<256x128xf32>
    %c0_26 = arith.constant 0 : index
    %c16_27 = arith.constant 16 : index
    %c0_28 = arith.constant 0 : index
    %20 = vector.load %arg5[%c0_26, %c16_27, %c0_28] : memref<18x40x128xbf16, #tpu.memory_space<vmem>>, vector<16x16x128xbf16>
    %21 = vector.shape_cast %20 : vector<16x16x128xbf16> to vector<256x128xbf16>
    %c1_29 = arith.constant 1 : index
    %c0_30 = arith.constant 0 : index
    %c0_31 = arith.constant 0 : index
    %22 = vector.load %arg2[%c1_29, %c0_30, %c0_31] : memref<9x128x128xbf16, #tpu.memory_space<vmem>>, vector<1x128x128xbf16>
    %23 = vector.shape_cast %22 : vector<1x128x128xbf16> to vector<128x128xbf16>
    %cst_32 = arith.constant dense<0.000000e+00> : vector<256x128xf32>
    %24 = tpu.matmul %21, %23, %cst_32 {dimension_numbers = #tpu.dot_dimension_numbers<[1], [0], [0], [1], [0, 0, 1, 1], [], []>} : vector<256x128xbf16>, vector<128x128xbf16>, vector<256x128xf32> -> vector<256x128xf32>
    %25 = arith.addf %19, %24 : vector<256x128xf32>
    %c0_33 = arith.constant 0 : index
    %c17_34 = arith.constant 17 : index
    %c0_35 = arith.constant 0 : index
    %26 = vector.load %arg5[%c0_33, %c17_34, %c0_35] : memref<18x40x128xbf16, #tpu.memory_space<vmem>>, vector<16x16x128xbf16>
    %27 = vector.shape_cast %26 : vector<16x16x128xbf16> to vector<256x128xbf16>
    %c2 = arith.constant 2 : index
    %c0_36 = arith.constant 0 : index
    %c0_37 = arith.constant 0 : index
    %28 = vector.load %arg2[%c2, %c0_36, %c0_37] : memref<9x128x128xbf16, #tpu.memory_space<vmem>>, vector<1x128x128xbf16>
    %29 = vector.shape_cast %28 : vector<1x128x128xbf16> to vector<128x128xbf16>
    %cst_38 = arith.constant dense<0.000000e+00> : vector<256x128xf32>
    %30 = tpu.matmul %27, %29, %cst_38 {dimension_numbers = #tpu.dot_dimension_numbers<[1], [0], [0], [1], [0, 0, 1, 1], [], []>} : vector<256x128xbf16>, vector<128x128xbf16>, vector<256x128xf32> -> vector<256x128xf32>
    %31 = arith.addf %25, %30 : vector<256x128xf32>
    %c1_39 = arith.constant 1 : index
    %c15_40 = arith.constant 15 : index
    %c0_41 = arith.constant 0 : index
    %32 = vector.load %arg5[%c1_39, %c15_40, %c0_41] : memref<18x40x128xbf16, #tpu.memory_space<vmem>>, vector<16x16x128xbf16>
    %33 = vector.shape_cast %32 : vector<16x16x128xbf16> to vector<256x128xbf16>
    %c3 = arith.constant 3 : index
    %c0_42 = arith.constant 0 : index
    %c0_43 = arith.constant 0 : index
    %34 = vector.load %arg2[%c3, %c0_42, %c0_43] : memref<9x128x128xbf16, #tpu.memory_space<vmem>>, vector<1x128x128xbf16>
    %35 = vector.shape_cast %34 : vector<1x128x128xbf16> to vector<128x128xbf16>
    %cst_44 = arith.constant dense<0.000000e+00> : vector<256x128xf32>
    %36 = tpu.matmul %33, %35, %cst_44 {dimension_numbers = #tpu.dot_dimension_numbers<[1], [0], [0], [1], [0, 0, 1, 1], [], []>} : vector<256x128xbf16>, vector<128x128xbf16>, vector<256x128xf32> -> vector<256x128xf32>
    %37 = arith.addf %31, %36 : vector<256x128xf32>
    %c1_45 = arith.constant 1 : index
    %c16_46 = arith.constant 16 : index
    %c0_47 = arith.constant 0 : index
    %38 = vector.load %arg5[%c1_45, %c16_46, %c0_47] : memref<18x40x128xbf16, #tpu.memory_space<vmem>>, vector<16x16x128xbf16>
    %39 = vector.shape_cast %38 : vector<16x16x128xbf16> to vector<256x128xbf16>
    %c4 = arith.constant 4 : index
    %c0_48 = arith.constant 0 : index
    %c0_49 = arith.constant 0 : index
    %40 = vector.load %arg2[%c4, %c0_48, %c0_49] : memref<9x128x128xbf16, #tpu.memory_space<vmem>>, vector<1x128x128xbf16>
    %41 = vector.shape_cast %40 : vector<1x128x128xbf16> to vector<128x128xbf16>
    %cst_50 = arith.constant dense<0.000000e+00> : vector<256x128xf32>
    %42 = tpu.matmul %39, %41, %cst_50 {dimension_numbers = #tpu.dot_dimension_numbers<[1], [0], [0], [1], [0, 0, 1, 1], [], []>} : vector<256x128xbf16>, vector<128x128xbf16>, vector<256x128xf32> -> vector<256x128xf32>
    %43 = arith.addf %37, %42 : vector<256x128xf32>
    %c1_51 = arith.constant 1 : index
    %c17_52 = arith.constant 17 : index
    %c0_53 = arith.constant 0 : index
    %44 = vector.load %arg5[%c1_51, %c17_52, %c0_53] : memref<18x40x128xbf16, #tpu.memory_space<vmem>>, vector<16x16x128xbf16>
    %45 = vector.shape_cast %44 : vector<16x16x128xbf16> to vector<256x128xbf16>
    %c5 = arith.constant 5 : index
    %c0_54 = arith.constant 0 : index
    %c0_55 = arith.constant 0 : index
    %46 = vector.load %arg2[%c5, %c0_54, %c0_55] : memref<9x128x128xbf16, #tpu.memory_space<vmem>>, vector<1x128x128xbf16>
    %47 = vector.shape_cast %46 : vector<1x128x128xbf16> to vector<128x128xbf16>
    %cst_56 = arith.constant dense<0.000000e+00> : vector<256x128xf32>
    %48 = tpu.matmul %45, %47, %cst_56 {dimension_numbers = #tpu.dot_dimension_numbers<[1], [0], [0], [1], [0, 0, 1, 1], [], []>} : vector<256x128xbf16>, vector<128x128xbf16>, vector<256x128xf32> -> vector<256x128xf32>
    %49 = arith.addf %43, %48 : vector<256x128xf32>
    %c2_57 = arith.constant 2 : index
    %c15_58 = arith.constant 15 : index
    %c0_59 = arith.constant 0 : index
    %50 = vector.load %arg5[%c2_57, %c15_58, %c0_59] : memref<18x40x128xbf16, #tpu.memory_space<vmem>>, vector<16x16x128xbf16>
    %51 = vector.shape_cast %50 : vector<16x16x128xbf16> to vector<256x128xbf16>
    %c6 = arith.constant 6 : index
    %c0_60 = arith.constant 0 : index
    %c0_61 = arith.constant 0 : index
    %52 = vector.load %arg2[%c6, %c0_60, %c0_61] : memref<9x128x128xbf16, #tpu.memory_space<vmem>>, vector<1x128x128xbf16>
    %53 = vector.shape_cast %52 : vector<1x128x128xbf16> to vector<128x128xbf16>
    %cst_62 = arith.constant dense<0.000000e+00> : vector<256x128xf32>
    %54 = tpu.matmul %51, %53, %cst_62 {dimension_numbers = #tpu.dot_dimension_numbers<[1], [0], [0], [1], [0, 0, 1, 1], [], []>} : vector<256x128xbf16>, vector<128x128xbf16>, vector<256x128xf32> -> vector<256x128xf32>
    %55 = arith.addf %49, %54 : vector<256x128xf32>
    %c2_63 = arith.constant 2 : index
    %c16_64 = arith.constant 16 : index
    %c0_65 = arith.constant 0 : index
    %56 = vector.load %arg5[%c2_63, %c16_64, %c0_65] : memref<18x40x128xbf16, #tpu.memory_space<vmem>>, vector<16x16x128xbf16>
    %57 = vector.shape_cast %56 : vector<16x16x128xbf16> to vector<256x128xbf16>
    %c7 = arith.constant 7 : index
    %c0_66 = arith.constant 0 : index
    %c0_67 = arith.constant 0 : index
    %58 = vector.load %arg2[%c7, %c0_66, %c0_67] : memref<9x128x128xbf16, #tpu.memory_space<vmem>>, vector<1x128x128xbf16>
    %59 = vector.shape_cast %58 : vector<1x128x128xbf16> to vector<128x128xbf16>
    %cst_68 = arith.constant dense<0.000000e+00> : vector<256x128xf32>
    %60 = tpu.matmul %57, %59, %cst_68 {dimension_numbers = #tpu.dot_dimension_numbers<[1], [0], [0], [1], [0, 0, 1, 1], [], []>} : vector<256x128xbf16>, vector<128x128xbf16>, vector<256x128xf32> -> vector<256x128xf32>
    %61 = arith.addf %55, %60 : vector<256x128xf32>
    %c2_69 = arith.constant 2 : index
    %c17_70 = arith.constant 17 : index
    %c0_71 = arith.constant 0 : index
    %62 = vector.load %arg5[%c2_69, %c17_70, %c0_71] : memref<18x40x128xbf16, #tpu.memory_space<vmem>>, vector<16x16x128xbf16>
    %63 = vector.shape_cast %62 : vector<16x16x128xbf16> to vector<256x128xbf16>
    %c8 = arith.constant 8 : index
    %c0_72 = arith.constant 0 : index
    %c0_73 = arith.constant 0 : index
    %64 = vector.load %arg2[%c8, %c0_72, %c0_73] : memref<9x128x128xbf16, #tpu.memory_space<vmem>>, vector<1x128x128xbf16>
    %65 = vector.shape_cast %64 : vector<1x128x128xbf16> to vector<128x128xbf16>
    %cst_74 = arith.constant dense<0.000000e+00> : vector<256x128xf32>
    %66 = tpu.matmul %63, %65, %cst_74 {dimension_numbers = #tpu.dot_dimension_numbers<[1], [0], [0], [1], [0, 0, 1, 1], [], []>} : vector<256x128xbf16>, vector<128x128xbf16>, vector<256x128xf32> -> vector<256x128xf32>
    %67 = arith.addf %61, %66 : vector<256x128xf32>
    %68 = vector.shape_cast %67 : vector<256x128xf32> to vector<16x16x128xf32>
    %69 = arith.truncf %68 : vector<16x16x128xf32> to vector<16x16x128xbf16>
    %c0_75 = arith.constant 0 : index
    %c0_76 = arith.constant 0 : index
    %c0_77 = arith.constant 0 : index
    %c0_78 = arith.constant 0 : index
    %70 = vector.load %arg3[%c0_75, %c0_76, %c0_77, %c0_78] : memref<1x16x16x128xbf16, #tpu.memory_space<vmem>>, vector<1x16x16x128xbf16>
    %71 = vector.shape_cast %70 : vector<1x16x16x128xbf16> to vector<16x16x128xbf16>
    %72 = vector.shape_cast %69 : vector<16x16x128xbf16> to vector<1x16x16x128xbf16>
    tpu.vector_store %arg3[%c0_75, %c0_76, %c0_77, %c0_78], %72 {strides = array<i32>} : memref<1x16x16x128xbf16, #tpu.memory_space<vmem>>, vector<1x16x16x128xbf16>,
    %cst_79 = arith.constant dense<0.000000e+00> : vector<128xf32>
    %73 = vector.multi_reduction <add>, %67, %cst_79 [0] : vector<256x128xf32> to vector<128xf32>
    %74 = vector.shape_cast %73 : vector<128xf32> to vector<1x128xf32>
    %75 = arith.mulf %67, %67 : vector<256x128xf32>
    %cst_80 = arith.constant dense<0.000000e+00> : vector<128xf32>
    %76 = vector.multi_reduction <add>, %75, %cst_80 [0] : vector<256x128xf32> to vector<128xf32>
    %77 = vector.shape_cast %76 : vector<128xf32> to vector<1x128xf32>
    %78 = arith.addf %8, %74 : vector<1x128xf32>
    %79 = arith.addf %9, %77 : vector<1x128xf32>
    %c0_81 = arith.constant 0 : index
    %c0_82 = arith.constant 0 : index
    %c0_83 = arith.constant 0 : index
    %80 = vector.load %arg4[%c0_81, %c0_82, %c0_83] : memref<1x2x128xf32, #tpu.memory_space<vmem>>, vector<1x1x128xf32>
    %81 = vector.shape_cast %80 : vector<1x1x128xf32> to vector<1x128xf32>
    %82 = vector.shape_cast %78 : vector<1x128xf32> to vector<1x1x128xf32>
    tpu.vector_store %arg4[%c0_81, %c0_82, %c0_83], %82 {strides = array<i32>} : memref<1x2x128xf32, #tpu.memory_space<vmem>>, vector<1x1x128xf32>,
    %c0_84 = arith.constant 0 : index
    %c1_85 = arith.constant 1 : index
    %c0_86 = arith.constant 0 : index
    %83 = vector.load %arg4[%c0_84, %c1_85, %c0_86] : memref<1x2x128xf32, #tpu.memory_space<vmem>>, vector<1x1x128xf32>
    %84 = vector.shape_cast %83 : vector<1x1x128xf32> to vector<1x128xf32>
    %85 = vector.shape_cast %79 : vector<1x128xf32> to vector<1x1x128xf32>
    tpu.vector_store %arg4[%c0_84, %c1_85, %c0_86], %85 {strides = array<i32>} : memref<1x2x128xf32, #tpu.memory_space<vmem>>, vector<1x1x128xf32>,
    return
  }
  func.func @transform_0(%arg0: i32) -> (i32, i32, i32, i32) {
    %c0_i32 = arith.constant 0 : i32
    %c0_i32_0 = arith.constant 0 : i32
    %c0_i32_1 = arith.constant 0 : i32
    %c0_i32_2 = arith.constant 0 : i32
    return %arg0, %c0_i32, %c0_i32_0, %c0_i32_1 : i32, i32, i32, i32
  }
  func.func @transform_1(%arg0: i32) -> (i32, i32, i32) {
    %c0_i32 = arith.constant 0 : i32
    %c0_i32_0 = arith.constant 0 : i32
    %c0_i32_1 = arith.constant 0 : i32
    %c0_i32_2 = arith.constant 0 : i32
    return %c0_i32, %c0_i32_0, %c0_i32_1 : i32, i32, i32
  }
  func.func @transform_2(%arg0: i32) -> (i32, i32, i32, i32) {
    %c0_i32 = arith.constant 0 : i32
    %c0_i32_0 = arith.constant 0 : i32
    %c0_i32_1 = arith.constant 0 : i32
    %c0_i32_2 = arith.constant 0 : i32
    return %arg0, %c0_i32, %c0_i32_0, %c0_i32_1 : i32, i32, i32, i32
  }
  func.func @transform_3(%arg0: i32) -> (i32, i32, i32) {
    %c0_i32 = arith.constant 0 : i32
    %c0_i32_0 = arith.constant 0 : i32
    %c0_i32_1 = arith.constant 0 : i32
    return %arg0, %c0_i32, %c0_i32_0 : i32, i32, i32
  }
}

</mosaic_0001>

<bundles_post_ra>
// kernel: tpu_custom_call.1
= control target key start
LH: loop header
LB: loop body
LE: loop exit
PB: predicated region body
PF: predicated region fallthrough
CT: control target
= control target key end

     0   :  { %9 = vsyncpa [#allocation4], 0  ;;  %s9641_s0 = inlined_call_operand.hbm [shape: bf16[2,16,16,128], index: 0, kind: input, shape index: {}]   ;;  %s9642_s1 = inlined_call_operand.hbm [shape: bf16[9,128,128], index: 1, kind: input, shape index: {}]   ;;  %s9643_s2 = inlined_call_operand.hbm [shape: bf16[2,16,16,128], index: 2, kind: output, shape index: {0}]   ;;  %s9644_s3 = inlined_call_operand.hbm [shape: f32[2,2,128], index: 3, kind: output, shape index: {1}]  }
   0x1   :  { %11 = vsyncpa [#allocation4 + $0x1], 0 }
   0x2   :  { %12 = vsyncpa [#allocation7], 0 }
   0x3   :  { %13 = vsyncpa [#allocation5], 0 }
   0x4   :  { %15 = vsyncpa [#allocation5 + $0x1], 0 }
   0x5   :  { %16 = vsyncpa [#allocation10], 0 }
   0x6   :  { %18 = vsyncpa [#allocation10 + $0x1], 0  ;;  %s8024_s12 = smov 0   ;;  %s8026_s13 = smov 0  }
   0x7   :  { %s8028_s14 = smov 0   ;;  %s8030_s15 = smov 0  }
   0x8 LB: > { %s8045_s16 = sadd.s32 4294967295, %s7993_s15   ;;  %s6254_s17 = sadd.s32 4294967294, %s7993_s15   ;;  %s7993_s15 = sphi %s8030_s15, %s9839_s15   ;;  %s7989_s14 = sphi %s8028_s14, %s9838_s14   ;;  %s7985_s13 = sphi %s8026_s13, %s9837_s13   ;;  %s7981_s12 = sphi %s8024_s12, %s9836_s12  }
   0x9   : > { %p44_p0 = scmp.ne.s32.totalorder %s7985_s13, %s7981_s12  ;;  %p9645_p1 = scmp.eq.s32.totalorder %s8045_s16, 0 }
   0xa   : > { %p95_p3 = scmp.eq.s32.totalorder %s6254_s17, 1  ;;  %p6255_p5 = scmp.ge.s32.totalorder %s7993_s15, 1 }
   0xb   : > { %p8054_p4 = por %p9645_p1, %p44_p0  ;;  %p128_p7 = scmp.lt.s32.totalorder %s7993_s15, 3 }
   0xc   : > { %p8059_p6 = por %p95_p3, %p44_p0  ;;  %s7995_s21 = smov [#allocation6]  }
   0xd   : > { %s9678_s18 = scalar_select %p8054_p4, 1, 0 }
   0xe   : > { %s9679_s19 = scalar_select %p8059_p6, 1, 0 }
   0xf   : > { %p8064_p8 = pnand %p6255_p5, %p128_p7  ;;  %s140_s22 = sshll.u32 %s7995_s21, 4  ;;  %s8068_s22 = int_to_ptr.vmem [resolvable:$true] %s140_s22 }
  0x10   : > { %s8080_s24 = sadd.s32 1, %s7993_s15   ;;  %s31_s25 = sadd.s32 1, %s7989_s14 }
  0x11   : > { %s9680_s20 = scalar_select %p8064_p8, 1, 0 }
  0x12   : > { %p7628_p9 = pneg %p8064_p8  ;;  %s28_s26 = ssub.s32 %s7993_s15, %s8080_s24 }
  0x13   : > { %s7833_s29 = scalar_lea.hbm %s9642_s1, 9216 }
  0x14   : > { %p8075_p11 = pnand %p7628_p9, %p9645_p1  ;;  %p7834_p12 = scmp.ne.s32.totalorder %s9642_s1, %s7833_s29 }
  0x15   : > { %p7840_p5 = scmp.lt.u32.totalorder %s7833_s29, %s9642_s1 }
  0x16   : > { %p7835_p13 = pneg %p8075_p11 }
  0x18   : > { %p7836_p0 = pnand %p7835_p13, %p7834_p12 }
  0x1a   : > { %p7837_p3 = pneg %p7836_p0 }
  0x1c   : > { %p7842_p7 = pnand %p7840_p5, %p7837_p3 }
  0x1e   : > { %7845 = shalt.err (!%p7842_p7)
}
  0x1f   : > { %s7846_s7 = scalar_lea.vmem %s8068_s22, 9216  ;;  %p7854_p2 = scmp.lt.s32.totalorder %s8068_s22, %s8068_s22 }
  0x20   : > { %p7847_p9 = scmp.ne.s32.totalorder %s8068_s22, %s7846_s7  ;;  %p7855_p6 = scmp.lt.s32.totalorder %s7846_s7, %s7846_s7 }
  0x22   : > { %p7849_p10 = pnand %p7847_p9, %p7835_p13  ;;  %p7856_p4 = por %p7855_p6, %p7854_p2 }
  0x24   : > { %p7850_p1 = pneg %p7849_p10 }
  0x26   : > { %p7857_p8 = pnand %p7856_p4, %p7850_p1 }
  0x28   : > { %7860 = shalt.err (!%p7857_p8)
}
  0x29   : > { %s7996_s8 = smov 64   ;;  %s7997_s9 = smov 4  }
  0x2a   : > { %7631 = dma.hbm_to_vmem [thread:$0]  (!%p8075_p11), %s9642_s1, 9216, %s8068_s22, [#allocation7], %s7996_s8, %s7996_s8, %s7997_s9  }
  0x2b   : > { %p29_p1 = scmp.eq.s32.totalorder %s28_s26, 0  ;;  %p38_p2 = scmp.ne.s32.totalorder %s7989_s14, %s7985_s13 }
  0x2c   : > { %p39_p4 = scmp.eq.s32.totalorder %s7993_s15, 0  ;;  %p7644_p6 = scmp.lt.s32.totalorder %s7993_s15, 2 }
  0x2d   : > { %s8114_s17 = scalar_select %p29_p1, %s7989_s14, %s31_s25  }
  0x2e   : > { %p40_p8 = por %p39_p4, %p38_p2  ;;  %p9682_p10 = scmp.eq.s32.totalorder %s8045_s16, 1 }
  0x2f   : > { %s154_s23 = sand.u32 1, %s7989_s14   ;;  %s6569_s27 = sshll.u32 %s7993_s15, 11 }
  0x30   : > { %p8118_p12 = por %p9682_p10, %p38_p2  ;;  %s6258_s28 = sshll.u32 %s154_s23, 7 }
  0x31   : > { %s8127_s4 = scalar_lea.hbm %s9641_s0, %s6569_s27  ;;  %s158_s22 = scalar_lea.vmem [#allocation3], %s6258_s28 }
  0x32   : > { %s165_s25 = sshll.u32 %s158_s22, 4  ;;  %p8129_p11 = pnand %p7644_p6, %p40_p8  ;;  %s8133_s25 = int_to_ptr.vmem [resolvable:$true] %s165_s25 }
  0x33   : > { %s8135_s5 = scalar_lea.sflag [#allocation4], %s154_s23  ;;  %s7861_s6 = scalar_lea.hbm %s8127_s4, 2048 }
  0x34   : > { %p7862_p13 = scmp.ne.s32.totalorder %s8127_s4, %s7861_s6  ;;  %p7863_p0 = pneg %p8129_p11 }
  0x35   : > { %s7866_s11 = scalar_lea.hbm %s9641_s0, 4096  ;;  %p7867_p7 = scmp.lt.u32.totalorder %s8127_s4, %s9641_s0 }
  0x36   : > { %p7864_p3 = pnand %p7863_p0, %p7862_p13  ;;  %p7868_p9 = scmp.lt.u32.totalorder %s7866_s11, %s7861_s6 }
  0x37   : > { %p7870_p2 = scmp.lt.u32.totalorder %s7861_s6, %s8127_s4 }
  0x38   : > { %p7865_p5 = pneg %p7864_p3  ;;  %p7869_p1 = por %p7868_p9, %p7867_p7 }
  0x3a   : > { %p7871_p4 = por %p7870_p2, %p7869_p1 }
  0x3c   : > { %p7872_p6 = pnand %p7871_p4, %p7865_p5 }
  0x3e   : > { %7875 = shalt.err (!%p7872_p6)
}
  0x3f   : > { %s7876_s23 = scalar_lea.vmem %s8133_s25, 2048  ;;  %s7998_s29 = smov [#allocation3]  }
  0x40   : > { %p7877_p8 = scmp.ne.s32.totalorder %s8133_s25, %s7876_s23  ;;  %s7881_s30 = sshll.u32 %s7998_s29, 4  ;;  %s7882_s30 = int_to_ptr.vmem [resolvable:$false] %s7881_s30 }
  0x41   : > { %s7883_s22 = scalar_lea.vmem %s7882_s30, 4096  ;;  %p7884_p3 = scmp.lt.s32.totalorder %s8133_s25, %s7882_s30 }
  0x42   : > { %p7879_p10 = pnand %p7877_p8, %p7863_p0  ;;  %p7885_p7 = scmp.lt.s32.totalorder %s7883_s22, %s7876_s23 }
  0x44   : > { %p7880_p13 = pneg %p7879_p10  ;;  %p7886_p9 = por %p7885_p7, %p7884_p3 }
  0x46   : > { %p7887_p1 = pnand %p7886_p9, %p7880_p13 }
  0x48   : > { %7890 = shalt.err (!%p7887_p1)
}
  0x49   : > { %7635 = dma.hbm_to_vmem [thread:$0]  (!%p8129_p11), %s8127_s4, 2048, %s8133_s25, %s8135_s5, %s7996_s8, %s7996_s8, %s7997_s9  }
  0x4a   : > { %p9685_p0 = scmp.ne.s32.totalorder %s9680_s20, 0 }
  0x4c   : > { %177 = sbr.rel (%p9685_p0) target bundleno = 784 (0x310), region = 28 }
  0x53   : > { %s8169_s6 = sand.u32 1, %s7985_s13   ;;  %p9686_p5 = scmp.ne.s32.totalorder %s9678_s18, 0 }
  0x54   : > { %s6262_s7 = sshll.u32 %s8169_s6, 7  ;;  %s180_s10 = scalar_lea.sflag [#allocation4], %s8169_s6 }
  0x55   : > { %s8175_s26 = scalar_lea.vmem [#allocation3], %s6262_s7 }
  0x56   : > { %7964 = dma.done.wait (%p9686_p5), %s180_s10, 2048  }
  0x57   : > { %7966 = vsyncadd (%p9686_p5), %s180_s10, 4294965248  ;;  %p9687_p11 = scmp.eq.s32.totalorder %s8045_s16, 0 }
  0x59   : > { %7968 = dma.done.wait (%p9687_p11), [#allocation7], 9216   ;;  %p9688_p2 = pmov %p9687_p11 }
  0x5a   : > { %v7999_v0 = vmov 0   ;;  %v7685_v1 = vld [vmem:[#allocation6 + $0x40] sm:$0xff]   ;;  %v7687_v3 = vld [vmem:[#allocation6 + $0x48] sm:$0xff]   ;;  %v7689_v5 = vld [vmem:[#allocation6 + $0x50] sm:$0xff]   ;;  %vm454_vm0 = vsmask.f32 4368 }
  0x5b   : > { %7970 = vsyncadd (%p9688_p2), [#allocation7], 4294958080  ;;  %218 = vst [vmem:[#allocation2 + $0x8] sm:$0xf] %v7999_v0  ;;  %v7686_v2 = vld [vmem:[#allocation6 + $0x100] sm:$0xff]   ;;  %6914 = vmatprep.subr.bf16.mxu1 %v7685_v1  ;;  %v7688_v4 = vld [vmem:[#allocation6 + $0x108] sm:$0xff]  }
  0x5c   : > { %219 = vst [vmem:[#allocation2 + $0xc] sm:$0xf] %v7999_v0  ;;  %217 = vst [vmem:[#allocation2 + $0x4] sm:$0xf] %v7999_v0  ;;  %7106 = vmatprep.subr.bf16.mxu0 %v7686_v2  ;;  %6915 = vmatpush3.bf16.msra.mxu1 %v7685_v1  ;;  %v7690_v6 = vld [vmem:[#allocation6 + $0x110] sm:$0xff]   ;;  %v7691_v7 = vld [vmem:[#allocation6 + $0x58] sm:$0xff]  }
  0x5d   : > { %220 = vst [vmem:[#allocation2 + $0x10] sm:$0xf] %v7999_v0  ;;  %223 = vst [vmem:[#allocation2 + $0x158] sm:$0xf] %v7999_v0  ;;  %7107 = vmatpush3.bf16.msra.mxu0 %v7686_v2  ;;  %6916 = vmatprep.subr.bf16.mxu1 %v7687_v3  ;;  %v7692_v8 = vld [vmem:[#allocation6 + $0x118] sm:$0xff]   ;;  %v7693_v9 = vld [vmem:[#allocation6 + $0x60] sm:$0xff]  }
  0x5e   : > { %224 = vst [vmem:[#allocation2 + $0x15c] sm:$0xf] %v7999_v0  ;;  %225 = vst [vmem:[#allocation2 + $0x160] sm:$0xf] %v7999_v0  ;;  %7108 = vmatprep.subr.bf16.mxu0 %v7688_v4  ;;  %v7694_v10 = vld [vmem:[#allocation6 + $0x120] sm:$0xff]   ;;  %v7695_v11 = vld [vmem:[#allocation6 + $0x68] sm:$0xff]  }
  0x5f   : > { %226 = vst [vmem:[#allocation2 + $0x164] sm:$0xf] %v7999_v0  ;;  %v341_v14 = vld [vmem:[%s8175_s26] sm:$0xff]   ;;  %v7696_v15 = vld [vmem:[#allocation6 + $0x128] sm:$0xff]   ;;  %vm285_vm1 = vsmask.f32 256 }
  0x60   : > { %6917 = vmatpush3.bf16.msra.mxu1 %v7687_v3  ;;  %374 = vst [vmem:[#allocation2 + $0x1c] sm:$0xff] %v341_v14   ;;  %v343_v20 = vld [vmem:[%s8175_s26 + $0x8] sm:$0xff]   ;;  %vm8195_vm2 = vmor %vm285_vm1, %vm454_vm0  ;;  %v7697_v24 = vld [vmem:[#allocation6 + $0x70] sm:$0xff]   ;;  %vm284_vm3 = vcmask 1040384   ;;  %vm1467_vm4 = vsmask.f32 3328 }
  0x61   : > { %7109 = vmatpush3.bf16.msra.mxu0 %v7688_v4  ;;  %6918 = vmatprep.subr.bf16.mxu1 %v7689_v5  ;;  %376 = vst [vmem:[#allocation2 + $0x30] sm:$0xff] %v343_v20   ;;  %v7698_v25 = vld [vmem:[#allocation6 + $0x130] sm:$0xff]   ;;  %v347_v29 = vld [vmem:[%s8175_s26 + $0x18] sm:$0xff]   ;;  %v7704_v43 = vld [vmem:[#allocation6] sm:$0xff]   ;;  %vm1468_vm5 = vsmask.f32 7440 }
  0x62   : > { %7110 = vmatprep.subr.bf16.mxu0 %v7690_v6  ;;  %v8185_v12 = vld [vmem:[#allocation2 + $0x8] sm:$0xf]  ;;  %v345_v28 = vld [vmem:[%s8175_s26 + $0x10] sm:$0xff]   ;;  %v7699_v30 = vld [vmem:[#allocation6 + $0x78] sm:$0xff]   ;;  %380 = vst [vmem:[#allocation2 + $0x58] sm:$0xff] %v347_v29   ;;  %vm227_vm8 = vcmask 1043459  }
  0x63   : > { %v408_v13 = vld [vmem:[#allocation2 + $0xc] sm:$0xf]  ;;  %v462_v16 = vshrl.u32 %v8185_v12, 16  ;;  %378 = vst [vmem:[#allocation2 + $0x44] sm:$0xff] %v345_v28   ;;  %v7700_v32 = vld [vmem:[#allocation6 + $0x138] sm:$0xff]   ;;  %v465_v39 = vshll.u32 %v8185_v12, 16  ;;  %vm8483_vm6 = vmand %vm284_vm3, %vm285_vm1 }
  0x64   : > { %6919 = vmatpush3.bf16.msra.mxu1 %v7689_v5  ;;  %v471_v17 = vshrl.u32 %v408_v13, 16  ;;  %v474_v18 = vshll.u32 %v408_v13, 16  ;;  %v6282_v19 = vcombine.low %v8185_v12, %v408_v13  ;;  %v349_v48 = vld [vmem:[%s8175_s26 + $0x20] sm:$0xff]   ;;  %v7707_v2 = vld [vmem:[#allocation6 + $0x148] sm:$0xff]   ;;  %vm8561_vm7 = vmor %vm1467_vm4, %vm1468_vm5  ;;  %vm228_vm9 = vsmask.f32 7950 }
  0x65   : > { %7111 = vmatpush3.bf16.msra.mxu0 %v7690_v6  ;;  %6920 = vmatprep.subr.bf16.mxu1 %v7691_v7  ;;  %v8191_v21 = vrot.slane %v462_v16, 7  ;;  %382 = vst [vmem:[#allocation2 + $0x6c] sm:$0xff] %v349_v48   ;;  %v7706_v58 = vld [vmem:[#allocation6 + $0x140] sm:$0xff]   ;;  %vm8726_vm10 = vmand %vm227_vm8, %vm228_vm9  ;;  %s9537_s18 = scalar_lea.vmem [#allocation8], %s6262_s7  ;;  %s6602_s20 = sshll.u32 %s8045_s16, 11 }
  0x66   : > { %7112 = vmatprep.subr.bf16.mxu0 %v7692_v8  ;;  %v473_v22 = vrot.slane %v471_v17, 7  ;;  %6930 = vmatprep.mubr.bf16.mxu1 %v6282_v19  ;;  %v7711_v17 = vld [vmem:[#allocation6 + $0x8] sm:$0xff]   ;;  %v355_v19 = vld [vmem:[%s8175_s26 + $0x38] sm:$0xff]   ;;  %s6126_s8 = sshll.u32 %s9537_s18, 4  ;;  %s9562_s25 = scalar_lea.hbm %s9643_s2, %s6602_s20  ;;  %s9564_s8 = int_to_ptr.vmem [resolvable:$true] %s6126_s8 }
  0x67   : > { %v469_v26 = vrot.slane %v8191_v21, 4  ;;  %v8206_v33 = vld [vmem:[#allocation2 + $0x1c] sm:$0xf]  ;;  %v8208_v34 = vld [vmem:[#allocation2 + $0x20] sm:$0xf]  ;;  %388 = vst [vmem:[#allocation2 + $0xa8] sm:$0xff] %v355_v19  }
  0x68   : > { %6921 = vmatpush3.bf16.msra.mxu1 %v7691_v7  ;;  %v476_v27 = vor.u32 %v474_v18, %v473_v22  ;;  %v2230_v35 = vshrl.u32 %v8206_v33, 16  ;;  %v2239_v36 = vshrl.u32 %v8208_v34, 16  ;;  %v8212_v37 = vld [vmem:[#allocation2 + $0x1c] sm:$0xf]  ;;  %v8214_v38 = vld [vmem:[#allocation2 + $0x20] sm:$0xf]  ;;  %v6394_v40 = vcombine.low %v8206_v33, %v8208_v34 }
  0x69   : > { %7113 = vmatpush3.bf16.msra.mxu0 %v7692_v8  ;;  %6922 = vmatprep.subr.bf16.mxu1 %v7693_v9  ;;  %v484_v41 = vshrl.u32 %v8212_v37, 16  ;;  %v493_v42 = vshrl.u32 %v8214_v38, 16  ;;  %v2233_v45 = vshll.u32 %v8206_v33, 16  ;;  %v2242_v46 = vshll.u32 %v8208_v34, 16  ;;  %v8225_v47 = vld [vmem:[#allocation2 + $0x30] sm:$0xf] }
  0x6a   : > { %7114 = vmatprep.subr.bf16.mxu0 %v7694_v10  ;;  %v8204_v31 = vsel %vm8195_vm2, %v469_v26, %v476_v27  ;;  %v8221_v44 = vrot.slane %v2230_v35, 7  ;;  %v8228_v49 = vrot.slane %v2239_v36, 7  ;;  %v487_v51 = vshll.u32 %v8212_v37, 16  ;;  %v8233_v52 = vld [vmem:[#allocation2 + $0x34] sm:$0xf]  ;;  %7122 = vmatprep.mubr.bf16.mxu0 %v6394_v40  ;;  %v7725_v40 = vld [vmem:[#allocation6 + $0x18] sm:$0xff]  }
  0x6b   : > { %v8230_v50 = vrot.slane %v484_v41, 7  ;;  %v2252_v53 = vshrl.u32 %v8225_v47, 16  ;;  %v8236_v54 = vrot.slane %v493_v42, 7  ;;  %v496_v55 = vshll.u32 %v8214_v38, 16  ;;  %v8246_v62 = vld [vmem:[#allocation2 + $0x30] sm:$0xf] }
  0x6c   : > { %6923 = vmatpush3.bf16.msra.mxu1 %v7693_v9  ;;  %9691 = vst [vmem:[#allocation15_spill] sm:$0xff] %v8221_v44  ;;  %v2255_v56 = vshll.u32 %v8225_v47, 16  ;;  %v2261_v57 = vshrl.u32 %v8233_v52, 16  ;;  %v6283_v60 = vcombine.low %v8212_v37, %v8214_v38  ;;  %v8248_v63 = vld [vmem:[#allocation2 + $0x34] sm:$0xf]  ;;  %v6395_v1 = vcombine.low %v8225_v47, %v8233_v52  ;;  %s6108_s5 = scalar_lea.sflag [#allocation5], %s8169_s6 }
  0x6d   : > { %7115 = vmatpush3.bf16.msra.mxu0 %v7694_v10  ;;  %6924 = vmatprep.subr.bf16.mxu1 %v7695_v11  ;;  %v8244_v61 = vrot.slane %v2252_v53, 7  ;;  %v491_v0 = vrot.slane %v8230_v50, 4  ;;  %v506_v3 = vshrl.u32 %v8246_v62, 16  ;;  %v8254_v4 = vld [vmem:[#allocation2 + $0x44] sm:$0xf]  ;;  %v515_v8 = vshrl.u32 %v8248_v63, 16 }
  0x6e   : > { %7116 = vmatprep.subr.bf16.mxu0 %v7696_v15  ;;  %9693 = vst [vmem:[#allocation17_spill] sm:$0xff] %v8254_v4  ;;  %v8256_v5 = vld [vmem:[#allocation2 + $0x48] sm:$0xf]  ;;  %v8258_v6 = vrot.slane %v2261_v57, 7  ;;  %v8262_v9 = vld [vmem:[#allocation2 + $0x44] sm:$0xf]  ;;  %v8388_v12 = vor.u32 %v2242_v46, %v8228_v49  ;;  %v8398_v33 = vor.u32 %v487_v51, %v8230_v50 }
  0x6f   : > { %9692 = vst [vmem:[#allocation16_spill] sm:$0xff] %v8244_v61  ;;  %9694 = vst [vmem:[#allocation18_spill] sm:$0xff] %v8256_v5  ;;  %v351_v10 = vld [vmem:[%s8175_s26 + $0x28] sm:$0xff]   ;;  %v8266_v13 = vrot.slane %v506_v3, 7  ;;  %v8271_v16 = vld [vmem:[#allocation2 + $0x48] sm:$0xf]  ;;  %v6396_v27 = vcombine.low %v8254_v4, %v8256_v5  ;;  %v8403_v34 = vor.u32 %v2255_v56, %v8244_v61 }
  0x70   : > { %6925 = vmatpush3.bf16.msra.mxu1 %v7695_v11  ;;  %384 = vst [vmem:[#allocation2 + $0x80] sm:$0xff] %v351_v10   ;;  %v8273_v18 = vrot.slane %v515_v8, 7  ;;  %v2274_v20 = vshrl.u32 %v8254_v4, 16  ;;  %v2283_v22 = vshrl.u32 %v8256_v5, 16  ;;  %v528_v28 = vshrl.u32 %v8262_v9, 16  ;;  %v7714_v8 = vld [vmem:[#allocation6 + $0x158] sm:$0xff]  }
  0x71   : > { %7117 = vmatpush3.bf16.msra.mxu0 %v7696_v15  ;;  %6926 = vmatprep.subr.bf16.mxu1 %v7697_v24  ;;  %v6284_v15 = vcombine.low %v8246_v62, %v8248_v63  ;;  %v8285_v29 = vld [vmem:[#allocation2 + $0x5c] sm:$0xf]  ;;  %v537_v41 = vshrl.u32 %v8271_v16, 16  ;;  %v8295_v42 = vld [vmem:[#allocation2 + $0x58] sm:$0xf]  ;;  %9708 = vst [vmem:[#allocation32_spill] sm:$0xff] %v8388_v12 }
  0x72   : > { %7118 = vmatprep.subr.bf16.mxu0 %v7698_v25  ;;  %9696 = vst [vmem:[#allocation20_spill] sm:$0xff] %v8285_v29  ;;  %v8289_v35 = vrot.slane %v2274_v20, 7  ;;  %v8291_v36 = vrot.slane %v2283_v22, 7  ;;  %v2305_v3 = vshrl.u32 %v8285_v29, 16  ;;  %v8310_v10 = vld [vmem:[#allocation2 + $0x6c] sm:$0xf] }
  0x73   : > { %9699 = vst [vmem:[#allocation23_spill] sm:$0xff] %v8310_v10  ;;  %9709 = vst [vmem:[#allocation33_spill] sm:$0xff] %v8403_v34  ;;  %v7721_v37 = vld [vmem:[#allocation6 + $0x168] sm:$0xff]   ;;  %v7743_v34 = vld [vmem:[#allocation6 + $0x38] sm:$0xff]   ;;  %s7891_s11 = scalar_lea.vmem %s9564_s8, 2048  ;;  %s8000_s27 = smov [#allocation8]  }
  0x74   : > { %6927 = vmatpush3.bf16.msra.mxu1 %v7697_v24  ;;  %v8278_v24 = vld [vmem:[#allocation2 + $0x58] sm:$0xf]  ;;  %9697 = vst [vmem:[#allocation21_spill] sm:$0xff] %v8289_v35  ;;  %9698 = vst [vmem:[#allocation22_spill] sm:$0xff] %v8291_v36  ;;  %v8321_v57 = vrot.slane %v2305_v3, 7  ;;  %p7892_p4 = scmp.ne.s32.totalorder %s9564_s8, %s7891_s11  ;;  %s7895_s28 = sshll.u32 %s8000_s27, 4  ;;  %s7896_s28 = int_to_ptr.vmem [resolvable:$false] %s7895_s28 }
  0x75   : > { %7119 = vmatpush3.bf16.msra.mxu0 %v7698_v25  ;;  %6928 = vmatprep.subr.bf16.mxu1 %v7699_v30  ;;  %9695 = vst [vmem:[#allocation19_spill] sm:$0xff] %v8278_v24  ;;  %v2296_v53 = vshrl.u32 %v8278_v24, 16  ;;  %v6397_v22 = vcombine.low %v8278_v24, %v8285_v29  ;;  %v2318_v25 = vshrl.u32 %v8310_v10, 16  ;;  %v8332_v3 = vld [vmem:[#allocation2 + $0x70] sm:$0xf]  ;;  %s7897_s23 = scalar_lea.vmem %s7896_s28, 4096  ;;  %p7898_p10 = scmp.lt.s32.totalorder %s9564_s8, %s7896_s28 }
  0x76   : > { %7120 = vmatprep.subr.bf16.mxu0 %v7700_v32  ;;  %9702 = vst [vmem:[#allocation26_spill] sm:$0xff] %v8321_v57  ;;  %v581_v38 = vshrl.u32 %v8332_v3, 16  ;;  %p7893_p6 = pnand %p7892_p4, %p8118_p12  ;;  %p7899_p13 = scmp.lt.s32.totalorder %s7897_s23, %s7891_s11 }
  0x77   : > { %v8313_v20 = vrot.slane %v2296_v53, 7  ;;  %v8345_v14 = vrot.slane %v2318_v25, 7  ;;  %v8407_v46 = vld [vmem:[#allocation2 + $0x84] sm:$0xf] }
  0x78   : > { %6929 = vmatpush3.bf16.msra.mxu1 %v7699_v30  ;;  %v7713_v30 = vld [vmem:[#allocation6 + $0x150] sm:$0xff]   ;;  %v603_v50 = vshrl.u32 %v8407_v46, 16  ;;  %p7894_p8 = pneg %p7893_p6  ;;  %p7900_p3 = por %p7899_p13, %p7898_p10 }
  0x79   : > { %7121 = vmatpush3.bf16.msra.mxu0 %v7700_v32  ;;  %6962 = vmatprep.subr.bf16.mxu1 %v7704_v43  ;;  %v8287_v32 = vld [vmem:[#allocation6 + $0x10] sm:$0xff]   ;;  %9700 = vst [vmem:[#allocation24_spill] sm:$0xff] %v8313_v20  ;;  %9703 = vst [vmem:[#allocation27_spill] sm:$0xff] %v8345_v14 }
  0x7a   : > { %7154 = vmatprep.subr.bf16.mxu0 %v7706_v58  ;;  %p7901_p7 = pnand %p7900_p3, %p7894_p8 }
  0x7b   : > { %6931 = vmatmul.mubr.bf16.vlgmr.msra.gmra.mrb[0].mxu1 %v6283_v60  ;;  %v8304_v60 = vrot.slane %v537_v41, 7  ;;  %v8319_v41 = vld [vmem:[#allocation2 + $0x70] sm:$0xf] }
  0x7c   : > { %7123 = vmatmul.mubr.bf16.vlgmr.msra.gmra.mrb[0].mxu0 %v6395_v1  ;;  %6963 = vmatpush3.bf16.msra.mxu1 %v7704_v43  ;;  %v8297_v43 = vrot.slane %v528_v28, 7  ;;  %v6285_v1 = vcombine.low %v8262_v9, %v8271_v16  ;;  %9701 = vst [vmem:[#allocation25_spill] sm:$0xff] %v8319_v41  ;;  %v6398_v26 = vcombine.low %v8310_v10, %v8319_v41 }
  0x7d   : > { %7155 = vmatpush3.bf16.msra.mxu0 %v7706_v58  ;;  %6934 = vmatprep.mubr.bf16.mxu1 %v6284_v15  ;;  %v8302_v58 = vld [vmem:[#allocation2 + $0x5c] sm:$0xf] }
  0x7e   : > { %7156 = vmatprep.subr.bf16.mxu0 %v7707_v2  ;;  %7126 = vmatprep.mubr.bf16.mxu0 %v6396_v27  ;;  %v353_v15 = vld [vmem:[%s8175_s26 + $0x30] sm:$0xff]   ;;  %v550_v27 = vshrl.u32 %v8295_v42, 16  ;;  %v559_v28 = vshrl.u32 %v8302_v58, 16  ;;  %v6286_v53 = vcombine.low %v8295_v42, %v8302_v58 }
  0x7f   : > { %6964 = vmatprep.subr.bf16.mxu1 %v7711_v17  ;;  %386 = vst [vmem:[#allocation2 + $0x94] sm:$0xff] %v353_v15   ;;  %v498_v15 = vor.u32 %v496_v55, %v8236_v54  ;;  %v8349_v54 = vld [vmem:[#allocation2 + $0x80] sm:$0xf]  ;;  %v7720_v55 = vld [vmem:[#allocation6 + $0x160] sm:$0xff]  }
  0x80   : > { %6965 = vmatpush3.bf16.msra.mxu1 %v7711_v17  ;;  %v8327_v17 = vld [vmem:[#allocation2 + $0x6c] sm:$0xf]  ;;  %v8337_v59 = vrot.slane %v550_v27, 7  ;;  %v8343_v11 = vrot.slane %v559_v28, 7  ;;  %9704 = vst [vmem:[#allocation28_spill] sm:$0xff] %v8349_v54  ;;  %v2340_v25 = vshrl.u32 %v8349_v54, 16 }
  0x81   : > { %7157 = vmatpush3.bf16.msra.mxu0 %v7707_v2  ;;  %6966 = vmatprep.subr.bf16.mxu1 %v8287_v32  ;;  %v2327_v2 = vshrl.u32 %v8319_v41, 16  ;;  %v572_v48 = vshrl.u32 %v8327_v17, 16  ;;  %v8355_v28 = vld [vmem:[#allocation2 + $0x84] sm:$0xf]  ;;  %v357_v27 = vld [vmem:[%s8175_s26 + $0x40] sm:$0xff]   ;;  %v8378_v19 = vsel %vm8195_vm2, %v491_v0, %v498_v15 }
  0x82   : > { %7158 = vmatprep.subr.bf16.mxu0 %v7713_v30  ;;  %9706 = vst [vmem:[#allocation30_spill] sm:$0xff] %v8355_v28  ;;  %390 = vst [vmem:[#allocation2 + $0xbc] sm:$0xff] %v357_v27   ;;  %v7731_v0 = vld [vmem:[#allocation6 + $0x20] sm:$0xff]  }
  0x83   : > { %6935 = vmatmul.mubr.bf16.gmra.mrb[4].mxu1 %v6285_v1  ;;  %v8351_v1 = vrot.slane %v2327_v2, 7  ;;  %v8369_v2 = vrot.slane %v581_v38, 7  ;;  %v8393_v38 = vld [vmem:[#allocation2 + $0x80] sm:$0xf] }
  0x84   : > { %7127 = vmatmul.mubr.bf16.gmra.mrb[4].mxu0 %v6397_v22  ;;  %6938 = vmatprep.mubr.bf16.mxu1 %v6286_v53  ;;  %v8358_v53 = vrot.slane %v572_v48, 7  ;;  %v6287_v48 = vcombine.low %v8327_v17, %v8332_v3  ;;  %v594_v49 = vshrl.u32 %v8393_v38, 16  ;;  %v6288_v47 = vcombine.low %v8393_v38, %v8407_v46 }
  0x85   : > { %7159 = vmatpush3.bf16.msra.mxu0 %v7713_v30  ;;  %9705 = vst [vmem:[#allocation29_spill] sm:$0xff] %v8351_v1  ;;  %7130 = vmatprep.mubr.bf16.mxu0 %v6398_v26  ;;  %v2349_v30 = vshrl.u32 %v8355_v28, 16  ;;  %v8367_v26 = vor.u32 %v465_v39, %v8191_v21  ;;  %v6399_v39 = vcombine.low %v8349_v54, %v8355_v28  ;;  %v9716_v28 = vshll.u32 %v8233_v52, 16 }
  0x86   : > { %7160 = vmatprep.subr.bf16.mxu0 %v7714_v8  ;;  %6967 = vmatpush3.bf16.msra.mxu1 %v8287_v32  ;;  %v8383_v32 = vor.u32 %v2233_v45, %v8221_v44  ;;  %v8405_v45 = vrot.slane %v2340_v25, 7  ;;  %v8410_v15 = vld [vmem:[#allocation2 + $0x94] sm:$0xf]  ;;  %v8417_v51 = vld [vmem:[#allocation2 + $0x98] sm:$0xf] }
  0x87   : > { %6968 = vmatprep.subr.bf16.mxu1 %v7725_v40  ;;  %9711 = vst [vmem:[#allocation35_spill] sm:$0xff] %v8410_v15  ;;  %v8412_v27 = vrot.slane %v2349_v30, 7  ;;  %9713 = vst [vmem:[#allocation37_spill] sm:$0xff] %v8417_v51  ;;  %v2362_v56 = vshrl.u32 %v8410_v15, 16  ;;  %v2371_v21 = vshrl.u32 %v8417_v51, 16  ;;  %v8434_v30 = vld [vmem:[#allocation6 + $0x170] sm:$0xff]   ;;  %v8445_v22 = vor.u32 %v9716_v28, %v8258_v6 }
  0x88   : > { %9707 = vst [vmem:[#allocation31_spill] sm:$0xff] %v8383_v32  ;;  %9710 = vst [vmem:[#allocation34_spill] sm:$0xff] %v8405_v45  ;;  %v8425_v7 = vld [vmem:[#allocation2 + $0x94] sm:$0xf] }
  0x89   : > { %7161 = vmatpush3.bf16.msra.mxu0 %v7714_v8  ;;  %9712 = vst [vmem:[#allocation36_spill] sm:$0xff] %v8412_v27  ;;  %v8420_v8 = vrot.slane %v594_v49, 7  ;;  %v616_v49 = vshrl.u32 %v8425_v7, 16  ;;  %v359_v25 = vld [vmem:[%s8175_s26 + $0x48] sm:$0xff]   ;;  %v605_v27 = vrot.slane %v603_v50, 7  ;;  %v8437_v54 = vrot.slane %v2362_v56, 7 }
  0x8a   : > { %7162 = vmatprep.subr.bf16.mxu0 %v7720_v55  ;;  %6969 = vmatpush3.bf16.msra.mxu1 %v7725_v40  ;;  %v6400_v40 = vcombine.low %v8410_v15, %v8417_v51  ;;  %392 = vst [vmem:[#allocation2 + $0xd0] sm:$0xff] %v359_v25   ;;  %9717 = vst [vmem:[#allocation40_spill] sm:$0xff] %v8445_v22  ;;  %v8448_v15 = vld [vmem:[#allocation2 + $0xa8] sm:$0xf]  ;;  %v9719_v50 = vshll.u32 %v8246_v62, 16  ;;  %v9720_v56 = vshll.u32 %v8248_v63, 16 }
  0x8b   : > { %6939 = vmatmul.mubr.bf16.gmra.mrb[8].mxu1 %v6287_v48  ;;  %6970 = vmatprep.subr.bf16.mxu1 %v7731_v0  ;;  %v8431_v48 = vld [vmem:[#allocation2 + $0x98] sm:$0xf]  ;;  %9714 = vst [vmem:[#allocation38_spill] sm:$0xff] %v8437_v54  ;;  %9718 = vst [vmem:[#allocation41_spill] sm:$0xff] %v8448_v15  ;;  %v8461_v52 = vrot.slane %v616_v49, 7  ;;  %v2384_v51 = vshrl.u32 %v8448_v15, 16 }
  0x8c   : > { %7131 = vmatmul.mubr.bf16.gmra.mrb[8].mxu0 %v6399_v39  ;;  %6942 = vmatprep.mubr.bf16.mxu1 %v6288_v47  ;;  %v8439_v39 = vrot.slane %v2371_v21, 7  ;;  %v625_v47 = vshrl.u32 %v8431_v48, 16  ;;  %v8454_v21 = vor.u32 %v9719_v50, %v8266_v13  ;;  %v8459_v25 = vor.u32 %v9720_v56, %v8273_v18  ;;  %v7735_v62 = vld [vmem:[#allocation6 + $0x28] sm:$0xff]   ;;  %v7728_v49 = vld [vmem:[#allocation6 + $0x178] sm:$0xff]  }
  0x8d   : > { %7163 = vmatpush3.bf16.msra.mxu0 %v7720_v55  ;;  %7134 = vmatprep.mubr.bf16.mxu0 %v6400_v40  ;;  %v361_v55 = vld [vmem:[%s8175_s26 + $0x50] sm:$0xff]   ;;  %v6289_v28 = vcombine.low %v8425_v7, %v8431_v48  ;;  %v8466_v40 = vld [vmem:[#allocation2 + $0xac] sm:$0xf]  ;;  %v9722_v56 = vshll.u32 %v8262_v9, 16  ;;  %v9726_v9 = vshll.u32 %v8295_v42, 16 }
  0x8e   : > { %9715 = vst [vmem:[#allocation39_spill] sm:$0xff] %v8439_v39  ;;  %7164 = vmatprep.subr.bf16.mxu0 %v7721_v37  ;;  %9721 = vst [vmem:[#allocation42_spill] sm:$0xff] %v8466_v40  ;;  %6971 = vmatpush3.bf16.msra.mxu1 %v7731_v0  ;;  %v8469_v50 = vrot.slane %v625_v47, 7  ;;  %v2393_v63 = vshrl.u32 %v8466_v40, 16  ;;  %v6401_v18 = vcombine.low %v8448_v15, %v8466_v40  ;;  %v9725_v39 = vshll.u32 %v8271_v16, 16  ;;  %v363_v40 = vld [vmem:[%s8175_s26 + $0x58] sm:$0xff]  }
  0x8f   : > { %394 = vst [vmem:[#allocation2 + $0xe4] sm:$0xff] %v361_v55   ;;  %v8477_v6 = vor.u32 %v9722_v56, %v8297_v43  ;;  %6972 = vmatprep.subr.bf16.mxu1 %v7735_v62  ;;  %v8497_v56 = vrot.slane %v2384_v51, 7  ;;  %v8500_v47 = vld [vmem:[#allocation2 + $0xa8] sm:$0xf]  ;;  %v8502_v0 = vld [vmem:[#allocation2 + $0xac] sm:$0xf] }
  0x90   : > { %v8490_v54 = vor.u32 %v9725_v39, %v8304_v60  ;;  %v9728_v15 = vshll.u32 %v8302_v58, 16  ;;  %v9729_v60 = vshll.u32 %v8327_v17, 16  ;;  %v9730_v51 = vshll.u32 %v8332_v3, 16  ;;  %396 = vst [vmem:[#allocation2 + $0xf8] sm:$0xff] %v363_v40   ;;  %v435_v10 = vld [vmem:[#allocation2 + $0xc0] sm:$0xf] }
  0x91   : > { %7165 = vmatpush3.bf16.msra.mxu0 %v7721_v37  ;;  %v8495_v37 = vor.u32 %v9726_v9, %v8337_v59  ;;  %9727 = vst [vmem:[#allocation43_spill] sm:$0xff] %v8497_v56  ;;  %v8520_v9 = vrot.slane %v2393_v63, 7  ;;  %v638_v56 = vshrl.u32 %v8500_v47, 16  ;;  %v6290_v17 = vcombine.low %v8500_v47, %v8502_v0  ;;  %v365_v63 = vld [vmem:[%s8175_s26 + $0x60] sm:$0xff]  }
  0x92   : > { %7166 = vmatprep.subr.bf16.mxu0 %v8434_v30  ;;  %v8508_v16 = vor.u32 %v9728_v15, %v8343_v11  ;;  %v8513_v42 = vor.u32 %v9729_v60, %v8358_v53  ;;  %v8518_v39 = vor.u32 %v9730_v51, %v8369_v2  ;;  %v647_v11 = vshrl.u32 %v8502_v0, 16  ;;  %v290_v15 = vld [vmem:[#allocation2 + $0x24] sm:$0x1]  ;;  %v3252_v2 = vld [vmem:[#allocation2 + $0x1c] sm:$0xf]  ;;  %6973 = vmatpush3.bf16.msra.mxu1 %v7735_v62 }
  0x93   : > { %6943 = vmatmul.mubr.bf16.gmra.mrb[12].mxu1 %v6289_v28  ;;  %9731 = vst [vmem:[#allocation44_spill] sm:$0xff] %v8520_v9  ;;  %v291_v3 = vsel %vm8483_vm6, 0, %v290_v15  ;;  %v3253_v60 = vld [vmem:[#allocation2 + $0x20] sm:$0xf]  ;;  %v8529_v28 = vld [vmem:[#allocation6 + $0x180] sm:$0xff]   ;;  %v9732_v51 = vshll.u32 %v8393_v38, 16 }
  0x94   : > { %7135 = vmatmul.mubr.bf16.gmra.mrb[12].mxu0 %v6401_v18  ;;  %v9733_v40 = vshll.u32 %v8407_v46, 16  ;;  %v8542_v9 = vrot.slane %v638_v56, 7  ;;  %v650_v15 = vshll.u32 %v8502_v0, 16  ;;  %292 = vst [vmem:[#allocation2 + $0x24] sm:$0x1] %v291_v3  ;;  %v3301_v45 = vshrl.u32 %v3252_v2, 16  ;;  %6946 = vmatprep.mubr.bf16.mxu1 %v6290_v17 }
  0x95   : > { %v8535_v58 = vor.u32 %v9732_v51, %v8420_v8  ;;  %7167 = vmatpush3.bf16.msra.mxu0 %v8434_v30  ;;  %v3304_v41 = vshll.u32 %v3252_v2, 16  ;;  %v434_v62 = vld [vmem:[#allocation2 + $0xbc] sm:$0xf]  ;;  %398 = vst [vmem:[#allocation2 + $0x10c] sm:$0xff] %v365_v63   ;;  %v649_v1 = vrot.slane %v647_v11, 7  ;;  %v3310_v38 = vshll.u32 %v3253_v60, 16 }
  0x96   : > { %v8539_v18 = vor.u32 %v9733_v40, %v605_v27  ;;  %7168 = vmatprep.subr.bf16.mxu0 %v7728_v49  ;;  %v3314_v51 = vshrl.u32 %v3253_v60, 16  ;;  %v660_v46 = vshrl.u32 %v434_v62, 16  ;;  %v3303_v27 = vrot.slane %v3301_v45, 4  ;;  %v7739_v2 = vld [vmem:[#allocation6 + $0x30] sm:$0xff]   ;;  %v3255_v60 = vld [vmem:[#allocation2 + $0x30] sm:$0xf] }
  0x97   : > { %v3306_v40 = vrot.slane %v3304_v41, 5  ;;  %v663_v14 = vshll.u32 %v434_v62, 16  ;;  %v669_v30 = vshrl.u32 %v435_v10, 16  ;;  %v8545_v56 = vrot.slane %v3310_v38, 5  ;;  %v293_v17 = vld [vmem:[#allocation2 + $0x38] sm:$0x1]  ;;  %6974 = vmatprep.subr.bf16.mxu1 %v7739_v2 }
  0x98   : > { %v3316_v29 = vrot.slane %v3314_v51, 4  ;;  %v672_v0 = vshll.u32 %v435_v10, 16  ;;  %v6291_v3 = vcombine.low %v434_v62, %v435_v10  ;;  %v8547_v57 = vrot.slane %v660_v46, 7  ;;  %v3256_v62 = vld [vmem:[#allocation2 + $0x34] sm:$0xf]  ;;  %6975 = vmatpush3.bf16.msra.mxu1 %v7739_v2 }
  0x99   : > { %7169 = vmatpush3.bf16.msra.mxu0 %v7728_v49  ;;  %v3307_v63 = vor.u32 %v3306_v40, %v3303_v27  ;;  %v671_v11 = vrot.slane %v669_v30, 7  ;;  %v9734_v45 = vshll.u32 %v8425_v7, 16  ;;  %v294_v10 = vsel %vm8483_vm6, 0, %v293_v17  ;;  %v367_v46 = vld [vmem:[%s8175_s26 + $0x68] sm:$0xff]   ;;  %v369_v30 = vld [vmem:[%s8175_s26 + $0x70] sm:$0xff]   ;;  %6976 = vmatprep.subr.bf16.mxu1 %v7743_v34 }
  0x9a   : > { %v3317_v38 = vor.u32 %v3316_v29, %v8545_v56  ;;  %v3325_v51 = vshrl.u32 %v3255_v60, 16  ;;  %v3328_v49 = vshll.u32 %v3255_v60, 16  ;;  %7202 = vmatprep.subr.bf16.mxu0 %v8529_v28  ;;  %295 = vst [vmem:[#allocation2 + $0x38] sm:$0x1] %v294_v10  ;;  %v3334_v29 = vshll.u32 %v3256_v62, 16  ;;  %400 = vst [vmem:[#allocation2 + $0x120] sm:$0xff] %v367_v46  }
  0x9b   : > { %v8552_v41 = vor.u32 %v9734_v45, %v8461_v52  ;;  %v3308_v7 = vrot.slane %v3307_v63, 4  ;;  %6947 = vmatmul.mubr.bf16.gmra.mrb[16].mxu1 %v6291_v3  ;;  %v3338_v40 = vshrl.u32 %v3256_v62, 16  ;;  %v9737_v17 = vshll.u32 %v8431_v48, 16  ;;  %v3254_v45 = vld [vmem:[#allocation2 + $0x24] sm:$0x1]  ;;  %402 = vst [vmem:[#allocation2 + $0x134] sm:$0xff] %v369_v30  }
  0x9c   : > { %v3327_v24 = vrot.slane %v3325_v51, 4  ;;  %v3330_v20 = vrot.slane %v3328_v49, 5  ;;  %v9738_v63 = vshll.u32 %v8500_v47, 16  ;;  %v8576_v10 = vor.u32 %v650_v15, %v649_v1  ;;  %v8581_v51 = vld [vmem:[#allocation2 + $0xd0] sm:$0xf]  ;;  %6977 = vmatpush3.bf16.msra.mxu1 %v7743_v34 }
  0x9d   : > { %v8569_v60 = vor.u32 %v9737_v17, %v8469_v50  ;;  %v3318_v62 = vrot.slane %v3317_v38, 4  ;;  %v3320_v46 = vshll.u32 %v3254_v45, 16  ;;  %v3336_v5 = vrot.slane %v3334_v29, 5  ;;  %v8583_v2 = vld [vmem:[#allocation2 + $0xd4] sm:$0xf] }
  0x9e   : > { %v8574_v3 = vor.u32 %v9738_v63, %v8542_v9  ;;  %v3340_v36 = vrot.slane %v3338_v40, 4  ;;  %v3313_v48 = vsel %vm8561_vm7, %v3308_v7, %v8545_v56  ;;  %v3331_v50 = vor.u32 %v3330_v20, %v3327_v24  ;;  %v296_v49 = vld [vmem:[#allocation2 + $0x4c] sm:$0x1]  ;;  %v3258_v30 = vld [vmem:[#allocation2 + $0x44] sm:$0xf] }
  0x9f   : > { %v8586_v47 = vor.u32 %v663_v14, %v8547_v57  ;;  %v8588_v1 = vor.u32 %v672_v0, %v671_v11  ;;  %v3322_v15 = vrot.slane %v3320_v46, 5  ;;  %v682_v29 = vshrl.u32 %v8581_v51, 16  ;;  %v8592_v56 = vld [vmem:[#allocation6 + $0x80] sm:$0xff]   ;;  %v8604_v63 = vld [vmem:[#allocation2 + $0xe4] sm:$0xf] }
  0xa0   : > { %9739 = vst [vmem:[#allocation45_spill] sm:$0xff] %v8574_v3  ;;  %v3341_v38 = vor.u32 %v3340_v36, %v3336_v5  ;;  %v3332_v24 = vrot.slane %v3331_v50, 4  ;;  %v691_v20 = vshrl.u32 %v8583_v2, 16  ;;  %v6292_v14 = vcombine.low %v8581_v51, %v8583_v2  ;;  %v3259_v17 = vld [vmem:[#allocation2 + $0x48] sm:$0xf]  ;;  %7010 = vmatprep.subr.bf16.mxu1 %v8592_v56 }
  0xa1   : > { %9740 = vst [vmem:[#allocation46_spill] sm:$0xff] %v8586_v47  ;;  %9741 = vst [vmem:[#allocation47_spill] sm:$0xff] %v8588_v1  ;;  %v3323_v36 = vsel %vm8561_vm7, %v3318_v62, %v3322_v15  ;;  %v8600_v11 = vrot.slane %v682_v29, 7  ;;  %v297_v45 = vsel %vm8483_vm6, 0, %v296_v49  ;;  %v3257_v50 = vld [vmem:[#allocation2 + $0x38] sm:$0x1] }
  0xa2   : > { %v3342_v0 = vrot.slane %v3341_v38, 4  ;;  %v6418_v46 = vcombine.low %v3313_v48, %v3323_v36  ;;  %v3337_v7 = vsel %vm8561_vm7, %v3332_v24, %v3336_v5  ;;  %v8609_v40 = vrot.slane %v691_v20, 7  ;;  %6950 = vmatprep.mubr.bf16.mxu1 %v6292_v14  ;;  %298 = vst [vmem:[#allocation2 + $0x4c] sm:$0x1] %v297_v45  ;;  %v8611_v62 = vld [vmem:[#allocation2 + $0xe8] sm:$0xf] }
  0xa3   : > { %v3349_v34 = vshrl.u32 %v3258_v30, 16  ;;  %v3344_v15 = vshll.u32 %v3257_v50, 16  ;;  %v3352_v38 = vshll.u32 %v3258_v30, 16  ;;  %v3358_v29 = vshll.u32 %v3259_v17, 16  ;;  %v299_v45 = vld [vmem:[#allocation2 + $0x60] sm:$0x1] }
  0xa4   : > { %v3362_v49 = vshrl.u32 %v3259_v17, 16  ;;  %7170 = vmatprep.mubr.bf16.mxu0 %v6418_v46  ;;  %v704_v35 = vshrl.u32 %v8604_v63, 16  ;;  %v713_v36 = vshrl.u32 %v8611_v62, 16  ;;  %v6293_v17 = vcombine.low %v8604_v63, %v8611_v62  ;;  %v3261_v46 = vld [vmem:[#allocation2 + $0x58] sm:$0xf]  ;;  %v7736_v30 = vld [vmem:[#allocation6 + $0x188] sm:$0xff]  }
  0xa5   : > { %v3351_v4 = vrot.slane %v3349_v34, 4  ;;  %v3346_v5 = vrot.slane %v3344_v15, 5  ;;  %v3354_v24 = vrot.slane %v3352_v38, 5  ;;  %v3360_v20 = vrot.slane %v3358_v29, 5  ;;  %v3262_v38 = vld [vmem:[#allocation2 + $0x5c] sm:$0xf] }
  0xa6   : > { %v3364_v14 = vrot.slane %v3362_v49, 4  ;;  %v8616_v32 = vrot.slane %v704_v35, 7  ;;  %v8618_v61 = vrot.slane %v713_v36, 7  ;;  %v300_v15 = vsel %vm8483_vm6, 0, %v299_v45  ;;  %6951 = vmatmul.mubr.bf16.gmra.mrb[20].mxu1 %v6293_v17  ;;  %v8635_v17 = vld [vmem:[#allocation2 + $0xfc] sm:$0xf] }
  0xa7   : > { %v3347_v50 = vsel %vm8561_vm7, %v3342_v0, %v3346_v5  ;;  %v3355_v34 = vor.u32 %v3354_v24, %v3351_v4  ;;  %301 = vst [vmem:[#allocation2 + $0x60] sm:$0x1] %v300_v15  ;;  %v3373_v35 = vshrl.u32 %v3261_v46, 16  ;;  %v3376_v49 = vshll.u32 %v3261_v46, 16  ;;  %9742 = vst [vmem:[#allocation48_spill] sm:$0xff] %v8635_v17 }
  0xa8   : > { %v3365_v48 = vor.u32 %v3364_v14, %v3360_v20  ;;  %v6419_v29 = vcombine.low %v3337_v7, %v3347_v50  ;;  %v3382_v36 = vshll.u32 %v3262_v38, 16  ;;  %v3386_v47 = vshrl.u32 %v3262_v38, 16  ;;  %v8630_v7 = vld [vmem:[#allocation2 + $0xf8] sm:$0xf] }
  0xa9   : > { %v3260_v22 = vld [vmem:[#allocation2 + $0x4c] sm:$0x1]  ;;  %v3356_v44 = vrot.slane %v3355_v34, 4  ;;  %v3375_v0 = vrot.slane %v3373_v35, 4  ;;  %v3378_v5 = vrot.slane %v3376_v49, 5  ;;  %v735_v15 = vshrl.u32 %v8635_v17, 16 }
  0xaa   : > { %v3366_v12 = vrot.slane %v3365_v48, 4  ;;  %7171 = vmatmul.mubr.bf16.vlgmr.msra.gmra.mrb[0].mxu0 %v6419_v29  ;;  %v3368_v4 = vshll.u32 %v3260_v22, 16  ;;  %v8628_v24 = vrot.slane %v3382_v36, 5  ;;  %v3388_v45 = vrot.slane %v3386_v47, 4  ;;  %v7740_v22 = vld [vmem:[#allocation6 + $0x190] sm:$0xff]  }
  0xab   : > { %7203 = vmatpush3.bf16.msra.mxu0 %v8529_v28  ;;  %v3361_v14 = vsel %vm8561_vm7, %v3356_v44, %v3360_v20  ;;  %v726_v48 = vshrl.u32 %v8630_v7, 16  ;;  %v3379_v34 = vor.u32 %v3378_v5, %v3375_v0  ;;  %v302_v29 = vld [vmem:[#allocation2 + $0x74] sm:$0x1]  ;;  %v371_v28 = vld [vmem:[%s8175_s26 + $0x78] sm:$0xff]   ;;  %v6294_v47 = vcombine.low %v8630_v7, %v8635_v17  ;;  %v3264_v49 = vld [vmem:[#allocation2 + $0x6c] sm:$0xf] }
  0xac   : > { %v3370_v50 = vrot.slane %v3368_v4, 5  ;;  %7204 = vmatprep.subr.bf16.mxu0 %v7736_v30  ;;  %v3389_v35 = vor.u32 %v3388_v45, %v8628_v24  ;;  %v303_v20 = vsel %vm8483_vm6, 0, %v302_v29  ;;  %v3265_v36 = vld [vmem:[#allocation2 + $0x70] sm:$0xf]  ;;  %404 = vst [vmem:[#allocation2 + $0x148] sm:$0xff] %v371_v28   ;;  %v8651_v5 = vrot.slane %v735_v15, 7 }
  0xad   : > { %v8643_v44 = vrot.slane %v726_v48, 7  ;;  %v3380_v0 = vrot.slane %v3379_v34, 4  ;;  %304 = vst [vmem:[#allocation2 + $0x74] sm:$0x1] %v303_v20  ;;  %v3397_v38 = vshrl.u32 %v3264_v49, 16  ;;  %6954 = vmatprep.mubr.bf16.mxu1 %v6294_v47  ;;  %v3400_v17 = vshll.u32 %v3264_v49, 16 }
  0xae   : > { %v3371_v4 = vsel %vm8561_vm7, %v3366_v12, %v3370_v50  ;;  %9743 = vst [vmem:[#allocation49_spill] sm:$0xff] %v8651_v5  ;;  %v8653_v45 = vld [vmem:[#allocation2 + $0x10c] sm:$0xf]  ;;  %v3263_v46 = vld [vmem:[#allocation2 + $0x60] sm:$0x1]  ;;  %v3390_v3 = vrot.slane %v3389_v35, 4 }
  0xaf   : > { %9744 = vst [vmem:[#allocation50_spill] sm:$0xff] %v8653_v45  ;;  %v6420_v48 = vcombine.low %v3361_v14, %v3371_v4  ;;  %7205 = vmatpush3.bf16.msra.mxu0 %v7736_v30  ;;  %v3406_v29 = vshll.u32 %v3265_v36, 16  ;;  %v3385_v28 = vsel %vm8561_vm7, %v3380_v0, %v8628_v24  ;;  %v3392_v1 = vshll.u32 %v3263_v46, 16  ;;  %v8658_v34 = vld [vmem:[#allocation2 + $0x110] sm:$0xf]  ;;  %v7744_v15 = vld [vmem:[#allocation6 + $0x198] sm:$0xff]  }
  0xb0   : > { %v3399_v12 = vrot.slane %v3397_v38, 4  ;;  %v3410_v50 = vshrl.u32 %v3265_v36, 16  ;;  %9745 = vst [vmem:[#allocation51_spill] sm:$0xff] %v8658_v34  ;;  %7206 = vmatprep.subr.bf16.mxu0 %v7740_v22  ;;  %v3402_v20 = vrot.slane %v3400_v17, 5  ;;  %v748_v35 = vshrl.u32 %v8653_v45, 16 }
  0xb1   : > { %7174 = vmatprep.mubr.bf16.mxu0 %v6420_v48  ;;  %v3408_v14 = vrot.slane %v3406_v29, 5  ;;  %v3394_v47 = vrot.slane %v3392_v1, 5  ;;  %v757_v4 = vshrl.u32 %v8658_v34, 16  ;;  %v6295_v36 = vcombine.low %v8653_v45, %v8658_v34  ;;  %v305_v0 = vld [vmem:[#allocation2 + $0x88] sm:$0x1]  ;;  %v7748_v45 = vld [vmem:[#allocation6 + $0x1a8] sm:$0xff]  }
  0xb2   : > { %v3412_v49 = vrot.slane %v3410_v50, 4  ;;  %v3403_v46 = vor.u32 %v3402_v20, %v3399_v12  ;;  %v8664_v38 = vrot.slane %v748_v35, 7  ;;  %v3267_v48 = vld [vmem:[#allocation2 + $0x80] sm:$0xf]  ;;  %v9747_v17 = vrot.slane %v8266_v13, 4 }
  0xb3   : > { %7207 = vmatpush3.bf16.msra.mxu0 %v7740_v22  ;;  %v3395_v29 = vsel %vm8561_vm7, %v3390_v3, %v3394_v47  ;;  %v8677_v12 = vrot.slane %v757_v4, 7  ;;  %v306_v20 = vsel %vm8483_vm6, 0, %v305_v0  ;;  %v3268_v35 = vld [vmem:[#allocation2 + $0x84] sm:$0xf]  ;;  %6955 = vmatmul.mubr.bf16.gmra.mrb[24].mxu1 %v6295_v36  ;;  %v3421_v13 = vshrl.u32 %v3267_v48, 16 }
  0xb4   : > { %9746 = vst [vmem:[#allocation52_spill] sm:$0xff] %v8664_v38  ;;  %v8673_v1 = vsel %vm8195_vm2, %v9747_v17, %v8459_v25  ;;  %v3413_v50 = vor.u32 %v3412_v49, %v3408_v14  ;;  %7208 = vmatprep.subr.bf16.mxu0 %v7744_v15  ;;  %v6421_v24 = vcombine.low %v3385_v28, %v3395_v29  ;;  %v3266_v22 = vld [vmem:[#allocation2 + $0x74] sm:$0x1]  ;;  %v3404_v30 = vrot.slane %v3403_v46, 4  ;;  %v7746_v25 = vld [vmem:[#allocation6 + $0x1a0] sm:$0xff]  }
  0xb5   : > { %9748 = vst [vmem:[#allocation53_spill] sm:$0xff] %v8677_v12  ;;  %307 = vst [vmem:[#allocation2 + $0x88] sm:$0x1] %v306_v20  ;;  %v3424_v34 = vshll.u32 %v3267_v48, 16  ;;  %v3416_v3 = vshll.u32 %v3266_v22, 16  ;;  %v3430_v47 = vshll.u32 %v3268_v35, 16 }
  0xb6   : > { %v3414_v17 = vrot.slane %v3413_v50, 4  ;;  %v3434_v49 = vshrl.u32 %v3268_v35, 16  ;;  %7175 = vmatmul.mubr.bf16.gmra.mrb[4].mxu0 %v6421_v24  ;;  %v3409_v4 = vsel %vm8561_vm7, %v3404_v30, %v3408_v14  ;;  %v3423_v0 = vrot.slane %v3421_v13, 4  ;;  %v8683_v28 = vld [vmem:[#allocation2 + $0x120] sm:$0xf] }
  0xb7   : > { %v3426_v12 = vrot.slane %v3424_v34, 5  ;;  %9749 = vst [vmem:[#allocation54_spill] sm:$0xff] %v8683_v28  ;;  %v8685_v46 = vld [vmem:[#allocation2 + $0x124] sm:$0xf]  ;;  %v9751_v36 = vshll.u32 %v8581_v51, 16  ;;  %v3418_v29 = vrot.slane %v3416_v3, 5  ;;  %7209 = vmatpush3.bf16.msra.mxu0 %v7744_v15 }
  0xb8   : > { %9750 = vst [vmem:[#allocation55_spill] sm:$0xff] %v8685_v46  ;;  %v3432_v50 = vrot.slane %v3430_v47, 5  ;;  %v3436_v20 = vrot.slane %v3434_v49, 4  ;;  %v770_v35 = vshrl.u32 %v8683_v28, 16  ;;  %v308_v24 = vld [vmem:[#allocation2 + $0x9c] sm:$0x1]  ;;  %7210 = vmatprep.subr.bf16.mxu0 %v7746_v25  ;;  %v6296_v49 = vcombine.low %v8683_v28, %v8685_v46 }
  0xb9   : > { %v8690_v48 = vor.u32 %v9751_v36, %v8600_v11  ;;  %v3427_v22 = vor.u32 %v3426_v12, %v3423_v0  ;;  %v779_v34 = vshrl.u32 %v8685_v46, 16  ;;  %v3270_v13 = vld [vmem:[#allocation2 + $0x94] sm:$0xf]  ;;  %v3419_v51 = vsel %vm8561_vm7, %v3414_v17, %v3418_v29  ;;  %v3271_v15 = vld [vmem:[#allocation2 + $0x98] sm:$0xf] }
  0xba   : > { %v3437_v3 = vor.u32 %v3436_v20, %v3432_v50  ;;  %v8698_v47 = vrot.slane %v770_v35, 7  ;;  %v8702_v12 = vld [vmem:[#allocation2 + $0x134] sm:$0xf]  ;;  %v6422_v0 = vcombine.low %v3409_v4, %v3419_v51  ;;  %v309_v30 = vsel %vm8483_vm6, 0, %v308_v24  ;;  %v8708_v38 = vld [vmem:[#allocation2 + $0x138] sm:$0xf]  ;;  %6958 = vmatprep.mubr.bf16.mxu1 %v6296_v49 }
  0xbb   : > { %9752 = vst [vmem:[#allocation56_spill] sm:$0xff] %v8690_v48  ;;  %9754 = vst [vmem:[#allocation58_spill] sm:$0xff] %v8702_v12  ;;  %v3428_v36 = vrot.slane %v3427_v22, 4  ;;  %v8704_v14 = vrot.slane %v779_v34, 7  ;;  %v3445_v29 = vshrl.u32 %v3270_v13, 16  ;;  %v3448_v20 = vshll.u32 %v3270_v13, 16  ;;  %7211 = vmatpush3.bf16.msra.mxu0 %v7746_v25 }
  0xbc   : > { %9753 = vst [vmem:[#allocation57_spill] sm:$0xff] %v8698_v47  ;;  %9756 = vst [vmem:[#allocation60_spill] sm:$0xff] %v8708_v38  ;;  %v3269_v48 = vld [vmem:[#allocation2 + $0x88] sm:$0x1]  ;;  %v3438_v17 = vrot.slane %v3437_v3, 4  ;;  %v3454_v35 = vshll.u32 %v3271_v15, 16  ;;  %7178 = vmatprep.mubr.bf16.mxu0 %v6422_v0  ;;  %7212 = vmatprep.subr.bf16.mxu0 %v7748_v45 }
  0xbd   : > { %9755 = vst [vmem:[#allocation59_spill] sm:$0xff] %v8704_v14  ;;  %310 = vst [vmem:[#allocation2 + $0x9c] sm:$0x1] %v309_v30  ;;  %v3433_v4 = vsel %vm8561_vm7, %v3428_v36, %v3432_v50  ;;  %v3440_v22 = vshll.u32 %v3269_v48, 16  ;;  %v3458_v34 = vshrl.u32 %v3271_v15, 16  ;;  %v792_v51 = vshrl.u32 %v8702_v12, 16 }
  0xbe   : > { %v7750_v24 = vld [vmem:[#allocation6 + $0x1b0] sm:$0xff]   ;;  %v3447_v46 = vrot.slane %v3445_v29, 4  ;;  %v3450_v14 = vrot.slane %v3448_v20, 5  ;;  %v8713_v28 = vrot.slane %v3454_v35, 5  ;;  %v801_v25 = vshrl.u32 %v8708_v38, 16 }
  0xbf   : > { %v3442_v3 = vrot.slane %v3440_v22, 5  ;;  %v3460_v13 = vrot.slane %v3458_v34, 4  ;;  %v8716_v49 = vrot.slane %v792_v51, 7  ;;  %v311_v0 = vld [vmem:[#allocation2 + $0xb0] sm:$0x1]  ;;  %v6297_v15 = vcombine.low %v8702_v12, %v8708_v38  ;;  %7213 = vmatpush3.bf16.msra.mxu0 %v7748_v45  ;;  %v7752_v12 = vld [vmem:[#allocation6 + $0x1b8] sm:$0xff]  }
  0xc0   : > { %v3451_v50 = vor.u32 %v3450_v14, %v3447_v46  ;;  %v312_v36 = vsel %vm8483_vm6, 0, %v311_v0  ;;  %v3273_v29 = vld [vmem:[#allocation2 + $0xa8] sm:$0xf]  ;;  %v3274_v20 = vld [vmem:[#allocation2 + $0xac] sm:$0xf]  ;;  %v8733_v22 = vrot.slane %v801_v25, 7  ;;  %7214 = vmatprep.subr.bf16.mxu0 %v7750_v24 }
  0xc1   : > { %9757 = vst [vmem:[#allocation61_spill] sm:$0xff] %v8716_v49  ;;  %v3443_v46 = vsel %vm8561_vm7, %v3438_v17, %v3442_v3  ;;  %v3461_v14 = vor.u32 %v3460_v13, %v8713_v28  ;;  %313 = vst [vmem:[#allocation2 + $0xb0] sm:$0x1] %v312_v36  ;;  %v3469_v34 = vshrl.u32 %v3273_v29, 16  ;;  %6959 = vmatmul.mubr.bf16.gmra.mrb[28].mxu1 %v6297_v15  ;;  %v3472_v48 = vshll.u32 %v3273_v29, 16 }
  0xc2   : > { %9760 = vst [vmem:[#allocation62_spill] sm:$0xff] %v8733_v22  ;;  %v6423_v51 = vcombine.low %v3433_v4, %v3443_v46  ;;  %v3452_v0 = vrot.slane %v3451_v50, 4  ;;  %v3478_v30 = vshll.u32 %v3274_v20, 16  ;;  %v230_v38 = vld [vmem:[#allocation2 + $0x4] sm:$0x8]  ;;  %v3482_v5 = vshrl.u32 %v3274_v20, 16 }
  0xc3   : > { %v3462_v47 = vrot.slane %v3461_v14, 4  ;;  %v3471_v45 = vrot.slane %v3469_v34, 4  ;;  %v231_v17 = vsel %vm8726_vm10, 0, %v230_v38  ;;  %v3474_v4 = vrot.slane %v3472_v48, 5  ;;  %v314_v50 = vld [vmem:[#allocation2 + $0xc4] sm:$0x1]  ;;  %7215 = vmatpush3.bf16.msra.mxu0 %v7750_v24 }
  0xc4   : > { %v3272_v49 = vld [vmem:[#allocation2 + $0x9c] sm:$0x1]  ;;  %7179 = vmatmul.mubr.bf16.gmra.mrb[8].mxu0 %v6423_v51  ;;  %v3457_v3 = vsel %vm8561_vm7, %v3452_v0, %v8713_v28  ;;  %v3480_v25 = vrot.slane %v3478_v30, 5  ;;  %232 = vst [vmem:[#allocation2 + $0x4] sm:$0x8] %v231_v17  ;;  %v3484_v15 = vrot.slane %v3482_v5, 4  ;;  %7216 = vmatprep.subr.bf16.mxu0 %v7752_v12 }
  0xc5   : > { %v3464_v13 = vshll.u32 %v3272_v49, 16  ;;  %v315_v36 = vsel %vm8483_vm6, 0, %v314_v50  ;;  %v3276_v29 = vld [vmem:[#allocation2 + $0xbc] sm:$0xf]  ;;  %v3277_v46 = vld [vmem:[#allocation2 + $0xc0] sm:$0xf]  ;;  %v3475_v48 = vor.u32 %v3474_v4, %v3471_v45 }
  0xc6   : > { %v9761_v38 = vshll.u32 %v8583_v2, 16  ;;  %v9762_v28 = vshll.u32 %v8604_v63, 16  ;;  %316 = vst [vmem:[#allocation2 + $0xc4] sm:$0x1] %v315_v36  ;;  %v3493_v5 = vshrl.u32 %v3276_v29, 16  ;;  %v3496_v14 = vshll.u32 %v3276_v29, 16 }
  0xc7   : > { %v3466_v30 = vrot.slane %v3464_v13, 5  ;;  %v233_v34 = vld [vmem:[#allocation2 + $0x18] sm:$0x8]  ;;  %v8752_v51 = vld [vmem:[#allocation6 + $0x1c0] sm:$0xff]   ;;  %v3485_v24 = vor.u32 %v3484_v15, %v3480_v25  ;;  %v3502_v0 = vshll.u32 %v3277_v46, 16  ;;  %v3506_v17 = vshrl.u32 %v3277_v46, 16  ;;  %7217 = vmatpush3.bf16.msra.mxu0 %v7752_v12 }
  0xc8   : > { %v8745_v20 = vor.u32 %v9761_v38, %v8609_v40  ;;  %v8750_v49 = vor.u32 %v9762_v28, %v8616_v32  ;;  %v234_v2 = vsel %vm8726_vm10, 0, %v233_v34  ;;  %v3275_v63 = vld [vmem:[#allocation2 + $0xb0] sm:$0x1]  ;;  %v3476_v50 = vrot.slane %v3475_v48, 4  ;;  %v317_v34 = vld [vmem:[#allocation2 + $0xd8] sm:$0x1]  ;;  %7250 = vmatprep.subr.bf16.mxu0 %v8752_v51 }
  0xc9   : > { %v3467_v40 = vsel %vm8561_vm7, %v3462_v47, %v3466_v30  ;;  %v3495_v13 = vrot.slane %v3493_v5, 4  ;;  %v3498_v45 = vrot.slane %v3496_v14, 5  ;;  %235 = vst [vmem:[#allocation2 + $0x18] sm:$0x8] %v234_v2  ;;  %v3486_v36 = vrot.slane %v3485_v24, 4 }
  0xca   : > { %v6424_v4 = vcombine.low %v3457_v3, %v3467_v40  ;;  %v3488_v29 = vshll.u32 %v3275_v63, 16  ;;  %v8758_v38 = vrot.slane %v3502_v0, 5  ;;  %v3481_v15 = vsel %vm8561_vm7, %v3476_v50, %v3480_v25  ;;  %v3279_v22 = vld [vmem:[#allocation2 + $0xd0] sm:$0xf]  ;;  %v3280_v5 = vld [vmem:[#allocation2 + $0xd4] sm:$0xf] }
  0xcb   : > { %v3499_v46 = vor.u32 %v3498_v45, %v3495_v13  ;;  %v3508_v28 = vrot.slane %v3506_v17, 4  ;;  %v535_v47 = vrot.slane %v8297_v43, 4  ;;  %v406_v48 = vld [vmem:[#allocation2 + $0x4] sm:$0x8]  ;;  %v318_v3 = vsel %vm8483_vm6, 0, %v317_v34 }
  0xcc   : > { %7182 = vmatprep.mubr.bf16.mxu0 %v6424_v4  ;;  %v3490_v30 = vrot.slane %v3488_v29, 5  ;;  %v9763_v12 = vshll.u32 %v8611_v62, 16  ;;  %v9764_v25 = vshll.u32 %v8630_v7, 16  ;;  %v457_v0 = vshrl.u32 %v406_v48, 16  ;;  %319 = vst [vmem:[#allocation2 + $0xd8] sm:$0x1] %v318_v3 }
  0xcd   : > { %v3500_v17 = vrot.slane %v3499_v46, 4  ;;  %v3509_v2 = vor.u32 %v3508_v28, %v8758_v38  ;;  %v3517_v40 = vshrl.u32 %v3279_v22, 16  ;;  %v3278_v50 = vld [vmem:[#allocation2 + $0xc4] sm:$0x1]  ;;  %v3520_v13 = vshll.u32 %v3279_v22, 16 }
  0xce   : > { %v8769_v14 = vor.u32 %v9763_v12, %v8618_v61  ;;  %v8774_v24 = vor.u32 %v9764_v25, %v8643_v44  ;;  %v3491_v63 = vsel %vm8561_vm7, %v3486_v36, %v3490_v30  ;;  %v3526_v45 = vshll.u32 %v3280_v5, 16  ;;  %v236_v34 = vld [vmem:[#allocation2 + $0x2c] sm:$0x8] }
  0xcf   : > { %v3530_v62 = vshrl.u32 %v3280_v5, 16  ;;  %v6425_v61 = vcombine.low %v3481_v15, %v3491_v63  ;;  %v6266_v4 = vrot.slane %v457_v0, 11  ;;  %v3505_v7 = vsel %vm8561_vm7, %v3500_v17, %v8758_v38  ;;  %v320_v5 = vld [vmem:[#allocation2 + $0xec] sm:$0x1] }
  0xd0   : > { %v3510_v29 = vrot.slane %v3509_v2, 4  ;;  %v3512_v46 = vshll.u32 %v3278_v50, 16  ;;  %v409_v48 = vld [vmem:[#allocation2 + $0x18] sm:$0x8]  ;;  %v3519_v28 = vrot.slane %v3517_v40, 4  ;;  %v3522_v3 = vrot.slane %v3520_v13, 5 }
  0xd1   : > { %v3528_v12 = vrot.slane %v3526_v45, 5  ;;  %7183 = vmatmul.mubr.bf16.gmra.mrb[12].mxu0 %v6425_v61  ;;  %v468_v22 = vsel %vm8195_vm2, %v6266_v4, %v8367_v26  ;;  %v479_v36 = vshrl.u32 %v409_v48, 16  ;;  %v3532_v30 = vrot.slane %v3530_v62, 4  ;;  %v3282_v2 = vld [vmem:[#allocation2 + $0xe4] sm:$0xf] }
  0xd2   : > { %v237_v15 = vsel %vm8726_vm10, 0, %v236_v34  ;;  %v6306_v38 = vcombine.low %v468_v22, %v8204_v31  ;;  %v3514_v25 = vrot.slane %v3512_v46, 5  ;;  %v3523_v0 = vor.u32 %v3522_v3, %v3519_v28  ;;  %v3283_v40 = vld [vmem:[#allocation2 + $0xe8] sm:$0xf]  ;;  %v239_v45 = vld [vmem:[#allocation2 + $0x40] sm:$0x8] }
  0xd3   : > { %238 = vst [vmem:[#allocation2 + $0x2c] sm:$0x8] %v237_v15  ;;  %v321_v17 = vsel %vm8483_vm6, 0, %v320_v5  ;;  %v6267_v63 = vrot.slane %v479_v36, 11  ;;  %v3533_v50 = vor.u32 %v3532_v30, %v3528_v12  ;;  %v3541_v26 = vshrl.u32 %v3282_v2, 16  ;;  %v7747_v46 = vld [vmem:[#allocation6 + $0x88] sm:$0xff]  }
  0xd4   : > { %322 = vst [vmem:[#allocation2 + $0xec] sm:$0x1] %v321_v17  ;;  %v3544_v13 = vshll.u32 %v3282_v2, 16  ;;  %6978 = vmatprep.mubr.bf16.mxu1 %v6306_v38  ;;  %v3515_v62 = vsel %vm8561_vm7, %v3510_v29, %v3514_v25  ;;  %v3281_v61 = vld [vmem:[#allocation2 + $0xd8] sm:$0x1]  ;;  %v3524_v31 = vrot.slane %v3523_v0, 4 }
  0xd5   : > { %v3550_v4 = vshll.u32 %v3283_v40, 16  ;;  %v3554_v34 = vshrl.u32 %v3283_v40, 16  ;;  %v6426_v48 = vcombine.low %v3505_v7, %v3515_v62  ;;  %v490_v28 = vsel %vm8195_vm2, %v6267_v63, %v8398_v33  ;;  %v323_v29 = vld [vmem:[#allocation2 + $0x100] sm:$0x1]  ;;  %v3285_v38 = vld [vmem:[#allocation2 + $0xf8] sm:$0xf] }
  0xd6   : > { %v3534_v3 = vrot.slane %v3533_v50, 4  ;;  %v3536_v22 = vshll.u32 %v3281_v61, 16  ;;  %v6307_v36 = vcombine.low %v490_v28, %v8378_v19  ;;  %v3529_v30 = vsel %vm8561_vm7, %v3524_v31, %v3528_v12  ;;  %v3286_v2 = vld [vmem:[#allocation2 + $0xfc] sm:$0xf]  ;;  %v242_v62 = vld [vmem:[#allocation2 + $0x54] sm:$0x8] }
  0xd7   : > { %v3543_v15 = vrot.slane %v3541_v26, 4  ;;  %v3546_v5 = vrot.slane %v3544_v13, 5  ;;  %7186 = vmatprep.mubr.bf16.mxu0 %v6426_v48  ;;  %v3552_v0 = vrot.slane %v3550_v4, 5  ;;  %v3556_v17 = vrot.slane %v3554_v34, 4  ;;  %v7749_v4 = vld [vmem:[#allocation6 + $0x90] sm:$0xff]  }
  0xd8   : > { %v3538_v25 = vrot.slane %v3536_v22, 5  ;;  %v240_v7 = vsel %vm8726_vm10, 0, %v239_v45  ;;  %6979 = vmatmul.mubr.bf16.vlgmr.msra.gmra.mrb[0].mxu1 %v6307_v36  ;;  %v8805_v19 = vsel %vm8195_vm2, %v535_v47, %v8490_v54  ;;  %v324_v12 = vsel %vm8483_vm6, 0, %v323_v29 }
  0xd9   : > { %v3547_v33 = vor.u32 %v3546_v5, %v3543_v15  ;;  %241 = vst [vmem:[#allocation2 + $0x40] sm:$0x8] %v240_v7  ;;  %v3565_v40 = vshrl.u32 %v3285_v38, 16  ;;  %7011 = vmatpush3.bf16.msra.mxu1 %v8592_v56  ;;  %v3557_v26 = vor.u32 %v3556_v17, %v3552_v0  ;;  %325 = vst [vmem:[#allocation2 + $0x100] sm:$0x1] %v324_v12  ;;  %v3568_v13 = vshll.u32 %v3285_v38, 16 }
  0xda   : > { %v3539_v63 = vsel %vm8561_vm7, %v3534_v3, %v3538_v25  ;;  %v412_v50 = vld [vmem:[#allocation2 + $0x2c] sm:$0x8]  ;;  %v3574_v45 = vshll.u32 %v3286_v2, 16  ;;  %7012 = vmatprep.subr.bf16.mxu1 %v7747_v46  ;;  %v326_v3 = vld [vmem:[#allocation2 + $0x114] sm:$0x1]  ;;  %v3578_v15 = vshrl.u32 %v3286_v2, 16 }
  0xdb   : > { %v6427_v43 = vcombine.low %v3529_v30, %v3539_v63  ;;  %v501_v61 = vshrl.u32 %v412_v50, 16  ;;  %v3284_v31 = vld [vmem:[#allocation2 + $0xec] sm:$0x1]  ;;  %v3548_v54 = vrot.slane %v3547_v33, 4  ;;  %v3567_v47 = vrot.slane %v3565_v40, 4  ;;  %v7751_v63 = vld [vmem:[#allocation6 + $0x98] sm:$0xff]  }
  0xdc   : > { %v3558_v34 = vrot.slane %v3557_v26, 4  ;;  %v3560_v48 = vshll.u32 %v3284_v31, 16  ;;  %v3570_v28 = vrot.slane %v3568_v13, 5  ;;  %v8812_v22 = vrot.slane %v3574_v45, 5  ;;  %v3288_v5 = vld [vmem:[#allocation2 + $0x10c] sm:$0xf] }
  0xdd   : > { %7187 = vmatmul.mubr.bf16.gmra.mrb[16].mxu0 %v6427_v43  ;;  %v6268_v56 = vrot.slane %v501_v61, 11  ;;  %v3553_v36 = vsel %vm8561_vm7, %v3548_v54, %v3552_v0  ;;  %v243_v30 = vsel %vm8726_vm10, 0, %v242_v62  ;;  %7013 = vmatpush3.bf16.msra.mxu1 %v7747_v46  ;;  %v557_v25 = vrot.slane %v8337_v59, 4  ;;  %v3289_v7 = vld [vmem:[#allocation2 + $0x110] sm:$0xf] }
  0xde   : > { %v3562_v29 = vrot.slane %v3560_v48, 5  ;;  %v3571_v38 = vor.u32 %v3570_v28, %v3567_v47  ;;  %244 = vst [vmem:[#allocation2 + $0x54] sm:$0x8] %v243_v30  ;;  %v327_v17 = vsel %vm8483_vm6, 0, %v326_v3  ;;  %v3580_v0 = vrot.slane %v3578_v15, 4  ;;  %7014 = vmatprep.subr.bf16.mxu1 %v7749_v4  ;;  %v7753_v48 = vld [vmem:[#allocation6 + $0xa0] sm:$0xff]  }
  0xdf   : > { %v512_v33 = vsel %vm8195_vm2, %v6268_v56, %v8454_v21  ;;  %328 = vst [vmem:[#allocation2 + $0x114] sm:$0x1] %v327_v17  ;;  %v3589_v2 = vshrl.u32 %v3288_v5, 16  ;;  %v3592_v12 = vshll.u32 %v3288_v5, 16  ;;  %v245_v40 = vld [vmem:[#allocation2 + $0x68] sm:$0x8]  ;;  %v8830_v13 = vsel %vm8195_vm2, %v557_v25, %v8508_v16 }
  0xe0   : > { %v6308_v46 = vcombine.low %v512_v33, %v8673_v1  ;;  %v3563_v59 = vsel %vm8561_vm7, %v3558_v34, %v3562_v29  ;;  %v415_v50 = vld [vmem:[#allocation2 + $0x40] sm:$0x8]  ;;  %v3572_v26 = vrot.slane %v3571_v38, 4  ;;  %v3287_v62 = vld [vmem:[#allocation2 + $0x100] sm:$0x1]  ;;  %v3581_v43 = vor.u32 %v3580_v0, %v8812_v22 }
  0xe1   : > { %v6428_v21 = vcombine.low %v3553_v36, %v3563_v59  ;;  %v523_v45 = vshrl.u32 %v415_v50, 16  ;;  %v3591_v61 = vrot.slane %v3589_v2, 4  ;;  %v3584_v31 = vshll.u32 %v3287_v62, 16  ;;  %v329_v34 = vld [vmem:[#allocation2 + $0x128] sm:$0x1]  ;;  %7015 = vmatpush3.bf16.msra.mxu1 %v7749_v4 }
  0xe2   : > { %6982 = vmatprep.mubr.bf16.mxu1 %v6308_v46  ;;  %v3577_v1 = vsel %vm8561_vm7, %v3572_v26, %v8812_v22  ;;  %v3594_v54 = vrot.slane %v3592_v12, 5  ;;  %v3598_v47 = vshll.u32 %v3289_v7, 16  ;;  %v3582_v28 = vrot.slane %v3581_v43, 4  ;;  %v3291_v36 = vld [vmem:[#allocation2 + $0x120] sm:$0xf]  ;;  %7016 = vmatprep.subr.bf16.mxu1 %v7751_v63  ;;  %v7755_v26 = vld [vmem:[#allocation6 + $0xa8] sm:$0xff]  }
  0xe3   : > { %7190 = vmatprep.mubr.bf16.mxu0 %v6428_v21  ;;  %v6269_v16 = vrot.slane %v523_v45, 11  ;;  %v3602_v3 = vshrl.u32 %v3289_v7, 16  ;;  %v246_v56 = vsel %vm8726_vm10, 0, %v245_v40  ;;  %v3586_v15 = vrot.slane %v3584_v31, 5  ;;  %v3292_v29 = vld [vmem:[#allocation2 + $0x124] sm:$0xf] }
  0xe4   : > { %v3595_v30 = vor.u32 %v3594_v54, %v3591_v61  ;;  %v3600_v5 = vrot.slane %v3598_v47, 5  ;;  %247 = vst [vmem:[#allocation2 + $0x68] sm:$0x8] %v246_v56  ;;  %v579_v22 = vrot.slane %v8358_v53, 4  ;;  %v330_v17 = vsel %vm8483_vm6, 0, %v329_v34 }
  0xe5   : > { %v534_v4 = vsel %vm8195_vm2, %v6269_v16, %v8477_v6  ;;  %v418_v38 = vld [vmem:[#allocation2 + $0x54] sm:$0x8]  ;;  %v3604_v25 = vrot.slane %v3602_v3, 4  ;;  %v3613_v7 = vshrl.u32 %v3291_v36, 16  ;;  %v3587_v0 = vsel %vm8561_vm7, %v3582_v28, %v3586_v15  ;;  %331 = vst [vmem:[#allocation2 + $0x128] sm:$0x1] %v330_v17  ;;  %7017 = vmatpush3.bf16.msra.mxu1 %v7751_v63 }
  0xe6   : > { %v6309_v33 = vcombine.low %v534_v4, %v8805_v19  ;;  %v545_v2 = vshrl.u32 %v418_v38, 16  ;;  %v3290_v12 = vld [vmem:[#allocation2 + $0x114] sm:$0x1]  ;;  %v3596_v40 = vrot.slane %v3595_v30, 4  ;;  %v6429_v53 = vcombine.low %v3577_v1, %v3587_v0  ;;  %v248_v50 = vld [vmem:[#allocation2 + $0x7c] sm:$0x8]  ;;  %7018 = vmatprep.subr.bf16.mxu1 %v7753_v48 }
  0xe7   : > { %v3605_v46 = vor.u32 %v3604_v25, %v3600_v5  ;;  %v3608_v59 = vshll.u32 %v3290_v12, 16  ;;  %v587_v6 = vsel %vm8195_vm2, %v579_v22, %v8518_v39  ;;  %v3615_v45 = vrot.slane %v3613_v7, 4  ;;  %v332_v31 = vld [vmem:[#allocation2 + $0x13c] sm:$0x1]  ;;  %v3294_v16 = vld [vmem:[#allocation2 + $0x134] sm:$0xf] }
  0xe8   : > { %6983 = vmatmul.mubr.bf16.gmra.mrb[4].mxu1 %v6309_v33  ;;  %v6270_v19 = vrot.slane %v545_v2, 11  ;;  %v3601_v21 = vsel %vm8561_vm7, %v3596_v40, %v3600_v5  ;;  %v3616_v62 = vshll.u32 %v3291_v36, 16  ;;  %7191 = vmatmul.mubr.bf16.gmra.mrb[20].mxu0 %v6429_v53  ;;  %v3622_v61 = vshll.u32 %v3292_v29, 16  ;;  %v7757_v28 = vld [vmem:[#allocation6 + $0xb0] sm:$0xff]   ;;  %v7759_v7 = vld [vmem:[#allocation6 + $0xb8] sm:$0xff]  }
  0xe9   : > { %v3606_v43 = vrot.slane %v3605_v46, 4  ;;  %v3610_v63 = vrot.slane %v3608_v59, 5  ;;  %v3626_v1 = vshrl.u32 %v3292_v29, 16  ;;  %v249_v47 = vsel %vm8726_vm10, 0, %v248_v50  ;;  %7019 = vmatpush3.bf16.msra.mxu1 %v7753_v48  ;;  %v3295_v5 = vld [vmem:[#allocation2 + $0x138] sm:$0xf] }
  0xea   : > { %v556_v39 = vsel %vm8195_vm2, %v6270_v19, %v8495_v37  ;;  %v3618_v54 = vrot.slane %v3616_v62, 5  ;;  %v601_v34 = vrot.slane %v8420_v8, 4  ;;  %v3624_v15 = vrot.slane %v3622_v61, 5  ;;  %250 = vst [vmem:[#allocation2 + $0x7c] sm:$0x8] %v249_v47  ;;  %7020 = vmatprep.subr.bf16.mxu1 %v7755_v26 }
  0xeb   : > { %v6310_v3 = vcombine.low %v556_v39, %v8830_v13  ;;  %v3611_v56 = vsel %vm8561_vm7, %v3606_v43, %v3610_v63  ;;  %v421_v36 = vld [vmem:[#allocation2 + $0x68] sm:$0x8]  ;;  %v3628_v30 = vrot.slane %v3626_v1, 4  ;;  %v251_v48 = vld [vmem:[#allocation2 + $0x90] sm:$0x8]  ;;  %v333_v38 = vsel %vm8483_vm6, 0, %v332_v31 }
  0xec   : > { %v6430_v37 = vcombine.low %v3601_v21, %v3611_v56  ;;  %v567_v22 = vshrl.u32 %v421_v36, 16  ;;  %v3619_v29 = vor.u32 %v3618_v54, %v3615_v45  ;;  %v8864_v8 = vsel %vm8195_vm2, %v601_v34, %v8539_v18  ;;  %v3293_v13 = vld [vmem:[#allocation2 + $0x128] sm:$0x1]  ;;  %334 = vst [vmem:[#allocation2 + $0x13c] sm:$0x1] %v333_v38 }
  0xed   : > { %6986 = vmatprep.mubr.bf16.mxu1 %v6310_v3  ;;  %v3629_v4 = vor.u32 %v3628_v30, %v3624_v15  ;;  %v3637_v25 = vshrl.u32 %v3294_v16, 16  ;;  %v3640_v17 = vshll.u32 %v3294_v16, 16  ;;  %v3632_v2 = vshll.u32 %v3293_v13, 16  ;;  %v335_v40 = vld [vmem:[#allocation2 + $0x150] sm:$0x1]  ;;  %7021 = vmatpush3.bf16.msra.mxu1 %v7755_v26  ;;  %v8882_v34 = vld [vmem:[#allocation6 + $0xc0] sm:$0xff]  }
  0xee   : > { %7194 = vmatprep.mubr.bf16.mxu0 %v6430_v37  ;;  %v6271_v33 = vrot.slane %v567_v22, 11  ;;  %v3620_v0 = vrot.slane %v3619_v29, 4  ;;  %v3646_v12 = vshll.u32 %v3295_v5, 16  ;;  %v3650_v59 = vshrl.u32 %v3295_v5, 16  ;;  %v3297_v50 = vld [vmem:[#allocation2 + $0x148] sm:$0xf]  ;;  %7022 = vmatprep.subr.bf16.mxu1 %v7757_v28 }
  0xef   : > { %v3630_v18 = vrot.slane %v3629_v4, 4  ;;  %v3639_v53 = vrot.slane %v3637_v25, 4  ;;  %v3642_v46 = vrot.slane %v3640_v17, 5  ;;  %v3634_v45 = vrot.slane %v3632_v2, 5  ;;  %v3298_v1 = vld [vmem:[#allocation2 + $0x14c] sm:$0xf] }
  0xf0   : > { %v578_v19 = vsel %vm8195_vm2, %v6271_v33, %v8513_v42  ;;  %v3625_v21 = vsel %vm8561_vm7, %v3620_v0, %v3624_v15  ;;  %v8873_v62 = vrot.slane %v3646_v12, 5  ;;  %v3652_v61 = vrot.slane %v3650_v59, 4  ;;  %v254_v36 = vld [vmem:[#allocation2 + $0xa4] sm:$0x8]  ;;  %v4007_v15 = vld [vmem:[#allocation2 + $0x2c] sm:$0x8] }
  0xf1   : > { %v6311_v43 = vcombine.low %v578_v19, %v587_v6  ;;  %v3643_v63 = vor.u32 %v3642_v46, %v3639_v53  ;;  %v252_v26 = vsel %vm8726_vm10, 0, %v251_v48  ;;  %v3635_v31 = vsel %vm8561_vm7, %v3630_v18, %v3634_v45  ;;  %v424_v39 = vld [vmem:[#allocation2 + $0x7c] sm:$0x8]  ;;  %7023 = vmatpush3.bf16.msra.mxu1 %v7757_v28  ;;  %v4008_v28 = vld [vmem:[#allocation2 + $0x30] sm:$0xf] }
  0xf2   : > { %253 = vst [vmem:[#allocation2 + $0x90] sm:$0x8] %v252_v26  ;;  %v623_v42 = vrot.slane %v8461_v52, 4  ;;  %v336_v54 = vsel %vm8483_vm6, 0, %v335_v40  ;;  %v3661_v47 = vshrl.u32 %v3297_v50, 16  ;;  %v6431_v6 = vcombine.low %v3625_v21, %v3635_v31  ;;  %7024 = vmatprep.subr.bf16.mxu1 %v7759_v7 }
  0xf3   : > { %6987 = vmatmul.mubr.bf16.gmra.mrb[8].mxu1 %v6311_v43  ;;  %v589_v16 = vshrl.u32 %v424_v39, 16  ;;  %v3644_v3 = vrot.slane %v3643_v63, 4  ;;  %v3653_v56 = vor.u32 %v3652_v61, %v8873_v62  ;;  %337 = vst [vmem:[#allocation2 + $0x150] sm:$0x1] %v336_v54  ;;  %v3664_v5 = vshll.u32 %v3297_v50, 16 }
  0xf4   : > { %v631_v52 = vsel %vm8195_vm2, %v623_v42, %v8569_v60  ;;  %v3663_v30 = vrot.slane %v3661_v47, 4  ;;  %v3670_v37 = vshll.u32 %v3298_v1, 16  ;;  %7195 = vmatmul.mubr.bf16.gmra.mrb[24].mxu0 %v6431_v6  ;;  %v3296_v29 = vld [vmem:[#allocation2 + $0x13c] sm:$0x1]  ;;  %v3674_v4 = vshrl.u32 %v3298_v1, 16 }
  0xf5   : > { %v6272_v22 = vrot.slane %v589_v16, 11  ;;  %v3649_v48 = vsel %vm8561_vm7, %v3644_v3, %v8873_v62  ;;  %v3654_v13 = vrot.slane %v3653_v56, 4  ;;  %v3656_v38 = vshll.u32 %v3296_v29, 16  ;;  %7025 = vmatpush3.bf16.msra.mxu1 %v7759_v7  ;;  %v4009_v46 = vld [vmem:[#allocation2 + $0x34] sm:$0xf] }
  0xf6   : > { %v3666_v25 = vrot.slane %v3664_v5, 5  ;;  %v3672_v17 = vrot.slane %v3670_v37, 5  ;;  %v255_v33 = vsel %vm8726_vm10, 0, %v254_v36  ;;  %v3676_v0 = vrot.slane %v3674_v4, 4  ;;  %7058 = vmatprep.subr.bf16.mxu1 %v8882_v34  ;;  %v257_v45 = vld [vmem:[#allocation2 + $0xb8] sm:$0x8] }
  0xf7   : > { %v600_v60 = vsel %vm8195_vm2, %v6272_v22, %v8535_v58  ;;  %256 = vst [vmem:[#allocation2 + $0xa4] sm:$0x8] %v255_v33  ;;  %v645_v2 = vrot.slane %v8542_v9, 4  ;;  %v4056_v12 = vshrl.u32 %v4007_v15, 16  ;;  %v3658_v18 = vrot.slane %v3656_v38, 5  ;;  %v9765_v33 = vld [vmem:[#allocation47_spill] sm:$0xff] }
  0xf8   : > { %v6312_v40 = vcombine.low %v600_v60, %v8864_v8  ;;  %v3667_v53 = vor.u32 %v3666_v25, %v3663_v30  ;;  %v4061_v59 = vshrl.u32 %v4008_v28, 16  ;;  %v3677_v19 = vor.u32 %v3676_v0, %v3672_v17  ;;  %v4010_v39 = vld [vmem:[#allocation2 + $0x40] sm:$0x8]  ;;  %v4011_v36 = vld [vmem:[#allocation2 + $0x44] sm:$0xf] }
  0xf9   : > { %v427_v50 = vld [vmem:[#allocation2 + $0x90] sm:$0x8]  ;;  %v653_v7 = vsel %vm8195_vm2, %v645_v2, %v8576_v10  ;;  %v6442_v58 = vrot.slane %v4056_v12, 11  ;;  %v4064_v21 = vshll.u32 %v4008_v28, 16  ;;  %v3659_v9 = vsel %vm8561_vm7, %v3654_v13, %v3658_v18  ;;  %v4012_v28 = vld [vmem:[#allocation2 + $0x48] sm:$0xf] }
  0xfa   : > { %6990 = vmatprep.mubr.bf16.mxu1 %v6312_v40  ;;  %v611_v62 = vshrl.u32 %v427_v50, 16  ;;  %v3299_v43 = vld [vmem:[#allocation2 + $0x150] sm:$0x1]  ;;  %v3668_v8 = vrot.slane %v3667_v53, 4  ;;  %v4063_v63 = vrot.slane %v4061_v59, 7  ;;  %v6432_v61 = vcombine.low %v3649_v48, %v3659_v9 }
  0xfb   : > { %v3678_v26 = vrot.slane %v3677_v19, 4  ;;  %v3680_v1 = vshll.u32 %v3299_v43, 16  ;;  %v4070_v31 = vshrl.u32 %v4009_v46, 16  ;;  %v4073_v3 = vshll.u32 %v4009_v46, 16  ;;  %v260_v38 = vld [vmem:[#allocation2 + $0xcc] sm:$0x8] }
  0xfc   : > { %v6273_v42 = vrot.slane %v611_v62, 11  ;;  %v3673_v10 = vsel %vm8561_vm7, %v3668_v8, %v3672_v17  ;;  %v4066_v54 = vor.u32 %v4064_v21, %v4063_v63  ;;  %v4068_v47 = vrot.slane %v4063_v63, 4  ;;  %7198 = vmatprep.mubr.bf16.mxu0 %v6432_v61  ;;  %v4013_v25 = vld [vmem:[#allocation2 + $0x54] sm:$0x8]  ;;  %v4014_v2 = vld [vmem:[#allocation2 + $0x58] sm:$0xf] }
  0xfd   : > { %v3682_v6 = vrot.slane %v3680_v1, 5  ;;  %v4072_v16 = vrot.slane %v4070_v31, 7  ;;  %v258_v56 = vsel %vm8726_vm10, 0, %v257_v45  ;;  %v667_v37 = vrot.slane %v8547_v57, 4  ;;  %v4015_v50 = vld [vmem:[#allocation2 + $0x5c] sm:$0xf] }
  0xfe   : > { %v622_v15 = vsel %vm8195_vm2, %v6273_v42, %v8552_v41  ;;  %v430_v30 = vld [vmem:[#allocation2 + $0xa4] sm:$0x8]  ;;  %v4067_v5 = vsel %vm8195_vm2, %v6442_v58, %v4066_v54  ;;  %259 = vst [vmem:[#allocation2 + $0xb8] sm:$0x8] %v258_v56  ;;  %v4078_v22 = vshrl.u32 %v4010_v39, 16  ;;  %v4083_v0 = vshrl.u32 %v4011_v36, 16 }
  0xff   : > { %v6313_v29 = vcombine.low %v622_v15, %v631_v52  ;;  %v3683_v48 = vsel %vm8561_vm7, %v3678_v26, %v3682_v6  ;;  %v633_v13 = vshrl.u32 %v430_v30, 16  ;;  %v4075_v4 = vor.u32 %v4073_v3, %v4072_v16  ;;  %v9766_v19 = vld [vmem:[#allocation45_spill] sm:$0xff]  ;;  %v4016_v26 = vld [vmem:[#allocation2 + $0x68] sm:$0x8]  ;;  %v4017_v6 = vld [vmem:[#allocation2 + $0x6c] sm:$0xf] }
 0x100   : > { %v6433_v17 = vcombine.low %v3673_v10, %v3683_v48  ;;  %v675_v41 = vsel %vm8195_vm2, %v667_v37, %v9765_v33  ;;  %v6443_v60 = vrot.slane %v4078_v22, 11  ;;  %v4086_v12 = vshll.u32 %v4011_v36, 16  ;;  %v263_v62 = vld [vmem:[#allocation2 + $0xe0] sm:$0x8] }
 0x101   : > { %6991 = vmatmul.mubr.bf16.gmra.mrb[12].mxu1 %v6313_v29  ;;  %v6274_v57 = vrot.slane %v633_v13, 11  ;;  %v4076_v52 = vsel %vm8195_vm2, %v4068_v47, %v4075_v4  ;;  %v4092_v40 = vshrl.u32 %v4012_v28, 16  ;;  %v4085_v53 = vrot.slane %v4083_v0, 7  ;;  %v266_v4 = vld [vmem:[#allocation2 + $0xf4] sm:$0x8]  ;;  %v7758_v0 = vld [vmem:[#allocation6 + $0x1d0] sm:$0xff]  }
 0x102   : > { %7199 = vmatmul.mubr.bf16.gmra.mrb[28].mxu0 %v6433_v17  ;;  %v6458_v18 = vcombine.low %v4067_v5, %v4076_v52  ;;  %v4095_v46 = vshll.u32 %v4012_v28, 16  ;;  %v261_v59 = vsel %vm8726_vm10, 0, %v260_v38  ;;  %v689_v45 = vrot.slane %v8600_v11, 4  ;;  %v7756_v28 = vld [vmem:[#allocation6 + $0x1c8] sm:$0xff]   ;;  %v9767_v38 = vld [vmem:[#allocation46_spill] sm:$0xff] }
 0x103   : > { %v644_v58 = vsel %vm8195_vm2, %v6274_v57, %v9766_v19  ;;  %v4094_v21 = vrot.slane %v4092_v40, 7  ;;  %262 = vst [vmem:[#allocation2 + $0xcc] sm:$0x8] %v261_v59  ;;  %v4100_v9 = vshrl.u32 %v4013_v25, 16  ;;  %v4088_v8 = vor.u32 %v4086_v12, %v4085_v53  ;;  %v4019_v12 = vld [vmem:[#allocation2 + $0x7c] sm:$0x8] }
 0x104   : > { %v6314_v43 = vcombine.low %v644_v58, %v653_v7  ;;  %7218 = vmatprep.mubr.bf16.mxu0 %v6458_v18  ;;  %v4090_v63 = vrot.slane %v4085_v53, 4  ;;  %v4105_v61 = vshrl.u32 %v4014_v2, 16  ;;  %v697_v39 = vsel %vm8195_vm2, %v689_v45, %v8745_v20  ;;  %v4018_v20 = vld [vmem:[#allocation2 + $0x70] sm:$0xf]  ;;  %v4020_v59 = vld [vmem:[#allocation2 + $0x80] sm:$0xf] }
 0x105   : > { %v433_v1 = vld [vmem:[#allocation2 + $0xb8] sm:$0x8]  ;;  %v4097_v31 = vor.u32 %v4095_v46, %v4094_v21  ;;  %v6444_v42 = vrot.slane %v4100_v9, 11  ;;  %v4108_v10 = vshll.u32 %v4014_v2, 16  ;;  %v4089_v11 = vsel %vm8195_vm2, %v6443_v60, %v4088_v8 }
 0x106   : > { %6994 = vmatprep.mubr.bf16.mxu1 %v6314_v43  ;;  %v655_v54 = vshrl.u32 %v433_v1, 16  ;;  %v4107_v47 = vrot.slane %v4105_v61, 7  ;;  %v4114_v7 = vshrl.u32 %v4015_v50, 16  ;;  %v4117_v3 = vshll.u32 %v4015_v50, 16  ;;  %v9769_v58 = vld [vmem:[#allocation48_spill] sm:$0xff] }
 0x107   : > { %v4098_v16 = vsel %vm8195_vm2, %v4090_v63, %v4097_v31  ;;  %v264_v56 = vsel %vm8726_vm10, 0, %v263_v62  ;;  %v711_v36 = vrot.slane %v8616_v32, 4  ;;  %v4122_v48 = vshrl.u32 %v4016_v26, 16  ;;  %v4021_v63 = vld [vmem:[#allocation2 + $0x84] sm:$0xf]  ;;  %v9771_v61 = vld [vmem:[#allocation56_spill] sm:$0xff] }
 0x108   : > { %v6275_v15 = vrot.slane %v655_v54, 11  ;;  %v6459_v30 = vcombine.low %v4089_v11, %v4098_v16  ;;  %v4110_v5 = vor.u32 %v4108_v10, %v4107_v47  ;;  %v4112_v37 = vrot.slane %v4107_v47, 4  ;;  %265 = vst [vmem:[#allocation2 + $0xe0] sm:$0x8] %v264_v56  ;;  %v269_v10 = vld [vmem:[#allocation2 + $0x108] sm:$0x8] }
 0x109   : > { %v4116_v22 = vrot.slane %v4114_v7, 7  ;;  %v8940_v29 = vsel %vm8195_vm2, %v711_v36, %v8769_v14  ;;  %v4127_v13 = vshrl.u32 %v4017_v6, 16  ;;  %v4130_v33 = vshll.u32 %v4017_v6, 16  ;;  %v4022_v6 = vld [vmem:[#allocation2 + $0x90] sm:$0x8] }
 0x10a   : > { %v666_v32 = vsel %vm8195_vm2, %v6275_v15, %v9767_v38  ;;  %7219 = vmatmul.mubr.bf16.vlgmr.msra.gmra.mrb[0].mxu0 %v6459_v30  ;;  %v436_v25 = vld [vmem:[#allocation2 + $0xcc] sm:$0x8]  ;;  %v4111_v17 = vsel %vm8195_vm2, %v6444_v42, %v4110_v5  ;;  %v4136_v60 = vshrl.u32 %v4018_v20, 16  ;;  %v6445_v52 = vrot.slane %v4122_v48, 11  ;;  %v7760_v15 = vld [vmem:[#allocation6 + $0x1d8] sm:$0xff]   ;;  %v9772_v48 = vld [vmem:[#allocation52_spill] sm:$0xff] }
 0x10b   : > { %v6315_v2 = vcombine.low %v666_v32, %v675_v41  ;;  %7251 = vmatpush3.bf16.msra.mxu0 %v8752_v51  ;;  %v677_v14 = vshrl.u32 %v436_v25, 16  ;;  %v4119_v57 = vor.u32 %v4117_v3, %v4116_v22  ;;  %v4129_v40 = vrot.slane %v4127_v13, 7  ;;  %v9768_v41 = vld [vmem:[#allocation49_spill] sm:$0xff]  ;;  %v9773_v13 = vld [vmem:[#allocation50_spill] sm:$0xff] }
 0x10c   : > { %v4138_v18 = vrot.slane %v4136_v60, 7  ;;  %v4139_v53 = vshll.u32 %v4018_v20, 16  ;;  %7252 = vmatprep.subr.bf16.mxu0 %v7756_v28  ;;  %v267_v46 = vsel %vm8726_vm10, 0, %v266_v4  ;;  %v733_v51 = vrot.slane %v8643_v44, 4  ;;  %v4023_v20 = vld [vmem:[#allocation2 + $0x94] sm:$0xf] }
 0x10d   : > { %6995 = vmatmul.mubr.bf16.gmra.mrb[16].mxu1 %v6315_v2  ;;  %v6276_v50 = vrot.slane %v677_v14, 11  ;;  %v4120_v19 = vsel %vm8195_vm2, %v4112_v37, %v4119_v57  ;;  %268 = vst [vmem:[#allocation2 + $0xf4] sm:$0x8] %v267_v46  ;;  %v9770_v21 = vshll.u32 %v9769_v58, 16  ;;  %v4132_v62 = vor.u32 %v4130_v33, %v4129_v40  ;;  %v7762_v25 = vld [vmem:[#allocation6 + $0x1e0] sm:$0xff]   ;;  %v9775_v2 = vld [vmem:[#allocation53_spill] sm:$0xff] }
 0x10e   : > { %v6460_v9 = vcombine.low %v4111_v17, %v4120_v19  ;;  %v4134_v43 = vrot.slane %v4129_v40, 4  ;;  %v4141_v8 = vor.u32 %v4139_v53, %v4138_v18  ;;  %v4144_v44 = vshrl.u32 %v4019_v12, 16  ;;  %v9776_v14 = vld [vmem:[#allocation51_spill] sm:$0xff]  ;;  %v4024_v12 = vld [vmem:[#allocation2 + $0x98] sm:$0xf] }
 0x10f   : > { %v740_v45 = vor.u32 %v9770_v21, %v9768_v41  ;;  %v688_v26 = vsel %vm8195_vm2, %v6276_v50, %v9771_v61  ;;  %v439_v1 = vld [vmem:[#allocation2 + $0xe0] sm:$0x8]  ;;  %7253 = vmatpush3.bf16.msra.mxu0 %v7756_v28  ;;  %v4149_v42 = vshrl.u32 %v4020_v59, 16  ;;  %v4133_v47 = vsel %vm8195_vm2, %v6445_v52, %v4132_v62  ;;  %v272_v50 = vld [vmem:[#allocation2 + $0x11c] sm:$0x8] }
 0x110   : > { %v6316_v54 = vcombine.low %v688_v26, %v697_v39  ;;  %7222 = vmatprep.mubr.bf16.mxu0 %v6460_v9  ;;  %v699_v11 = vshrl.u32 %v439_v1, 16  ;;  %v4142_v7 = vsel %vm8195_vm2, %v4134_v43, %v4141_v8  ;;  %7254 = vmatprep.subr.bf16.mxu0 %v7758_v0  ;;  %v6446_v3 = vrot.slane %v4144_v44, 11  ;;  %v4025_v9 = vld [vmem:[#allocation2 + $0xa4] sm:$0x8]  ;;  %v9778_v43 = vld [vmem:[#allocation57_spill] sm:$0xff] }
 0x111   : > { %v8961_v31 = vsel %vm8195_vm2, %v733_v51, %v740_v45  ;;  %v6461_v16 = vcombine.low %v4133_v47, %v4142_v7  ;;  %v4151_v56 = vrot.slane %v4149_v42, 7  ;;  %v4152_v36 = vshll.u32 %v4020_v59, 16  ;;  %v9779_v8 = vld [vmem:[#allocation54_spill] sm:$0xff]  ;;  %v7764_v47 = vld [vmem:[#allocation6 + $0x1e8] sm:$0xff]  }
 0x112   : > { %6998 = vmatprep.mubr.bf16.mxu1 %v6316_v54  ;;  %v6277_v30 = vrot.slane %v699_v11, 11  ;;  %v4158_v5 = vshrl.u32 %v4021_v63, 16  ;;  %v4161_v39 = vshll.u32 %v4021_v63, 16  ;;  %v270_v37 = vsel %vm8726_vm10, 0, %v269_v10  ;;  %v4026_v1 = vld [vmem:[#allocation2 + $0xa8] sm:$0xf] }
 0x113   : > { %7223 = vmatmul.mubr.bf16.gmra.mrb[4].mxu0 %v6461_v16  ;;  %v4154_v28 = vor.u32 %v4152_v36, %v4151_v56  ;;  %v4156_v22 = vrot.slane %v4151_v56, 4  ;;  %271 = vst [vmem:[#allocation2 + $0x108] sm:$0x8] %v270_v37  ;;  %v9774_v4 = vshll.u32 %v9773_v13, 16  ;;  %v755_v32 = vrot.slane %v9772_v48, 4  ;;  %v9782_v56 = vld [vmem:[#allocation55_spill] sm:$0xff] }
 0x114   : > { %v710_v17 = vsel %vm8195_vm2, %v6277_v30, %v8750_v49  ;;  %v442_v33 = vld [vmem:[#allocation2 + $0xf4] sm:$0x8]  ;;  %v4160_v60 = vrot.slane %v4158_v5, 7  ;;  %v9777_v57 = vshll.u32 %v9776_v14, 16  ;;  %v4166_v40 = vshrl.u32 %v4022_v6, 16  ;;  %7255 = vmatpush3.bf16.msra.mxu0 %v7758_v0 }
 0x115   : > { %v8972_v38 = vor.u32 %v9774_v4, %v9772_v48  ;;  %v6317_v18 = vcombine.low %v710_v17, %v8940_v29  ;;  %v721_v53 = vshrl.u32 %v442_v33, 16  ;;  %v4155_v46 = vsel %vm8195_vm2, %v6446_v3, %v4154_v28  ;;  %7256 = vmatprep.subr.bf16.mxu0 %v7760_v15  ;;  %v4027_v11 = vld [vmem:[#allocation2 + $0xac] sm:$0xf]  ;;  %v275_v30 = vld [vmem:[#allocation2 + $0x130] sm:$0x8]  ;;  %v7766_v28 = vld [vmem:[#allocation6 + $0x1f0] sm:$0xff]  }
 0x116   : > { %v762_v52 = vor.u32 %v9777_v57, %v9775_v2  ;;  %v4171_v59 = vshrl.u32 %v4023_v20, 16  ;;  %v4163_v19 = vor.u32 %v4161_v39, %v4160_v60  ;;  %v6447_v51 = vrot.slane %v4166_v40, 11  ;;  %v9781_v3 = vld [vmem:[#allocation59_spill] sm:$0xff]  ;;  %v4028_v4 = vld [vmem:[#allocation2 + $0xb8] sm:$0x8]  ;;  %v9784_v57 = vld [vmem:[#allocation61_spill] sm:$0xff] }
 0x117   : > { %v4174_v41 = vshll.u32 %v4023_v20, 16  ;;  %6999 = vmatmul.mubr.bf16.gmra.mrb[20].mxu1 %v6317_v18  ;;  %v6278_v58 = vrot.slane %v721_v53, 11  ;;  %v4180_v45 = vshrl.u32 %v4024_v12, 16  ;;  %v4183_v0 = vshll.u32 %v4024_v12, 16  ;;  %v4030_v53 = vld [vmem:[#allocation2 + $0xc0] sm:$0xf] }
 0x118   : > { %v763_v49 = vsel %vm8195_vm2, %v755_v32, %v762_v52  ;;  %v4173_v21 = vrot.slane %v4171_v59, 7  ;;  %v4164_v29 = vsel %vm8195_vm2, %v4156_v22, %v4163_v19  ;;  %v273_v62 = vsel %vm8726_vm10, 0, %v272_v50  ;;  %7257 = vmatpush3.bf16.msra.mxu0 %v7760_v15  ;;  %v9785_v52 = vld [vmem:[#allocation58_spill] sm:$0xff] }
 0x119   : > { %v9780_v63 = vshll.u32 %v9779_v8, 16  ;;  %v777_v26 = vrot.slane %v9778_v43, 4  ;;  %v732_v44 = vsel %vm8195_vm2, %v6278_v58, %v8774_v24  ;;  %v6462_v42 = vcombine.low %v4155_v46, %v4164_v29  ;;  %274 = vst [vmem:[#allocation2 + $0x11c] sm:$0x8] %v273_v62  ;;  %7258 = vmatprep.subr.bf16.mxu0 %v7762_v25 }
 0x11a   : > { %v4176_v10 = vor.u32 %v4174_v41, %v4173_v21  ;;  %v4178_v54 = vrot.slane %v4173_v21, 4  ;;  %v6318_v7 = vcombine.low %v732_v44, %v8961_v31  ;;  %v445_v6 = vld [vmem:[#allocation2 + $0x108] sm:$0x8]  ;;  %v4182_v16 = vrot.slane %v4180_v45, 7 }
 0x11b   : > { %v8993_v61 = vor.u32 %v9780_v63, %v9778_v43  ;;  %v9783_v36 = vshll.u32 %v9782_v56, 16  ;;  %v4188_v15 = vshrl.u32 %v4025_v9, 16  ;;  %7226 = vmatprep.mubr.bf16.mxu0 %v6462_v42  ;;  %v743_v5 = vshrl.u32 %v445_v6, 16  ;;  %v9787_v45 = vld [vmem:[#allocation62_spill] sm:$0xff] }
 0x11c   : > { %v4177_v24 = vsel %vm8195_vm2, %v6447_v51, %v4176_v10  ;;  %v4193_v39 = vshrl.u32 %v4026_v1, 16  ;;  %v4196_v37 = vshll.u32 %v4026_v1, 16  ;;  %7002 = vmatprep.mubr.bf16.mxu1 %v6318_v7  ;;  %v4185_v22 = vor.u32 %v4183_v0, %v4182_v16  ;;  %7259 = vmatpush3.bf16.msra.mxu0 %v7762_v25  ;;  %v4029_v25 = vld [vmem:[#allocation2 + $0xbc] sm:$0xf]  ;;  %v287_v51 = vld [vmem:[#allocation2 + $0x10] sm:$0x1] }
 0x11d   : > { %v784_v20 = vor.u32 %v9783_v36, %v9781_v3  ;;  %v6448_v48 = vrot.slane %v4188_v15, 11  ;;  %v4202_v13 = vshrl.u32 %v4027_v11, 16  ;;  %v6279_v32 = vrot.slane %v743_v5, 11  ;;  %7260 = vmatprep.subr.bf16.mxu0 %v7764_v47  ;;  %v9788_v0 = vld [vmem:[#allocation60_spill] sm:$0xff]  ;;  %v7768_v1 = vld [vmem:[#allocation6 + $0x1f8] sm:$0xff]   ;;  %v9029_v16 = vld [vmem:[#allocation6 + $0x200] sm:$0xff]  }
 0x11e   : > { %v4195_v17 = vrot.slane %v4193_v39, 7  ;;  %v4205_v33 = vshll.u32 %v4027_v11, 16  ;;  %v276_v60 = vsel %vm8726_vm10, 0, %v275_v30  ;;  %v4186_v2 = vsel %vm8195_vm2, %v4178_v54, %v4185_v22  ;;  %v1420_v54 = vld [vmem:[#allocation2 + $0xc] sm:$0xf] }
 0x11f   : > { %v785_v31 = vsel %vm8195_vm2, %v777_v26, %v784_v20  ;;  %v4204_v14 = vrot.slane %v4202_v13, 7  ;;  %277 = vst [vmem:[#allocation2 + $0x130] sm:$0x8] %v276_v60  ;;  %v9786_v12 = vshll.u32 %v9785_v52, 16  ;;  %v799_v18 = vrot.slane %v9784_v57, 4 }
 0x120   : > { %v754_v46 = vsel %vm8195_vm2, %v6279_v32, %v8972_v38  ;;  %v6463_v59 = vcombine.low %v4177_v24, %v4186_v2  ;;  %v4198_v50 = vor.u32 %v4196_v37, %v4195_v17  ;;  %v4200_v19 = vrot.slane %v4195_v17, 4  ;;  %v448_v58 = vld [vmem:[#allocation2 + $0x11c] sm:$0x8]  ;;  %7261 = vmatpush3.bf16.msra.mxu0 %v7764_v47  ;;  %v1419_v26 = vld [vmem:[#allocation2 + $0x8] sm:$0xf] }
 0x121   : > { %v9014_v40 = vor.u32 %v9786_v12, %v9784_v57  ;;  %v6319_v41 = vcombine.low %v754_v46, %v763_v49  ;;  %v4207_v21 = vor.u32 %v4205_v33, %v4204_v14  ;;  %v9789_v9 = vshll.u32 %v9788_v0, 16  ;;  %7262 = vmatprep.subr.bf16.mxu0 %v7766_v28  ;;  %v4031_v15 = vld [vmem:[#allocation2 + $0xcc] sm:$0x8]  ;;  %v4032_v22 = vld [vmem:[#allocation2 + $0xd0] sm:$0xf] }
 0x122   : > { %v4210_v62 = vshrl.u32 %v4028_v4, 16  ;;  %7227 = vmatmul.mubr.bf16.gmra.mrb[8].mxu0 %v6463_v59  ;;  %v765_v43 = vshrl.u32 %v448_v58, 16  ;;  %v4199_v8 = vsel %vm8195_vm2, %v6448_v48, %v4198_v50  ;;  %v4215_v63 = vshrl.u32 %v4029_v25, 16  ;;  %v4033_v17 = vld [vmem:[#allocation2 + $0xd4] sm:$0xf] }
 0x123   : > { %v806_v29 = vor.u32 %v9789_v9, %v9787_v45  ;;  %v4218_v38 = vshll.u32 %v4029_v25, 16  ;;  %7003 = vmatmul.mubr.bf16.gmra.mrb[24].mxu1 %v6319_v41  ;;  %v4208_v49 = vsel %vm8195_vm2, %v4200_v19, %v4207_v21  ;;  %v4224_v10 = vshrl.u32 %v4030_v53, 16  ;;  %v1423_v46 = vld [vmem:[#allocation2 + $0x20] sm:$0xf]  ;;  %v1424_v41 = vld [vmem:[#allocation2 + $0x24] sm:$0x1] }
 0x124   : > { %v6449_v42 = vrot.slane %v4210_v62, 11  ;;  %v6280_v11 = vrot.slane %v765_v43, 11  ;;  %v6464_v47 = vcombine.low %v4199_v8, %v4208_v49  ;;  %v4217_v7 = vrot.slane %v4215_v63, 7  ;;  %7263 = vmatpush3.bf16.msra.mxu0 %v7766_v28  ;;  %v4034_v9 = vld [vmem:[#allocation2 + $0xe0] sm:$0x8] }
 0x125   : > { %v807_v44 = vsel %vm8195_vm2, %v799_v18, %v806_v29  ;;  %v4227_v6 = vshll.u32 %v4030_v53, 16  ;;  %v4226_v3 = vrot.slane %v4224_v10, 7  ;;  %v288_v56 = vsel %vm8483_vm6, 0, %v287_v51  ;;  %7264 = vmatprep.subr.bf16.mxu0 %v7768_v1  ;;  %v4035_v29 = vld [vmem:[#allocation2 + $0xe4] sm:$0xf] }
 0x126   : > { %v1471_v36 = vshrl.u32 %v1419_v26, 16  ;;  %v1474_v20 = vshll.u32 %v1419_v26, 16  ;;  %v776_v30 = vsel %vm8195_vm2, %v6280_v11, %v8993_v61  ;;  %7230 = vmatprep.mubr.bf16.mxu0 %v6464_v47  ;;  %v451_v5 = vld [vmem:[#allocation2 + $0x130] sm:$0x8]  ;;  %v4220_v24 = vor.u32 %v4218_v38, %v4217_v7  ;;  %289 = vst [vmem:[#allocation2 + $0x10] sm:$0x1] %v288_v56 }
 0x127   : > { %v4222_v39 = vrot.slane %v4217_v7, 4  ;;  %v1480_v37 = vshll.u32 %v1420_v54, 16  ;;  %v6320_v48 = vcombine.low %v776_v30, %v785_v31  ;;  %v787_v13 = vshrl.u32 %v451_v5, 16  ;;  %v1422_v61 = vld [vmem:[#allocation2 + $0x1c] sm:$0xf] }
 0x128   : > { %v4229_v4 = vor.u32 %v4227_v6, %v4226_v3  ;;  %v1473_v32 = vrot.slane %v1471_v36, 4  ;;  %v4221_v28 = vsel %vm8195_vm2, %v6449_v42, %v4220_v24  ;;  %v1476_v33 = vrot.slane %v1474_v20, 5  ;;  %7265 = vmatpush3.bf16.msra.mxu0 %v7768_v1  ;;  %v4036_v36 = vld [vmem:[#allocation2 + $0xe8] sm:$0xf] }
 0x129   : > { %v1482_v60 = vrot.slane %v1480_v37, 5  ;;  %v1484_v2 = vshrl.u32 %v1420_v54, 16  ;;  %7006 = vmatprep.mubr.bf16.mxu1 %v6320_v48  ;;  %v6281_v14 = vrot.slane %v787_v13, 11  ;;  %v4232_v52 = vshrl.u32 %v4031_v15, 16  ;;  %7298 = vmatprep.subr.bf16.mxu0 %v9029_v16  ;;  %v1425_v37 = vld [vmem:[#allocation2 + $0x30] sm:$0xf] }
 0x12a   : > { %v4230_v57 = vsel %vm8195_vm2, %v4222_v39, %v4229_v4  ;;  %v4237_v12 = vshrl.u32 %v4032_v22, 16  ;;  %v1477_v18 = vor.u32 %v1476_v33, %v1473_v32  ;;  %v4240_v53 = vshll.u32 %v4032_v22, 16  ;;  %v1426_v32 = vld [vmem:[#allocation2 + $0x34] sm:$0xf] }
 0x12b   : > { %v6465_v31 = vcombine.low %v4221_v28, %v4230_v57  ;;  %v1486_v25 = vrot.slane %v1484_v2, 4  ;;  %v798_v59 = vsel %vm8195_vm2, %v6281_v14, %v9014_v40  ;;  %v6450_v50 = vrot.slane %v4232_v52, 11  ;;  %v1427_v2 = vld [vmem:[#allocation2 + $0x38] sm:$0x1] }
 0x12c   : > { %v4239_v19 = vrot.slane %v4237_v12, 7  ;;  %v4246_v51 = vshrl.u32 %v4033_v17, 16  ;;  %v6321_v58 = vcombine.low %v798_v59, %v807_v44  ;;  %v1478_v21 = vrot.slane %v1477_v18, 4  ;;  %v4037_v12 = vld [vmem:[#allocation2 + $0xf4] sm:$0x8] }
 0x12d   : > { %7231 = vmatmul.mubr.bf16.gmra.mrb[12].mxu0 %v6465_v31  ;;  %v1487_v45 = vor.u32 %v1486_v25, %v1482_v60  ;;  %v4249_v0 = vshll.u32 %v4033_v17, 16  ;;  %v1421_v62 = vld [vmem:[#allocation2 + $0x10] sm:$0x1]  ;;  %v1495_v38 = vshrl.u32 %v1422_v61, 16  ;;  %v1498_v49 = vshll.u32 %v1422_v61, 16 }
 0x12e   : > { %v4242_v43 = vor.u32 %v4240_v53, %v4239_v19  ;;  %v4244_v8 = vrot.slane %v4239_v19, 4  ;;  %v4248_v63 = vrot.slane %v4246_v51, 7  ;;  %7007 = vmatmul.mubr.bf16.gmra.mrb[28].mxu1 %v6321_v58  ;;  %v1483_v40 = vsel %vm8561_vm7, %v1478_v21, %v1482_v60  ;;  %v9054_v51 = vld [vmem:[#allocation2 + $0xf8] sm:$0xf] }
 0x12f   : > { %v1488_v26 = vrot.slane %v1487_v45, 4  ;;  %v1490_v1 = vshll.u32 %v1421_v62, 16  ;;  %v1497_v10 = vrot.slane %v1495_v38, 4  ;;  %v1504_v54 = vshll.u32 %v1423_v46, 16 }
 0x130   : > { %v4243_v44 = vsel %vm8195_vm2, %v6450_v50, %v4242_v43  ;;  %v4251_v42 = vor.u32 %v4249_v0, %v4248_v63  ;;  %v1500_v47 = vrot.slane %v1498_v49, 5  ;;  %v1508_v7 = vshrl.u32 %v1423_v46, 16  ;;  %v9060_v0 = vld [vmem:[#allocation2 + $0xfc] sm:$0xf] }
 0x131   : > { %v1492_v11 = vrot.slane %v1490_v1, 5  ;;  %v1514_v6 = vshll.u32 %v1424_v41, 16  ;;  %v1506_v56 = vrot.slane %v1504_v54, 5  ;;  %v4254_v20 = vshrl.u32 %v4034_v9, 16  ;;  %v7763_v9 = vld [vmem:[#allocation6 + $0xc8] sm:$0xff]  }
 0x132   : > { %v4252_v3 = vsel %vm8195_vm2, %v4244_v8, %v4251_v42  ;;  %v4259_v15 = vshrl.u32 %v4035_v29, 16  ;;  %v1501_v24 = vor.u32 %v1500_v47, %v1497_v10  ;;  %v1510_v39 = vrot.slane %v1508_v7, 4  ;;  %v1428_v1 = vld [vmem:[#allocation2 + $0x44] sm:$0xf]  ;;  %v1429_v54 = vld [vmem:[#allocation2 + $0x48] sm:$0xf] }
 0x133   : > { %v1493_v30 = vsel %vm8561_vm7, %v1488_v26, %v1492_v11  ;;  %v6466_v5 = vcombine.low %v4243_v44, %v4252_v3  ;;  %v1516_v48 = vrot.slane %v1514_v6, 5  ;;  %v6451_v13 = vrot.slane %v4254_v20, 11  ;;  %v1430_v3 = vld [vmem:[#allocation2 + $0x4c] sm:$0x1] }
 0x134   : > { %v6330_v22 = vcombine.low %v1483_v40, %v1493_v30  ;;  %v4261_v4 = vrot.slane %v4259_v15, 7  ;;  %v1502_v17 = vrot.slane %v1501_v24, 4  ;;  %v1511_v28 = vor.u32 %v1510_v39, %v1506_v56  ;;  %v4040_v30 = vld [vmem:[#allocation2 + $0x108] sm:$0x8] }
 0x135   : > { %7234 = vmatprep.mubr.bf16.mxu0 %v6466_v5  ;;  %v4262_v33 = vshll.u32 %v4035_v29, 16  ;;  %v4268_v60 = vshrl.u32 %v4036_v36, 16  ;;  %v4271_v14 = vshll.u32 %v4036_v36, 16  ;;  %v1519_v57 = vshrl.u32 %v1425_v37, 16  ;;  %v7765_v5 = vld [vmem:[#allocation6 + $0xd0] sm:$0xff]  }
 0x136   : > { %7026 = vmatprep.mubr.bf16.mxu1 %v6330_v22  ;;  %v4266_v61 = vrot.slane %v4261_v4, 4  ;;  %v1522_v52 = vshll.u32 %v1425_v37, 16  ;;  %v1507_v31 = vsel %vm8561_vm7, %v1502_v17, %v1506_v56  ;;  %v1512_v18 = vrot.slane %v1511_v28, 4  ;;  %v9071_v22 = vld [vmem:[#allocation2 + $0x10c] sm:$0xf] }
 0x137   : > { %v4264_v25 = vor.u32 %v4262_v33, %v4261_v4  ;;  %v4270_v53 = vrot.slane %v4268_v60, 7  ;;  %v1521_v46 = vrot.slane %v1519_v57, 4  ;;  %v1528_v50 = vshll.u32 %v1426_v32, 16  ;;  %v9075_v17 = vld [vmem:[#allocation2 + $0x110] sm:$0xf] }
 0x138   : > { %v1524_v59 = vrot.slane %v1522_v52, 5  ;;  %v1532_v19 = vshrl.u32 %v1426_v32, 16  ;;  %v1517_v41 = vsel %vm8561_vm7, %v1512_v18, %v1516_v48  ;;  %v1538_v45 = vshll.u32 %v1427_v2, 16 }
 0x139   : > { %v4265_v58 = vsel %vm8195_vm2, %v6451_v13, %v4264_v25  ;;  %v4273_v21 = vor.u32 %v4271_v14, %v4270_v53  ;;  %v6331_v29 = vcombine.low %v1507_v31, %v1517_v41  ;;  %v1530_v43 = vrot.slane %v1528_v50, 5  ;;  %v7767_v31 = vld [vmem:[#allocation6 + $0xd8] sm:$0xff]  }
 0x13a   : > { %v1525_v62 = vor.u32 %v1524_v59, %v1521_v46  ;;  %v1534_v8 = vrot.slane %v1532_v19, 4  ;;  %v1540_v38 = vrot.slane %v1538_v45, 5  ;;  %v4276_v40 = vshrl.u32 %v4037_v12, 16 }
 0x13b   : > { %v4274_v63 = vsel %vm8195_vm2, %v4266_v61, %v4273_v21  ;;  %v4281_v26 = vshrl.u32 %v9054_v51, 16  ;;  %7027 = vmatmul.mubr.bf16.vlgmr.msra.gmra.mrb[0].mxu1 %v6331_v29  ;;  %v4284_v10 = vshll.u32 %v9054_v51, 16  ;;  %v4290_v7 = vshrl.u32 %v9060_v0, 16  ;;  %v1431_v61 = vld [vmem:[#allocation2 + $0x58] sm:$0xf] }
 0x13c   : > { %v6467_v49 = vcombine.low %v4265_v58, %v4274_v63  ;;  %v1526_v44 = vrot.slane %v1525_v62, 4  ;;  %v1535_v42 = vor.u32 %v1534_v8, %v1530_v43  ;;  %7059 = vmatpush3.bf16.msra.mxu1 %v8882_v34  ;;  %v6452_v11 = vrot.slane %v4276_v40, 11  ;;  %v1432_v58 = vld [vmem:[#allocation2 + $0x5c] sm:$0xf]  ;;  %v1433_v62 = vld [vmem:[#allocation2 + $0x60] sm:$0x1] }
 0x13d   : > { %v4283_v47 = vrot.slane %v4281_v26, 7  ;;  %v4293_v6 = vshll.u32 %v9060_v0, 16  ;;  %v1543_v20 = vshrl.u32 %v1428_v1, 16  ;;  %v1546_v15 = vshll.u32 %v1428_v1, 16  ;;  %7060 = vmatprep.subr.bf16.mxu1 %v7763_v9  ;;  %v4043_v40 = vld [vmem:[#allocation2 + $0x11c] sm:$0x8] }
 0x13e   : > { %7235 = vmatmul.mubr.bf16.gmra.mrb[16].mxu0 %v6467_v49  ;;  %v1531_v56 = vsel %vm8561_vm7, %v1526_v44, %v1530_v43  ;;  %v1536_v36 = vrot.slane %v1535_v42, 4  ;;  %v4292_v34 = vrot.slane %v4290_v7, 7  ;;  %v1552_v37 = vshll.u32 %v1429_v54, 16  ;;  %v7770_v26 = vld [vmem:[#allocation6 + $0xe0] sm:$0xff]  }
 0x13f   : > { %v4286_v24 = vor.u32 %v4284_v10, %v4283_v47  ;;  %v4288_v39 = vrot.slane %v4283_v47, 4  ;;  %v1545_v13 = vrot.slane %v1543_v20, 4  ;;  %v1548_v4 = vrot.slane %v1546_v15, 5  ;;  %v9087_v10 = vld [vmem:[#allocation2 + $0x120] sm:$0xf]  ;;  %v7774_v15 = vld [vmem:[#allocation6 + $0xe8] sm:$0xff]  }
 0x140   : > { %v1541_v48 = vsel %vm8561_vm7, %v1536_v36, %v1540_v38  ;;  %v1556_v32 = vshrl.u32 %v1429_v54, 16  ;;  %v4295_v60 = vor.u32 %v4293_v6, %v4292_v34  ;;  %v1554_v2 = vrot.slane %v1552_v37, 5  ;;  %7061 = vmatpush3.bf16.msra.mxu1 %v7763_v9  ;;  %v9091_v6 = vld [vmem:[#allocation2 + $0x124] sm:$0xf]  ;;  %v1434_v34 = vld [vmem:[#allocation2 + $0x6c] sm:$0xf] }
 0x141   : > { %v6332_v28 = vcombine.low %v1531_v56, %v1541_v48  ;;  %v4287_v33 = vsel %vm8195_vm2, %v6452_v11, %v4286_v24  ;;  %v1549_v14 = vor.u32 %v1548_v4, %v1545_v13  ;;  %v1562_v52 = vshll.u32 %v1430_v3, 16  ;;  %7062 = vmatprep.subr.bf16.mxu1 %v7765_v5  ;;  %v1435_v37 = vld [vmem:[#allocation2 + $0x70] sm:$0xf] }
 0x142   : > { %v1558_v57 = vrot.slane %v1556_v32, 4  ;;  %v4298_v12 = vshrl.u32 %v4040_v30, 16  ;;  %v4296_v18 = vsel %vm8195_vm2, %v4288_v39, %v4295_v60  ;;  %v4303_v25 = vshrl.u32 %v9071_v22, 16 }
 0x143   : > { %7030 = vmatprep.mubr.bf16.mxu1 %v6332_v28  ;;  %v4306_v53 = vshll.u32 %v9071_v22, 16  ;;  %v4312_v46 = vshrl.u32 %v9075_v17, 16  ;;  %v6468_v59 = vcombine.low %v4287_v33, %v4296_v18  ;;  %v1550_v50 = vrot.slane %v1549_v14, 4 }
 0x144   : > { %v1559_v19 = vor.u32 %v1558_v57, %v1554_v2  ;;  %v1564_v41 = vrot.slane %v1562_v52, 5  ;;  %v6453_v21 = vrot.slane %v4298_v12, 11  ;;  %v4305_v45 = vrot.slane %v4303_v25, 7  ;;  %7063 = vmatpush3.bf16.msra.mxu1 %v7765_v5 }
 0x145   : > { %v4314_v9 = vrot.slane %v4312_v46, 7  ;;  %v4315_v29 = vshll.u32 %v9075_v17, 16  ;;  %7238 = vmatprep.mubr.bf16.mxu0 %v6468_v59  ;;  %v1555_v43 = vsel %vm8561_vm7, %v1550_v50, %v1554_v2  ;;  %v1567_v63 = vshrl.u32 %v1431_v61, 16  ;;  %7064 = vmatprep.subr.bf16.mxu1 %v7767_v31  ;;  %v7778_v46 = vld [vmem:[#allocation6 + $0xf0] sm:$0xff]  }
 0x146   : > { %v1560_v8 = vrot.slane %v1559_v19, 4  ;;  %v1570_v38 = vshll.u32 %v1431_v61, 16  ;;  %v4308_v1 = vor.u32 %v4306_v53, %v4305_v45  ;;  %v4310_v49 = vrot.slane %v4305_v45, 4  ;;  %v1436_v61 = vld [vmem:[#allocation2 + $0x74] sm:$0x1] }
 0x147   : > { %v4317_v44 = vor.u32 %v4315_v29, %v4314_v9  ;;  %v1576_v42 = vshll.u32 %v1432_v58, 16  ;;  %v1569_v11 = vrot.slane %v1567_v63, 4  ;;  %v1580_v7 = vshrl.u32 %v1432_v58, 16  ;;  %v4046_v58 = vld [vmem:[#allocation2 + $0x130] sm:$0x8] }
 0x148   : > { %v1565_v54 = vsel %vm8561_vm7, %v1560_v8, %v1564_v41  ;;  %v1572_v47 = vrot.slane %v1570_v38, 5  ;;  %v4309_v56 = vsel %vm8195_vm2, %v6453_v21, %v4308_v1  ;;  %7065 = vmatpush3.bf16.msra.mxu1 %v7767_v31  ;;  %v1586_v39 = vshll.u32 %v1433_v62, 16  ;;  %v9103_v21 = vld [vmem:[#allocation2 + $0x134] sm:$0xf]  ;;  %v7782_v1 = vld [vmem:[#allocation6 + $0xf8] sm:$0xff]  }
 0x149   : > { %v6333_v3 = vcombine.low %v1555_v43, %v1565_v54  ;;  %v4318_v36 = vsel %vm8195_vm2, %v4310_v49, %v4317_v44  ;;  %v1578_v20 = vrot.slane %v1576_v42, 5  ;;  %v1582_v24 = vrot.slane %v1580_v7, 4  ;;  %7066 = vmatprep.subr.bf16.mxu1 %v7770_v26  ;;  %v9107_v43 = vld [vmem:[#allocation2 + $0x138] sm:$0xf] }
 0x14a   : > { %v6469_v30 = vcombine.low %v4309_v56, %v4318_v36  ;;  %v1573_v5 = vor.u32 %v1572_v47, %v1569_v11  ;;  %v4320_v48 = vshrl.u32 %v4043_v40, 16  ;;  %v4325_v13 = vshrl.u32 %v9087_v10, 16  ;;  %v1438_v11 = vld [vmem:[#allocation2 + $0x84] sm:$0xf] }
 0x14b   : > { %7031 = vmatmul.mubr.bf16.gmra.mrb[4].mxu1 %v6333_v3  ;;  %v4328_v4 = vshll.u32 %v9087_v10, 16  ;;  %v4334_v32 = vshrl.u32 %v9091_v6, 16  ;;  %v1583_v33 = vor.u32 %v1582_v24, %v1578_v20  ;;  %v1588_v60 = vrot.slane %v1586_v39, 5 }
 0x14c   : > { %7239 = vmatmul.mubr.bf16.gmra.mrb[20].mxu0 %v6469_v30  ;;  %v1574_v28 = vrot.slane %v1573_v5, 4  ;;  %v4337_v2 = vshll.u32 %v9091_v6, 16  ;;  %v6454_v14 = vrot.slane %v4320_v48, 11  ;;  %v4327_v57 = vrot.slane %v4325_v13, 7  ;;  %7067 = vmatpush3.bf16.msra.mxu1 %v7770_v26  ;;  %v1437_v26 = vld [vmem:[#allocation2 + $0x80] sm:$0xf] }
 0x14d   : > { %v4336_v52 = vrot.slane %v4334_v32, 7  ;;  %v1591_v12 = vshrl.u32 %v1434_v34, 16  ;;  %v1584_v18 = vrot.slane %v1583_v33, 4  ;;  %v1594_v25 = vshll.u32 %v1434_v34, 16  ;;  %7068 = vmatprep.subr.bf16.mxu1 %v7774_v15  ;;  %v1439_v13 = vld [vmem:[#allocation2 + $0x88] sm:$0x1] }
 0x14e   : > { %v1579_v31 = vsel %vm8561_vm7, %v1574_v28, %v1578_v20  ;;  %v1600_v53 = vshll.u32 %v1435_v37, 16  ;;  %v4330_v59 = vor.u32 %v4328_v4, %v4327_v57  ;;  %v4332_v50 = vrot.slane %v4327_v57, 4 }
 0x14f   : > { %v4339_v19 = vor.u32 %v4337_v2, %v4336_v52  ;;  %v1593_v41 = vrot.slane %v1591_v12, 4  ;;  %v1589_v45 = vsel %vm8561_vm7, %v1584_v18, %v1588_v60  ;;  %v1596_v9 = vrot.slane %v1594_v25, 5  ;;  %v9123_v18 = vld [vmem:[#allocation2 + $0x14c] sm:$0xf] }
 0x150   : > { %v1602_v29 = vrot.slane %v1600_v53, 5  ;;  %v1604_v62 = vshrl.u32 %v1435_v37, 16  ;;  %v6334_v8 = vcombine.low %v1579_v31, %v1589_v45  ;;  %v4331_v63 = vsel %vm8195_vm2, %v6454_v14, %v4330_v59  ;;  %7069 = vmatpush3.bf16.msra.mxu1 %v7774_v15  ;;  %v9119_v14 = vld [vmem:[#allocation2 + $0x148] sm:$0xf] }
 0x151   : > { %v4340_v38 = vsel %vm8195_vm2, %v4332_v50, %v4339_v19  ;;  %v1610_v40 = vshll.u32 %v1436_v61, 16  ;;  %v1597_v44 = vor.u32 %v1596_v9, %v1593_v41  ;;  %v4342_v54 = vshrl.u32 %v4046_v58, 16  ;;  %7070 = vmatprep.subr.bf16.mxu1 %v7778_v46  ;;  %v278_v61 = vld [vmem:[#allocation2 + $0x144] sm:$0x8]  ;;  %v1440_v50 = vld [vmem:[#allocation2 + $0x94] sm:$0xf] }
 0x152   : > { %v6470_v49 = vcombine.low %v4331_v63, %v4340_v38  ;;  %v1606_v42 = vrot.slane %v1604_v62, 4  ;;  %7034 = vmatprep.mubr.bf16.mxu1 %v6334_v8  ;;  %v4347_v7 = vshrl.u32 %v9103_v21, 16  ;;  %v4350_v3 = vshll.u32 %v9103_v21, 16  ;;  %v1441_v19 = vld [vmem:[#allocation2 + $0x98] sm:$0xf] }
 0x153   : > { %v1612_v47 = vrot.slane %v1610_v40, 5  ;;  %v4356_v56 = vshrl.u32 %v9107_v43, 16  ;;  %v1598_v36 = vrot.slane %v1597_v44, 4  ;;  %v6455_v30 = vrot.slane %v4342_v54, 11  ;;  %v1442_v54 = vld [vmem:[#allocation2 + $0x9c] sm:$0x1] }
 0x154   : > { %7242 = vmatprep.mubr.bf16.mxu0 %v6470_v49  ;;  %v1607_v20 = vor.u32 %v1606_v42, %v1602_v29  ;;  %v4359_v15 = vshll.u32 %v9107_v43, 16  ;;  %v4349_v5 = vrot.slane %v4347_v7, 7  ;;  %v1615_v39 = vshrl.u32 %v1437_v26, 16  ;;  %7071 = vmatpush3.bf16.msra.mxu1 %v7778_v46 }
 0x155   : > { %v4358_v24 = vrot.slane %v4356_v56, 7  ;;  %v1618_v34 = vshll.u32 %v1437_v26, 16  ;;  %v1603_v37 = vsel %vm8561_vm7, %v1598_v36, %v1602_v29  ;;  %v1624_v4 = vshll.u32 %v1438_v11, 16  ;;  %7072 = vmatprep.subr.bf16.mxu1 %v7782_v1  ;;  %v9131_v29 = vld [vmem:[#allocation6 + $0x100] sm:$0xff]  }
 0x156   : > { %v1608_v48 = vrot.slane %v1607_v20, 4  ;;  %v1628_v32 = vshrl.u32 %v1438_v11, 16  ;;  %v4352_v28 = vor.u32 %v4350_v3, %v4349_v5  ;;  %v4354_v33 = vrot.slane %v4349_v5, 4  ;;  %v281_v20 = vld [vmem:[#allocation2 + $0x158] sm:$0x8] }
 0x157   : > { %v4361_v60 = vor.u32 %v4359_v15, %v4358_v24  ;;  %v1617_v2 = vrot.slane %v1615_v39, 4  ;;  %v1620_v52 = vrot.slane %v1618_v34, 5  ;;  %v1626_v12 = vrot.slane %v1624_v4, 5  ;;  %v9144_v34 = vld [vmem:[#allocation2 + $0x160] sm:$0xf] }
 0x158   : > { %v1613_v57 = vsel %vm8561_vm7, %v1608_v48, %v1612_v47  ;;  %v1630_v31 = vrot.slane %v1628_v32, 4  ;;  %v4353_v53 = vsel %vm8195_vm2, %v6455_v30, %v4352_v28  ;;  %v1634_v59 = vshll.u32 %v1439_v13, 16  ;;  %7073 = vmatpush3.bf16.msra.mxu1 %v7782_v1  ;;  %v9142_v30 = vld [vmem:[#allocation2 + $0x15c] sm:$0xf]  ;;  %v1443_v32 = vld [vmem:[#allocation2 + $0xa8] sm:$0xf] }
 0x159   : > { %v6335_v25 = vcombine.low %v1603_v37, %v1613_v57  ;;  %v4362_v46 = vsel %vm8195_vm2, %v4354_v33, %v4361_v60  ;;  %v1621_v58 = vor.u32 %v1620_v52, %v1617_v2  ;;  %v279_v9 = vsel %vm8726_vm10, 0, %v278_v61  ;;  %7346 = vmatprep.subr.bf16.mxu1 %v9131_v29 }
 0x15a   : > { %v6471_v41 = vcombine.low %v4353_v53, %v4362_v46  ;;  %v1631_v45 = vor.u32 %v1630_v31, %v1626_v12  ;;  %v1636_v62 = vrot.slane %v1634_v59, 5  ;;  %280 = vst [vmem:[#allocation2 + $0x144] sm:$0x8] %v279_v9  ;;  %v4369_v8 = vshrl.u32 %v9119_v14, 16 }
 0x15b   : > { %7035 = vmatmul.mubr.bf16.gmra.mrb[8].mxu1 %v6335_v25  ;;  %v4372_v63 = vshll.u32 %v9119_v14, 16  ;;  %v4378_v38 = vshrl.u32 %v9123_v18, 16  ;;  %v1622_v40 = vrot.slane %v1621_v58, 4  ;;  %v4381_v1 = vshll.u32 %v9123_v18, 16  ;;  %v1444_v25 = vld [vmem:[#allocation2 + $0xac] sm:$0xf] }
 0x15c   : > { %7243 = vmatmul.mubr.bf16.gmra.mrb[24].mxu0 %v6471_v41  ;;  %v1632_v26 = vrot.slane %v1631_v45, 4  ;;  %v1639_v49 = vshrl.u32 %v1440_v50, 16  ;;  %v4371_v44 = vrot.slane %v4369_v8, 7  ;;  %v1642_v11 = vshll.u32 %v1440_v50, 16  ;;  %v1445_v8 = vld [vmem:[#allocation2 + $0xb0] sm:$0x1] }
 0x15d   : > { %v4380_v42 = vrot.slane %v4378_v38, 7  ;;  %v1648_v47 = vshll.u32 %v1441_v19, 16  ;;  %v1627_v7 = vsel %vm8561_vm7, %v1622_v40, %v1626_v12  ;;  %v1652_v36 = vshrl.u32 %v1441_v19, 16 }
 0x15e   : > { %v1637_v3 = vsel %vm8561_vm7, %v1632_v26, %v1636_v62  ;;  %v1641_v56 = vrot.slane %v1639_v49, 4  ;;  %v4374_v5 = vor.u32 %v4372_v63, %v4371_v44  ;;  %v4376_v24 = vrot.slane %v4371_v44, 4  ;;  %v1446_v49 = vld [vmem:[#allocation2 + $0xbc] sm:$0xf] }
 0x15f   : > { %v6336_v15 = vcombine.low %v1627_v7, %v1637_v3  ;;  %v4383_v39 = vor.u32 %v4381_v1, %v4380_v42  ;;  %v1644_v37 = vrot.slane %v1642_v11, 5  ;;  %v1650_v48 = vrot.slane %v1648_v47, 5  ;;  %v1447_v47 = vld [vmem:[#allocation2 + $0xc0] sm:$0xf] }
 0x160   : > { %v1654_v13 = vrot.slane %v1652_v36, 4  ;;  %v1658_v4 = vshll.u32 %v1442_v54, 16  ;;  %v282_v33 = vsel %vm8726_vm10, 0, %v281_v20  ;;  %v4391_v60 = vshrl.u32 %v9142_v30, 16  ;;  %v1448_v20 = vld [vmem:[#allocation2 + $0xc4] sm:$0x1] }
 0x161   : > { %7038 = vmatprep.mubr.bf16.mxu1 %v6336_v15  ;;  %v4384_v28 = vsel %vm8195_vm2, %v4376_v24, %v4383_v39  ;;  %v4394_v2 = vshll.u32 %v9142_v30, 16  ;;  %v4049_v61 = vld [vmem:[#allocation2 + $0x144] sm:$0x8]  ;;  %v1645_v57 = vor.u32 %v1644_v37, %v1641_v56  ;;  %283 = vst [vmem:[#allocation2 + $0x158] sm:$0x8] %v282_v33  ;;  %v4400_v31 = vshrl.u32 %v9144_v34, 16 }
 0x162   : > { %v1655_v52 = vor.u32 %v1654_v13, %v1650_v48  ;;  %v1660_v12 = vrot.slane %v1658_v4, 5  ;;  %v4364_v53 = vshrl.u32 %v4049_v61, 16  ;;  %v4393_v46 = vrot.slane %v4391_v60, 7  ;;  %v7806_v37 = vld [vmem:[#allocation2 + $0x30] sm:$0xf] }
 0x163   : > { %v4403_v59 = vshll.u32 %v9144_v34, 16  ;;  %v1663_v50 = vshrl.u32 %v1443_v32, 16  ;;  %v1646_v19 = vrot.slane %v1645_v57, 4  ;;  %v4402_v41 = vrot.slane %v4400_v31, 7 }
 0x164   : > { %v1656_v35 = vrot.slane %v1655_v52, 4  ;;  %v1666_v58 = vshll.u32 %v1443_v32, 16  ;;  %v6456_v45 = vrot.slane %v4364_v53, 11  ;;  %v4396_v9 = vor.u32 %v4394_v2, %v4393_v46  ;;  %v1449_v52 = vld [vmem:[#allocation2 + $0xd0] sm:$0xf] }
 0x165   : > { %v4398_v62 = vrot.slane %v4393_v46, 4  ;;  %v1665_v63 = vrot.slane %v1663_v50, 4  ;;  %v1651_v38 = vsel %vm8561_vm7, %v1646_v19, %v1650_v48  ;;  %v4405_v26 = vor.u32 %v4403_v59, %v4402_v41  ;;  %v7807_v48 = vld [vmem:[#allocation2 + $0x34] sm:$0xf]  ;;  %v7809_v41 = vld [vmem:[#allocation2 + $0x48] sm:$0xf] }
 0x166   : > { %v1661_v40 = vsel %vm8561_vm7, %v1656_v35, %v1660_v12  ;;  %v1668_v1 = vrot.slane %v1666_v58, 5  ;;  %v4375_v44 = vsel %vm8195_vm2, %v6456_v45, %v4374_v5  ;;  %v1672_v54 = vshll.u32 %v1444_v25, 16  ;;  %v1450_v46 = vld [vmem:[#allocation2 + $0xd4] sm:$0xf]  ;;  %v9164_v35 = vld [vmem:[#allocation2 + $0x44] sm:$0xf] }
 0x167   : > { %v6337_v42 = vcombine.low %v1651_v38, %v1661_v40  ;;  %v1676_v11 = vshrl.u32 %v1444_v25, 16  ;;  %v6472_v7 = vcombine.low %v4375_v44, %v4384_v28  ;;  %v4406_v3 = vsel %vm8195_vm2, %v4398_v62, %v4405_v26  ;;  %v1452_v44 = vld [vmem:[#allocation2 + $0xe4] sm:$0xf] }
 0x168   : > { %v1669_v56 = vor.u32 %v1668_v1, %v1665_v63  ;;  %v1682_v36 = vshll.u32 %v1445_v8, 16  ;;  %v4052_v15 = vld [vmem:[#allocation2 + $0x158] sm:$0x8]  ;;  %v1674_v24 = vrot.slane %v1672_v54, 5  ;;  %v6482_v13 = vcombine.low %v7806_v37, %v7807_v48  ;;  %v1451_v63 = vld [vmem:[#allocation2 + $0xd8] sm:$0x1] }
 0x169   : > { %7039 = vmatmul.mubr.bf16.gmra.mrb[12].mxu1 %v6337_v42  ;;  %v1678_v39 = vrot.slane %v1676_v11, 4  ;;  %v1687_v4 = vshrl.u32 %v1446_v49, 16  ;;  %7246 = vmatprep.mubr.bf16.mxu0 %v6472_v7  ;;  %v4386_v5 = vshrl.u32 %v4052_v15, 16  ;;  %v1690_v60 = vshll.u32 %v1446_v49, 16  ;;  %v1454_v48 = vld [vmem:[#allocation2 + $0xec] sm:$0x1] }
 0x16a   : > { %v1670_v32 = vrot.slane %v1669_v56, 4  ;;  %v1684_v33 = vrot.slane %v1682_v36, 5  ;;  %v1696_v61 = vshll.u32 %v1447_v47, 16  ;;  %v1700_v57 = vshrl.u32 %v1447_v47, 16 }
 0x16b   : > { %v1679_v28 = vor.u32 %v1678_v39, %v1674_v24  ;;  %v1689_v2 = vrot.slane %v1687_v4, 4  ;;  %v6457_v12 = vrot.slane %v4386_v5, 11  ;;  %v1692_v25 = vrot.slane %v1690_v60, 5  ;;  %v7811_v39 = vld [vmem:[#allocation2 + $0x5c] sm:$0xf] }
 0x16c   : > { %v1675_v31 = vsel %vm8561_vm7, %v1670_v32, %v1674_v24  ;;  %v1706_v53 = vshll.u32 %v1448_v20, 16  ;;  %v1698_v50 = vrot.slane %v1696_v61, 5  ;;  %v1702_v19 = vrot.slane %v1700_v57, 4  ;;  %v1453_v20 = vld [vmem:[#allocation2 + $0xe8] sm:$0xf] }
 0x16d   : > { %v1680_v59 = vrot.slane %v1679_v28, 4  ;;  %v6483_v58 = vcombine.low %v9164_v35, %v7809_v41  ;;  %v4397_v45 = vsel %vm8195_vm2, %v6457_v12, %v4396_v9  ;;  %v1693_v62 = vor.u32 %v1692_v25, %v1689_v2  ;;  %v7810_v24 = vld [vmem:[#allocation2 + $0x58] sm:$0xf]  ;;  %v1457_v41 = vld [vmem:[#allocation2 + $0x100] sm:$0x1] }
 0x16e   : > { %v1708_v8 = vrot.slane %v1706_v53, 5  ;;  %v1711_v38 = vshrl.u32 %v1449_v52, 16  ;;  %v6473_v40 = vcombine.low %v4397_v45, %v4406_v3  ;;  %v1703_v1 = vor.u32 %v1702_v19, %v1698_v50  ;;  %v1455_v28 = vld [vmem:[#allocation2 + $0xf8] sm:$0xf]  ;;  %v1456_v53 = vld [vmem:[#allocation2 + $0xfc] sm:$0xf] }
 0x16f   : > { %v1685_v26 = vsel %vm8561_vm7, %v1680_v59, %v1684_v33  ;;  %v1714_v49 = vshll.u32 %v1449_v52, 16  ;;  %v1694_v54 = vrot.slane %v1693_v62, 4  ;;  %v1720_v47 = vshll.u32 %v1450_v46, 16  ;;  %v9177_v19 = vld [vmem:[#allocation2 + $0x70] sm:$0xf] }
 0x170   : > { %v6338_v42 = vcombine.low %v1675_v31, %v1685_v26  ;;  %v1713_v11 = vrot.slane %v1711_v38, 4  ;;  %7247 = vmatmul.mubr.bf16.gmra.mrb[28].mxu0 %v6473_v40  ;;  %v1704_v7 = vrot.slane %v1703_v1, 4  ;;  %v1724_v36 = vshrl.u32 %v1450_v46, 16  ;;  %v7776_v40 = vld [vmem:[#allocation6 + $0x208] sm:$0xff]  }
 0x171   : > { %v1716_v56 = vrot.slane %v1714_v49, 5  ;;  %v1730_v9 = vshll.u32 %v1451_v63, 16  ;;  %7266 = vmatprep.mubr.bf16.mxu0 %v6482_v13  ;;  %v1699_v3 = vsel %vm8561_vm7, %v1694_v54, %v1698_v50  ;;  %v1722_v15 = vrot.slane %v1720_v47, 5  ;;  %v9175_v50 = vld [vmem:[#allocation2 + $0x6c] sm:$0xf] }
 0x172   : > { %7042 = vmatprep.mubr.bf16.mxu1 %v6338_v42  ;;  %v6484_v37 = vcombine.low %v7810_v24, %v7811_v39  ;;  %v1735_v4 = vshrl.u32 %v1452_v44, 16  ;;  %v1709_v5 = vsel %vm8561_vm7, %v1704_v7, %v1708_v8  ;;  %v1726_v33 = vrot.slane %v1724_v36, 4  ;;  %v1458_v7 = vld [vmem:[#allocation2 + $0x10c] sm:$0xf] }
 0x173   : > { %v1717_v32 = vor.u32 %v1716_v56, %v1713_v11  ;;  %v1732_v60 = vrot.slane %v1730_v9, 5  ;;  %v6339_v2 = vcombine.low %v1699_v3, %v1709_v5  ;;  %v1738_v57 = vshll.u32 %v1452_v44, 16  ;;  %v1459_v3 = vld [vmem:[#allocation2 + $0x110] sm:$0xf]  ;;  %v7780_v5 = vld [vmem:[#allocation6 + $0x210] sm:$0xff]  }
 0x174   : > { %v1737_v61 = vrot.slane %v1735_v4, 4  ;;  %v1744_v13 = vshll.u32 %v1453_v20, 16  ;;  %v1727_v12 = vor.u32 %v1726_v33, %v1722_v15  ;;  %v1748_v31 = vshrl.u32 %v1453_v20, 16 }
 0x175   : > { %v1718_v52 = vrot.slane %v1717_v32, 4  ;;  %v1754_v25 = vshll.u32 %v1454_v48, 16  ;;  %7043 = vmatmul.mubr.bf16.gmra.mrb[16].mxu1 %v6339_v2  ;;  %v1740_v46 = vrot.slane %v1738_v57, 5  ;;  %v6485_v35 = vcombine.low %v9175_v50, %v9177_v19  ;;  %v7815_v48 = vld [vmem:[#allocation2 + $0x84] sm:$0xf] }
 0x176   : > { %v1746_v59 = vrot.slane %v1744_v13, 5  ;;  %v1759_v45 = vshrl.u32 %v1455_v28, 16  ;;  %v1728_v8 = vrot.slane %v1727_v12, 4  ;;  %v1750_v63 = vrot.slane %v1748_v31, 4  ;;  %v1461_v13 = vld [vmem:[#allocation2 + $0x120] sm:$0xf] }
 0x177   : > { %v1723_v62 = vsel %vm8561_vm7, %v1718_v52, %v1722_v15  ;;  %v1756_v38 = vrot.slane %v1754_v25, 5  ;;  %v1741_v26 = vor.u32 %v1740_v46, %v1737_v61  ;;  %v1762_v49 = vshll.u32 %v1455_v28, 16  ;;  %v1465_v50 = vld [vmem:[#allocation2 + $0x138] sm:$0xf] }
 0x178   : > { %v1761_v1 = vrot.slane %v1759_v45, 4  ;;  %v1768_v44 = vshll.u32 %v1456_v53, 16  ;;  %7267 = vmatmul.mubr.bf16.vlgmr.msra.gmra.mrb[0].mxu0 %v6483_v58  ;;  %v1733_v42 = vsel %vm8561_vm7, %v1728_v8, %v1732_v60  ;;  %v1751_v54 = vor.u32 %v1750_v63, %v1746_v59  ;;  %v7814_v58 = vld [vmem:[#allocation2 + $0x80] sm:$0xf] }
 0x179   : > { %v1772_v11 = vshrl.u32 %v1456_v53, 16  ;;  %v1778_v47 = vshll.u32 %v1457_v41, 16  ;;  %7299 = vmatpush3.bf16.msra.mxu0 %v9029_v16  ;;  %v6340_v56 = vcombine.low %v1723_v62, %v1733_v42  ;;  %7270 = vmatprep.mubr.bf16.mxu0 %v6484_v37  ;;  %v1742_v36 = vrot.slane %v1741_v26, 4  ;;  %v1460_v16 = vld [vmem:[#allocation2 + $0x114] sm:$0x1]  ;;  %v7784_v53 = vld [vmem:[#allocation6 + $0x218] sm:$0xff]  }
 0x17a   : > { %v1764_v9 = vrot.slane %v1762_v49, 5  ;;  %v1770_v20 = vrot.slane %v1768_v44, 5  ;;  %v1752_v15 = vrot.slane %v1751_v54, 4  ;;  %7300 = vmatprep.subr.bf16.mxu0 %v7776_v40  ;;  %v6486_v4 = vcombine.low %v7814_v58, %v7815_v48  ;;  %v1462_v62 = vld [vmem:[#allocation2 + $0x124] sm:$0xf] }
 0x17b   : > { %v1774_v24 = vrot.slane %v1772_v11, 4  ;;  %v1780_v39 = vrot.slane %v1778_v47, 5  ;;  %7046 = vmatprep.mubr.bf16.mxu1 %v6340_v56  ;;  %v1747_v32 = vsel %vm8561_vm7, %v1742_v36, %v1746_v59  ;;  %v1783_v60 = vshrl.u32 %v1458_v7, 16  ;;  %v7817_v26 = vld [vmem:[#allocation2 + $0x98] sm:$0xf] }
 0x17c   : > { %v1765_v33 = vor.u32 %v1764_v9, %v1761_v1  ;;  %v1786_v37 = vshll.u32 %v1458_v7, 16  ;;  %v1757_v28 = vsel %vm8561_vm7, %v1752_v15, %v1756_v38  ;;  %v1792_v61 = vshll.u32 %v1459_v3, 16  ;;  %v7816_v38 = vld [vmem:[#allocation2 + $0x94] sm:$0xf]  ;;  %v1463_v49 = vld [vmem:[#allocation2 + $0x128] sm:$0x1] }
 0x17d   : > { %v1775_v2 = vor.u32 %v1774_v24, %v1770_v20  ;;  %v1796_v57 = vshrl.u32 %v1459_v3, 16  ;;  %v6341_v52 = vcombine.low %v1747_v32, %v1757_v28  ;;  %7301 = vmatpush3.bf16.msra.mxu0 %v7776_v40  ;;  %v1785_v31 = vrot.slane %v1783_v60, 4  ;;  %v1464_v47 = vld [vmem:[#allocation2 + $0x134] sm:$0xf]  ;;  %v7819_v48 = vld [vmem:[#allocation2 + $0xac] sm:$0xf] }
 0x17e   : > { %v1766_v12 = vrot.slane %v1765_v33, 4  ;;  %v1788_v25 = vrot.slane %v1786_v37, 5  ;;  %v1794_v41 = vrot.slane %v1792_v61, 5  ;;  %v1802_v45 = vshll.u32 %v1460_v16, 16  ;;  %7302 = vmatprep.subr.bf16.mxu0 %v7780_v5  ;;  %v2176_v28 = vld [vmem:[#allocation2 + $0x18] sm:$0x8] }
 0x17f   : > { %v1776_v46 = vrot.slane %v1775_v2, 4  ;;  %v1798_v59 = vrot.slane %v1796_v57, 4  ;;  %7047 = vmatmul.mubr.bf16.gmra.mrb[20].mxu1 %v6341_v52  ;;  %v6487_v1 = vcombine.low %v7816_v38, %v7817_v26  ;;  %v1807_v40 = vshrl.u32 %v1461_v13, 16  ;;  %v2179_v38 = vld [vmem:[#allocation2 + $0x2c] sm:$0x8] }
 0x180   : > { %v1771_v8 = vsel %vm8561_vm7, %v1766_v12, %v1770_v20  ;;  %v1789_v63 = vor.u32 %v1788_v25, %v1785_v31  ;;  %7271 = vmatmul.mubr.bf16.gmra.mrb[4].mxu0 %v6485_v35  ;;  %v1804_v54 = vrot.slane %v1802_v45, 5  ;;  %v1810_v11 = vshll.u32 %v1461_v13, 16  ;;  %v7787_v20 = vld [vmem:[#allocation6 + $0x220] sm:$0xff]   ;;  %v7820_v45 = vld [vmem:[#allocation2 + $0xbc] sm:$0xf] }
 0x181   : > { %v1781_v44 = vsel %vm8561_vm7, %v1776_v46, %v1780_v39  ;;  %v1799_v42 = vor.u32 %v1798_v59, %v1794_v41  ;;  %7274 = vmatprep.mubr.bf16.mxu0 %v6486_v4  ;;  %7303 = vmatpush3.bf16.msra.mxu0 %v7780_v5  ;;  %v1809_v36 = vrot.slane %v1807_v40, 4  ;;  %v1816_v9 = vshll.u32 %v1462_v62, 16  ;;  %v7818_v39 = vld [vmem:[#allocation2 + $0xa8] sm:$0xf]  ;;  %v1466_v4 = vld [vmem:[#allocation2 + $0x13c] sm:$0x1] }
 0x182   : > { %v6342_v7 = vcombine.low %v1771_v8, %v1781_v44  ;;  %v1790_v56 = vrot.slane %v1789_v63, 4  ;;  %v1812_v15 = vrot.slane %v1810_v11, 5  ;;  %v1820_v24 = vshrl.u32 %v1462_v62, 16  ;;  %7304 = vmatprep.subr.bf16.mxu0 %v7784_v53  ;;  %v7790_v46 = vld [vmem:[#allocation6 + $0x228] sm:$0xff]   ;;  %v7821_v62 = vld [vmem:[#allocation2 + $0xc0] sm:$0xf] }
 0x183   : > { %v1800_v3 = vrot.slane %v1799_v42, 4  ;;  %v1826_v58 = vshll.u32 %v1463_v49, 16  ;;  %v1818_v35 = vrot.slane %v1816_v9, 5  ;;  %v6488_v32 = vcombine.low %v7818_v39, %v7819_v48  ;;  %v9791_v11 = vld [vmem:[#allocation15_spill] sm:$0xff]  ;;  %v7793_v39 = vld [vmem:[#allocation6 + $0x230] sm:$0xff]  }
 0x184   : > { %7050 = vmatprep.mubr.bf16.mxu1 %v6342_v7  ;;  %v1795_v19 = vsel %vm8561_vm7, %v1790_v56, %v1794_v41  ;;  %v1831_v33 = vshrl.u32 %v1464_v47, 16  ;;  %v1813_v16 = vor.u32 %v1812_v15, %v1809_v36  ;;  %v1822_v60 = vrot.slane %v1820_v24, 4  ;;  %v7822_v56 = vld [vmem:[#allocation2 + $0xd0] sm:$0xf]  ;;  %v7823_v36 = vld [vmem:[#allocation2 + $0xd4] sm:$0xf] }
 0x185   : > { %v1805_v5 = vsel %vm8561_vm7, %v1800_v3, %v1804_v54  ;;  %v1828_v37 = vrot.slane %v1826_v58, 5  ;;  %v1834_v57 = vshll.u32 %v1464_v47, 16  ;;  %v1840_v13 = vshll.u32 %v1465_v50, 16  ;;  %7305 = vmatpush3.bf16.msra.mxu0 %v7784_v53  ;;  %v9790_v54 = vld [vmem:[#allocation32_spill] sm:$0xff] }
 0x186   : > { %v6343_v2 = vcombine.low %v1795_v19, %v1805_v5  ;;  %v1833_v61 = vrot.slane %v1831_v33, 4  ;;  %v1814_v52 = vrot.slane %v1813_v16, 4  ;;  %v1823_v12 = vor.u32 %v1822_v60, %v1818_v35  ;;  %7306 = vmatprep.subr.bf16.mxu0 %v7787_v20  ;;  %v9793_v58 = vld [vmem:[#allocation40_spill] sm:$0xff]  ;;  %v9218_v33 = vld [vmem:[#allocation2 + $0xe4] sm:$0xf] }
 0x187   : > { %v1844_v31 = vshrl.u32 %v1465_v50, 16  ;;  %v1850_v25 = vshll.u32 %v1466_v4, 16  ;;  %v1836_v41 = vrot.slane %v1834_v57, 5  ;;  %v1842_v59 = vrot.slane %v1840_v13, 5  ;;  %v9794_v50 = vld [vmem:[#allocation16_spill] sm:$0xff]  ;;  %v9796_v4 = vld [vmem:[#allocation31_spill] sm:$0xff] }
 0x188   : > { %7051 = vmatmul.mubr.bf16.gmra.mrb[24].mxu1 %v6343_v2  ;;  %v6489_v8 = vcombine.low %v7820_v45, %v7821_v62  ;;  %v2225_v63 = vshrl.u32 %v2176_v28, 16  ;;  %7275 = vmatmul.mubr.bf16.gmra.mrb[8].mxu0 %v6487_v1  ;;  %v1819_v26 = vsel %vm8561_vm7, %v1814_v52, %v1818_v35  ;;  %v1824_v49 = vrot.slane %v1823_v12, 4  ;;  %v2182_v1 = vld [vmem:[#allocation2 + $0x40] sm:$0x8]  ;;  %v9220_v5 = vld [vmem:[#allocation2 + $0xe8] sm:$0xf] }
 0x189   : > { %v1846_v53 = vrot.slane %v1844_v31, 4  ;;  %v1852_v40 = vrot.slane %v1850_v25, 5  ;;  %7278 = vmatprep.mubr.bf16.mxu0 %v6488_v32  ;;  %v1837_v44 = vor.u32 %v1836_v41, %v1833_v61  ;;  %v9792_v47 = vrot.slane %v9791_v11, 4  ;;  %7307 = vmatpush3.bf16.msra.mxu0 %v7787_v20  ;;  %v2185_v61 = vld [vmem:[#allocation2 + $0x54] sm:$0x8]  ;;  %v9797_v13 = vld [vmem:[#allocation21_spill] sm:$0xff] }
 0x18a   : > { %v6354_v42 = vrot.slane %v2225_v63, 11  ;;  %v6490_v9 = vcombine.low %v7822_v56, %v7823_v36  ;;  %v1829_v3 = vsel %vm8561_vm7, %v1824_v49, %v1828_v37  ;;  %v2247_v24 = vshrl.u32 %v2179_v38, 16  ;;  %7308 = vmatprep.subr.bf16.mxu0 %v7790_v46  ;;  %v9798_v52 = vld [vmem:[#allocation17_spill] sm:$0xff]  ;;  %v9800_v41 = vld [vmem:[#allocation22_spill] sm:$0xff]  ;;  %v9805_v56 = vld [vmem:[#allocation19_spill] sm:$0xff] }
 0x18b   : > { %v2245_v7 = vsel %vm8195_vm2, %v9792_v47, %v9790_v54  ;;  %v1847_v15 = vor.u32 %v1846_v53, %v1842_v59  ;;  %v9795_v19 = vrot.slane %v9794_v50, 4  ;;  %v6344_v48 = vcombine.low %v1819_v26, %v1829_v3  ;;  %v9801_v45 = vld [vmem:[#allocation18_spill] sm:$0xff]  ;;  %v9803_v26 = vld [vmem:[#allocation33_spill] sm:$0xff] }
 0x18c   : > { %v1838_v32 = vrot.slane %v1837_v44, 4  ;;  %v2236_v20 = vsel %vm8195_vm2, %v6354_v42, %v9796_v4  ;;  %v6491_v16 = vcombine.low %v9218_v33, %v9220_v5  ;;  %v6355_v28 = vrot.slane %v2247_v24, 11  ;;  %v2188_v44 = vld [vmem:[#allocation2 + $0x68] sm:$0x8]  ;;  %v9811_v4 = vld [vmem:[#allocation23_spill] sm:$0xff] }
 0x18d   : > { %v2267_v35 = vsel %vm8195_vm2, %v9795_v19, %v9793_v58  ;;  %v1848_v60 = vrot.slane %v1847_v15, 4  ;;  %v6370_v37 = vcombine.low %v2236_v20, %v2245_v7  ;;  %v2269_v2 = vshrl.u32 %v2182_v1, 16  ;;  %7054 = vmatprep.mubr.bf16.mxu1 %v6344_v48  ;;  %7309 = vmatpush3.bf16.msra.mxu0 %v7790_v46  ;;  %v7796_v46 = vld [vmem:[#allocation6 + $0x238] sm:$0xff]   ;;  %v9804_v7 = vld [vmem:[#allocation24_spill] sm:$0xff]  ;;  %v2191_v58 = vld [vmem:[#allocation2 + $0x7c] sm:$0x8] }
 0x18e   : > { %v1843_v57 = vsel %vm8561_vm7, %v1838_v32, %v1842_v59  ;;  %v9799_v12 = vshll.u32 %v9798_v52, 16  ;;  %v2281_v25 = vrot.slane %v9797_v13, 4  ;;  %v9802_v62 = vshll.u32 %v9801_v45, 16  ;;  %7310 = vmatprep.subr.bf16.mxu0 %v7793_v39  ;;  %v9810_v32 = vld [vmem:[#allocation27_spill] sm:$0xff]  ;;  %v9816_v45 = vld [vmem:[#allocation34_spill] sm:$0xff] }
 0x18f   : > { %v1853_v38 = vsel %vm8561_vm7, %v1848_v60, %v1852_v40  ;;  %v2258_v49 = vsel %vm8195_vm2, %v6355_v28, %v9803_v26  ;;  %v6356_v53 = vrot.slane %v2269_v2, 11  ;;  %v6492_v59 = vcombine.low %v9054_v51, %v9060_v0  ;;  %v9807_v51 = vld [vmem:[#allocation26_spill] sm:$0xff]  ;;  %v9808_v0 = vld [vmem:[#allocation20_spill] sm:$0xff]  ;;  %v9813_v2 = vld [vmem:[#allocation29_spill] sm:$0xff] }
 0x190   : > { %v2279_v31 = vor.u32 %v9799_v12, %v9797_v13  ;;  %v2288_v63 = vor.u32 %v9802_v62, %v9800_v41  ;;  %v6345_v42 = vcombine.low %v1843_v57, %v1853_v38  ;;  %v6371_v54 = vcombine.low %v2258_v49, %v2267_v35  ;;  %7279 = vmatmul.mubr.bf16.gmra.mrb[12].mxu0 %v6489_v8  ;;  %v9817_v62 = vld [vmem:[#allocation28_spill] sm:$0xff]  ;;  %v9832_v33 = vld [vmem:[#allocation42_spill] sm:$0xff] }
 0x191   : > { %v2291_v47 = vshrl.u32 %v2185_v61, 16  ;;  %v9806_v36 = vshll.u32 %v9805_v56, 16  ;;  %v2303_v3 = vrot.slane %v9804_v7, 4  ;;  %v9809_v15 = vshll.u32 %v9808_v0, 16  ;;  %7282 = vmatprep.mubr.bf16.mxu0 %v6490_v9  ;;  %v9814_v61 = vld [vmem:[#allocation25_spill] sm:$0xff]  ;;  %7311 = vmatpush3.bf16.msra.mxu0 %v7793_v39 }
 0x192   : > { %v2289_v11 = vsel %vm8195_vm2, %v2281_v25, %v2288_v63  ;;  %v2280_v40 = vsel %vm8195_vm2, %v6356_v53, %v2279_v31  ;;  %7055 = vmatmul.mubr.bf16.gmra.mrb[28].mxu1 %v6345_v42  ;;  %v6493_v8 = vcombine.low %v9071_v22, %v9075_v17  ;;  %v2313_v35 = vshrl.u32 %v2188_v44, 16  ;;  %v2194_v31 = vld [vmem:[#allocation2 + $0x90] sm:$0x8]  ;;  %7312 = vmatprep.subr.bf16.mxu0 %v7796_v46  ;;  %v9819_v53 = vld [vmem:[#allocation36_spill] sm:$0xff]  ;;  %v9820_v44 = vld [vmem:[#allocation30_spill] sm:$0xff] }
 0x193   : > { %v2301_v1 = vor.u32 %v9806_v36, %v9804_v7  ;;  %v2310_v24 = vor.u32 %v9809_v15, %v9807_v51  ;;  %v6372_v50 = vcombine.low %v2280_v40, %v2289_v11  ;;  %v6357_v19 = vrot.slane %v2291_v47, 11  ;;  %7074 = vmatprep.mubr.bf16.mxu1 %v6370_v37  ;;  %v2197_v40 = vld [vmem:[#allocation2 + $0xa4] sm:$0x8] }
 0x194   : > { %v9812_v20 = vshll.u32 %v9811_v4, 16  ;;  %v2325_v28 = vrot.slane %v9810_v32, 4  ;;  %v9815_v57 = vshll.u32 %v9814_v61, 16  ;;  %v6358_v52 = vrot.slane %v2313_v35, 11  ;;  %v9822_v36 = vld [vmem:[#allocation38_spill] sm:$0xff]  ;;  %v9829_v61 = vld [vmem:[#allocation41_spill] sm:$0xff] }
 0x195   : > { %v2311_v48 = vsel %vm8195_vm2, %v2303_v3, %v2310_v24  ;;  %v2302_v13 = vsel %vm8195_vm2, %v6357_v19, %v2301_v1  ;;  %v6494_v37 = vcombine.low %v9087_v10, %v9091_v6  ;;  %v2335_v12 = vshrl.u32 %v2191_v58, 16  ;;  %v9823_v1 = vld [vmem:[#allocation35_spill] sm:$0xff]  ;;  %7313 = vmatpush3.bf16.msra.mxu0 %v7796_v46  ;;  %v9826_v19 = vld [vmem:[#allocation37_spill] sm:$0xff]  ;;  %v2200_v4 = vld [vmem:[#allocation2 + $0xb8] sm:$0x8] }
 0x196   : > { %v2323_v60 = vor.u32 %v9812_v20, %v9810_v32  ;;  %v2332_v9 = vor.u32 %v9815_v57, %v9813_v2  ;;  %v9266_v25 = vcombine.low %v2302_v13, %v2311_v48  ;;  %v9818_v63 = vshll.u32 %v9817_v62, 16  ;;  %v9825_v58 = vld [vmem:[#allocation39_spill] sm:$0xff]  ;;  %v9296_v20 = vld [vmem:[#allocation2 + $0xbc] sm:$0xf]  ;;  %v9306_v13 = vld [vmem:[#allocation2 + $0xc0] sm:$0xf] }
 0x197   : > { %v2347_v39 = vrot.slane %v9816_v45, 4  ;;  %v6359_v49 = vrot.slane %v2335_v12, 11  ;;  %v9821_v42 = vshll.u32 %v9820_v44, 16  ;;  %v6495_v47 = vcombine.low %v9103_v21, %v9107_v43  ;;  %v9828_v2 = vld [vmem:[#allocation43_spill] sm:$0xff]  ;;  %v7828_v10 = vld [vmem:[#allocation6 + $0x118] sm:$0xff]  }
 0x198   : > { %v2333_v41 = vsel %vm8195_vm2, %v2325_v28, %v2332_v9  ;;  %v2345_v38 = vor.u32 %v9818_v63, %v9816_v45  ;;  %v2324_v26 = vsel %vm8195_vm2, %v6358_v52, %v2323_v60  ;;  %v2357_v56 = vshrl.u32 %v2194_v31, 16  ;;  %7283 = vmatmul.mubr.bf16.gmra.mrb[16].mxu0 %v6491_v16  ;;  %v9831_v31 = vld [vmem:[#allocation44_spill] sm:$0xff]  ;;  %v5083_v63 = vld [vmem:[#allocation2 + $0x30] sm:$0xf]  ;;  %v5090_v43 = vld [vmem:[#allocation2 + $0x5c] sm:$0xf] }
 0x199   : > { %v2354_v11 = vor.u32 %v9821_v42, %v9819_v53  ;;  %v9281_v7 = vcombine.low %v2324_v26, %v2333_v41  ;;  %v9824_v3 = vshll.u32 %v9823_v1, 16  ;;  %v2369_v0 = vrot.slane %v9822_v36, 4  ;;  %7286 = vmatprep.mubr.bf16.mxu0 %v6492_v59 }
 0x19a   : > { %v2346_v15 = vsel %vm8195_vm2, %v6359_v49, %v2345_v38  ;;  %v9827_v35 = vshll.u32 %v9826_v19, 16  ;;  %v6496_v32 = vcombine.low %v9119_v14, %v9123_v18  ;;  %v6360_v60 = vrot.slane %v2357_v56, 11  ;;  %7075 = vmatmul.mubr.bf16.vlgmr.msra.gmra.mrb[0].mxu1 %v6371_v54  ;;  %v7826_v38 = vld [vmem:[#allocation6 + $0x108] sm:$0xff]  }
 0x19b   : > { %v2367_v51 = vor.u32 %v9824_v3, %v9822_v36  ;;  %v2355_v24 = vsel %vm8195_vm2, %v2347_v39, %v2354_v11  ;;  %v2379_v28 = vshrl.u32 %v2197_v40, 16  ;;  %v9830_v57 = vshll.u32 %v9829_v61, 16  ;;  %7354 = vmatpush3.bf16.msra.mxu1 %v9131_v29  ;;  %7078 = vmatprep.mubr.bf16.mxu1 %v6372_v50  ;;  %v5084_v50 = vld [vmem:[#allocation2 + $0x34] sm:$0xf]  ;;  %v5085_v40 = vld [vmem:[#allocation2 + $0x38] sm:$0x1] }
 0x19c   : > { %v2376_v48 = vor.u32 %v9827_v35, %v9825_v58  ;;  %v9301_v46 = vcombine.low %v2346_v15, %v2355_v24  ;;  %v2391_v12 = vrot.slane %v9828_v2, 4  ;;  %v9833_v5 = vshll.u32 %v9832_v33, 16  ;;  %7347 = vmatprep.subr.bf16.mxu1 %v7826_v38  ;;  %v9331_v19 = vld [vmem:[#allocation2 + $0xd0] sm:$0xf]  ;;  %v7827_v35 = vld [vmem:[#allocation6 + $0x110] sm:$0xff]  }
 0x19d   : > { %v2389_v9 = vor.u32 %v9830_v57, %v9828_v2  ;;  %v6497_v41 = vcombine.low %v9142_v30, %v9144_v34  ;;  %v2368_v45 = vsel %vm8195_vm2, %v6360_v60, %v2367_v51  ;;  %v6361_v54 = vrot.slane %v2379_v28, 11  ;;  %v2203_v51 = vld [vmem:[#allocation2 + $0xcc] sm:$0x8]  ;;  %v5087_v33 = vld [vmem:[#allocation2 + $0x48] sm:$0xf] }
 0x19e   : > { %v2377_v52 = vsel %vm8195_vm2, %v2369_v0, %v2376_v48  ;;  %v2398_v16 = vor.u32 %v9833_v5, %v9831_v31  ;;  %v2401_v59 = vshrl.u32 %v2200_v4, 16  ;;  %v2406_v62 = vshrl.u32 %v9296_v20, 16 }
 0x19f   : > { %v9320_v39 = vcombine.low %v2368_v45, %v2377_v52  ;;  %v2409_v49 = vshll.u32 %v9296_v20, 16  ;;  %v2415_v29 = vshrl.u32 %v9306_v13, 16  ;;  %v2390_v53 = vsel %vm8195_vm2, %v6361_v54, %v2389_v9  ;;  %7355 = vmatpush3.bf16.msra.mxu1 %v7826_v38  ;;  %v9338_v9 = vld [vmem:[#allocation2 + $0xd4] sm:$0xf] }
 0x1a0   : > { %v2399_v26 = vsel %vm8195_vm2, %v2391_v12, %v2398_v16  ;;  %v6362_v44 = vrot.slane %v2401_v59, 11  ;;  %v2408_v42 = vrot.slane %v2406_v62, 7  ;;  %v2418_v11 = vshll.u32 %v9306_v13, 16  ;;  %7348 = vmatprep.subr.bf16.mxu1 %v7827_v35  ;;  %7287 = vmatmul.mubr.bf16.gmra.mrb[20].mxu0 %v6493_v8  ;;  %v5086_v8 = vld [vmem:[#allocation2 + $0x44] sm:$0xf] }
 0x1a1   : > { %v9329_v56 = vcombine.low %v2390_v53, %v2399_v26  ;;  %v2417_v36 = vrot.slane %v2415_v29, 7  ;;  %v5132_v1 = vshrl.u32 %v5083_v63, 16  ;;  %v5135_v3 = vshll.u32 %v5083_v63, 16  ;;  %7290 = vmatprep.mubr.bf16.mxu0 %v6494_v37  ;;  %v5088_v63 = vld [vmem:[#allocation2 + $0x4c] sm:$0x1] }
 0x1a2   : > { %v2411_v0 = vor.u32 %v2409_v49, %v2408_v42  ;;  %v2413_v15 = vrot.slane %v2408_v42, 4  ;;  %v5141_v24 = vshll.u32 %v5084_v50, 16  ;;  %v5145_v58 = vshrl.u32 %v5084_v50, 16  ;;  %7079 = vmatmul.mubr.bf16.gmra.mrb[4].mxu1 %v9266_v25  ;;  %v9355_v42 = vld [vmem:[#allocation2 + $0xe4] sm:$0xf] }
 0x1a3   : > { %v2420_v48 = vor.u32 %v2418_v11, %v2417_v36  ;;  %v5134_v4 = vrot.slane %v5132_v1, 4  ;;  %v5137_v60 = vrot.slane %v5135_v3, 5  ;;  %v5151_v28 = vshll.u32 %v5085_v40, 16  ;;  %7082 = vmatprep.mubr.bf16.mxu1 %v9281_v7  ;;  %7356 = vmatpush3.bf16.msra.mxu1 %v7827_v35  ;;  %v9359_v3 = vld [vmem:[#allocation2 + $0xe8] sm:$0xf] }
 0x1a4   : > { %v2412_v2 = vsel %vm8195_vm2, %v6362_v44, %v2411_v0  ;;  %v5143_v61 = vrot.slane %v5141_v24, 5  ;;  %v5147_v57 = vrot.slane %v5145_v58, 4  ;;  %v2423_v52 = vshrl.u32 %v2203_v51, 16  ;;  %7349 = vmatprep.subr.bf16.mxu1 %v7828_v10  ;;  %v2206_v44 = vld [vmem:[#allocation2 + $0xe0] sm:$0x8]  ;;  %v7829_v24 = vld [vmem:[#allocation6 + $0x120] sm:$0xff]  }
 0x1a5   : > { %v2421_v12 = vsel %vm8195_vm2, %v2413_v15, %v2420_v48  ;;  %v5138_v31 = vor.u32 %v5137_v60, %v5134_v4  ;;  %v5153_v22 = vrot.slane %v5151_v28, 5  ;;  %v2428_v17 = vshrl.u32 %v9331_v19, 16  ;;  %v5089_v28 = vld [vmem:[#allocation2 + $0x58] sm:$0xf] }
 0x1a6   : > { %v9348_v5 = vcombine.low %v2412_v2, %v2421_v12  ;;  %v5148_v16 = vor.u32 %v5147_v57, %v5143_v61  ;;  %v6363_v25 = vrot.slane %v2423_v52, 11  ;;  %v2431_v45 = vshll.u32 %v9331_v19, 16 }
 0x1a7   : > { %v5139_v6 = vrot.slane %v5138_v31, 4  ;;  %v2430_v37 = vrot.slane %v2428_v17, 7  ;;  %v2437_v54 = vshrl.u32 %v9338_v9, 16  ;;  %v2440_v59 = vshll.u32 %v9338_v9, 16  ;;  %7357 = vmatpush3.bf16.msra.mxu1 %v7828_v10 }
 0x1a8   : > { %v5149_v62 = vrot.slane %v5148_v16, 4  ;;  %v5156_v38 = vshrl.u32 %v5086_v8, 16  ;;  %v5159_v26 = vshll.u32 %v5086_v8, 16  ;;  %v5165_v7 = vshll.u32 %v5087_v33, 16  ;;  %7350 = vmatprep.subr.bf16.mxu1 %v7829_v24  ;;  %7291 = vmatmul.mubr.bf16.gmra.mrb[24].mxu0 %v6495_v47  ;;  %v5091_v8 = vld [vmem:[#allocation2 + $0x60] sm:$0x1] }
 0x1a9   : > { %v5144_v49 = vsel %vm8561_vm7, %v5139_v6, %v5143_v61  ;;  %v2433_v29 = vor.u32 %v2431_v45, %v2430_v37  ;;  %v2435_v50 = vrot.slane %v2430_v37, 4  ;;  %v2439_v53 = vrot.slane %v2437_v54, 7  ;;  %7294 = vmatprep.mubr.bf16.mxu0 %v6496_v32  ;;  %v2209_v37 = vld [vmem:[#allocation2 + $0xf4] sm:$0x8] }
 0x1aa   : > { %v5154_v11 = vsel %vm8561_vm7, %v5149_v62, %v5153_v22  ;;  %v5158_v40 = vrot.slane %v5156_v38, 4  ;;  %v5161_v36 = vrot.slane %v5159_v26, 5  ;;  %v5167_v1 = vrot.slane %v5165_v7, 5  ;;  %7083 = vmatmul.mubr.bf16.gmra.mrb[8].mxu1 %v9301_v46  ;;  %v7830_v22 = vld [vmem:[#allocation6 + $0x128] sm:$0xff]   ;;  %v9381_v38 = vld [vmem:[#allocation2 + $0xf8] sm:$0xf] }
 0x1ab   : > { %v6506_v51 = vcombine.low %v5144_v49, %v5154_v11  ;;  %v2434_v0 = vsel %vm8195_vm2, %v6363_v25, %v2433_v29  ;;  %v2442_v15 = vor.u32 %v2440_v59, %v2439_v53  ;;  %v5169_v58 = vshrl.u32 %v5087_v33, 16  ;;  %7086 = vmatprep.mubr.bf16.mxu1 %v9320_v39  ;;  %7358 = vmatpush3.bf16.msra.mxu1 %v7829_v24  ;;  %v7831_v53 = vld [vmem:[#allocation6 + $0x130] sm:$0xff]  }
 0x1ac   : > { %v5162_v35 = vor.u32 %v5161_v36, %v5158_v40  ;;  %v5175_v48 = vshll.u32 %v5088_v63, 16  ;;  %v2445_v4 = vshrl.u32 %v2206_v44, 16  ;;  %v2450_v60 = vshrl.u32 %v9355_v42, 16  ;;  %7351 = vmatprep.subr.bf16.mxu1 %v7830_v22 }
 0x1ad   : > { %v2443_v2 = vsel %vm8195_vm2, %v2435_v50, %v2442_v15  ;;  %v5171_v61 = vrot.slane %v5169_v58, 4  ;;  %v2453_v57 = vshll.u32 %v9355_v42, 16  ;;  %v2459_v21 = vshrl.u32 %v9359_v3, 16  ;;  %v9389_v50 = vld [vmem:[#allocation2 + $0xfc] sm:$0xf] }
 0x1ae   : > { %v9376_v47 = vcombine.low %v2434_v0, %v2443_v2  ;;  %v5163_v52 = vrot.slane %v5162_v35, 4  ;;  %v5177_v12 = vrot.slane %v5175_v48, 5  ;;  %v6364_v46 = vrot.slane %v2445_v4, 11  ;;  %v5093_v35 = vld [vmem:[#allocation2 + $0x70] sm:$0xf]  ;;  %v7832_v2 = vld [vmem:[#allocation6 + $0x138] sm:$0xff]  }
 0x1af   : > { %v5172_v31 = vor.u32 %v5171_v61, %v5167_v1  ;;  %v2452_v14 = vrot.slane %v2450_v60, 7  ;;  %v2461_v18 = vrot.slane %v2459_v21, 7  ;;  %v2462_v32 = vshll.u32 %v9359_v3, 16  ;;  %7359 = vmatpush3.bf16.msra.mxu1 %v7830_v22 }
 0x1b0   : > { %v5168_v17 = vsel %vm8561_vm7, %v5163_v52, %v5167_v1  ;;  %v5180_v33 = vshrl.u32 %v5089_v28, 16  ;;  %v5183_v16 = vshll.u32 %v5089_v28, 16  ;;  %v5189_v39 = vshll.u32 %v5090_v43, 16  ;;  %7352 = vmatprep.subr.bf16.mxu1 %v7831_v53  ;;  %7295 = vmatmul.mubr.bf16.gmra.mrb[28].mxu0 %v6497_v41  ;;  %v5092_v1 = vld [vmem:[#allocation2 + $0x6c] sm:$0xf] }
 0x1b1   : > { %v5173_v25 = vrot.slane %v5172_v31, 4  ;;  %v2455_v45 = vor.u32 %v2453_v57, %v2452_v14  ;;  %v2457_v10 = vrot.slane %v2452_v14, 4  ;;  %v2464_v6 = vor.u32 %v2462_v32, %v2461_v18  ;;  %7314 = vmatprep.mubr.bf16.mxu0 %v6506_v51  ;;  %v9402_v14 = vld [vmem:[#allocation2 + $0x10c] sm:$0xf] }
 0x1b2   : > { %v5182_v54 = vrot.slane %v5180_v33, 4  ;;  %v5185_v59 = vrot.slane %v5183_v16, 5  ;;  %v5191_v62 = vrot.slane %v5189_v39, 5  ;;  %v5193_v63 = vshrl.u32 %v5090_v43, 16  ;;  %7087 = vmatmul.mubr.bf16.gmra.mrb[12].mxu1 %v9329_v56  ;;  %v5094_v56 = vld [vmem:[#allocation2 + $0x74] sm:$0x1] }
 0x1b3   : > { %v5178_v26 = vsel %vm8561_vm7, %v5173_v25, %v5177_v12  ;;  %v2456_v7 = vsel %vm8195_vm2, %v6364_v46, %v2455_v45  ;;  %v2465_v49 = vsel %vm8195_vm2, %v2457_v10, %v2464_v6  ;;  %v5199_v29 = vshll.u32 %v5091_v8, 16  ;;  %7090 = vmatprep.mubr.bf16.mxu1 %v9348_v5  ;;  %7360 = vmatpush3.bf16.msra.mxu1 %v7831_v53  ;;  %v2212_v43 = vld [vmem:[#allocation2 + $0x108] sm:$0x8]  ;;  %v9408_v25 = vld [vmem:[#allocation2 + $0x110] sm:$0xf] }
 0x1b4   : > { %v6507_v44 = vcombine.low %v5168_v17, %v5178_v26  ;;  %v6380_v11 = vcombine.low %v2456_v7, %v2465_v49  ;;  %v5186_v40 = vor.u32 %v5185_v59, %v5182_v54  ;;  %v5195_v36 = vrot.slane %v5193_v63, 4  ;;  %7353 = vmatprep.subr.bf16.mxu1 %v7832_v2  ;;  %v5095_v54 = vld [vmem:[#allocation2 + $0x80] sm:$0xf] }
 0x1b5   : > { %v5201_v0 = vrot.slane %v5199_v29, 5  ;;  %v2467_v15 = vshrl.u32 %v2209_v37, 16  ;;  %v2472_v24 = vshrl.u32 %v9381_v38, 16  ;;  %v2475_v58 = vshll.u32 %v9381_v38, 16 }
 0x1b6   : > { %v5187_v48 = vrot.slane %v5186_v40, 4  ;;  %v5196_v30 = vor.u32 %v5195_v36, %v5191_v62  ;;  %v2481_v34 = vshrl.u32 %v9389_v50, 16  ;;  %v2484_v41 = vshll.u32 %v9389_v50, 16 }
 0x1b7   : > { %v6365_v4 = vrot.slane %v2467_v15, 11  ;;  %v2474_v60 = vrot.slane %v2472_v24, 7  ;;  %v5204_v51 = vshrl.u32 %v5092_v1, 16  ;;  %v5207_v28 = vshll.u32 %v5092_v1, 16  ;;  %7361 = vmatpush3.bf16.msra.mxu1 %v7832_v2  ;;  %v5097_v1 = vld [vmem:[#allocation2 + $0x88] sm:$0x1] }
 0x1b8   : > { %v5192_v61 = vsel %vm8561_vm7, %v5187_v48, %v5191_v62  ;;  %v5197_v57 = vrot.slane %v5196_v30, 4  ;;  %v2483_v21 = vrot.slane %v2481_v34, 7  ;;  %v5213_v5 = vshll.u32 %v5093_v35, 16  ;;  %7315 = vmatmul.mubr.bf16.vlgmr.msra.gmra.mrb[0].mxu0 %v6507_v44  ;;  %v5096_v44 = vld [vmem:[#allocation2 + $0x84] sm:$0xf] }
 0x1b9   : > { %v2477_v52 = vor.u32 %v2475_v58, %v2474_v60  ;;  %v2479_v12 = vrot.slane %v2474_v60, 4  ;;  %v5206_v46 = vrot.slane %v5204_v51, 4  ;;  %v5209_v31 = vrot.slane %v5207_v28, 5  ;;  %v2215_v48 = vld [vmem:[#allocation2 + $0x11c] sm:$0x8] }
 0x1ba   : > { %v5202_v18 = vsel %vm8561_vm7, %v5197_v57, %v5201_v0  ;;  %v2486_v32 = vor.u32 %v2484_v41, %v2483_v21  ;;  %v5215_v22 = vrot.slane %v5213_v5, 5  ;;  %v5217_v17 = vshrl.u32 %v5093_v35, 16  ;;  %7091 = vmatmul.mubr.bf16.gmra.mrb[16].mxu1 %v9376_v47  ;;  %v9425_v5 = vld [vmem:[#allocation2 + $0x124] sm:$0xf] }
 0x1bb   : > { %v6508_v8 = vcombine.low %v5192_v61, %v5202_v18  ;;  %v2478_v33 = vsel %vm8195_vm2, %v6365_v4, %v2477_v52  ;;  %v5210_v16 = vor.u32 %v5209_v31, %v5206_v46  ;;  %v5223_v39 = vshll.u32 %v5094_v56, 16  ;;  %7094 = vmatprep.mubr.bf16.mxu1 %v6380_v11  ;;  %v9419_v4 = vld [vmem:[#allocation2 + $0x120] sm:$0xf]  ;;  %v5098_v31 = vld [vmem:[#allocation2 + $0x94] sm:$0xf] }
 0x1bc   : > { %v2487_v45 = vsel %vm8195_vm2, %v2479_v12, %v2486_v32  ;;  %v5219_v10 = vrot.slane %v5217_v17, 4  ;;  %v2489_v6 = vshrl.u32 %v2212_v43, 16  ;;  %v2494_v37 = vshrl.u32 %v9402_v14, 16 }
 0x1bd   : > { %7318 = vmatprep.mubr.bf16.mxu0 %v6508_v8  ;;  %v6381_v59 = vcombine.low %v2478_v33, %v2487_v45  ;;  %v5211_v62 = vrot.slane %v5210_v16, 4  ;;  %v5225_v63 = vrot.slane %v5223_v39, 5  ;;  %v2497_v26 = vshll.u32 %v9402_v14, 16  ;;  %v5099_v8 = vld [vmem:[#allocation2 + $0x98] sm:$0xf] }
 0x1be   : > { %v5220_v7 = vor.u32 %v5219_v10, %v5215_v22  ;;  %v6366_v49 = vrot.slane %v2489_v6, 11  ;;  %v2496_v29 = vrot.slane %v2494_v37, 7  ;;  %v2503_v53 = vshrl.u32 %v9408_v25, 16  ;;  %v5100_v10 = vld [vmem:[#allocation2 + $0x9c] sm:$0x1] }
 0x1bf   : > { %v5216_v40 = vsel %vm8561_vm7, %v5211_v62, %v5215_v22  ;;  %v2506_v36 = vshll.u32 %v9408_v25, 16  ;;  %v5228_v47 = vshrl.u32 %v5095_v54, 16  ;;  %v5231_v0 = vshll.u32 %v5095_v54, 16  ;;  %v2218_v62 = vld [vmem:[#allocation2 + $0x130] sm:$0x8] }
 0x1c0   : > { %v5221_v15 = vrot.slane %v5220_v7, 4  ;;  %v2499_v24 = vor.u32 %v2497_v26, %v2496_v29  ;;  %v2501_v58 = vrot.slane %v2496_v29, 4  ;;  %v2505_v35 = vrot.slane %v2503_v53, 7  ;;  %v9435_v29 = vld [vmem:[#allocation2 + $0x134] sm:$0xf] }
 0x1c1   : > { %v5230_v11 = vrot.slane %v5228_v47, 4  ;;  %v5233_v30 = vrot.slane %v5231_v0, 5  ;;  %v5237_v34 = vshll.u32 %v5096_v44, 16  ;;  %v5241_v41 = vshrl.u32 %v5096_v44, 16 }
 0x1c2   : > { %v5226_v60 = vsel %vm8561_vm7, %v5221_v15, %v5225_v63  ;;  %v2500_v56 = vsel %vm8195_vm2, %v6366_v49, %v2499_v24  ;;  %v2508_v51 = vor.u32 %v2506_v36, %v2505_v35  ;;  %v5247_v28 = vshll.u32 %v5097_v1, 16  ;;  %7095 = vmatmul.mubr.bf16.gmra.mrb[20].mxu1 %v6381_v59  ;;  %v9439_v1 = vld [vmem:[#allocation2 + $0x138] sm:$0xf] }
 0x1c3   : > { %v6509_v2 = vcombine.low %v5216_v40, %v5226_v60  ;;  %v5234_v61 = vor.u32 %v5233_v30, %v5230_v11  ;;  %v5239_v57 = vrot.slane %v5237_v34, 5  ;;  %v5243_v21 = vrot.slane %v5241_v41, 4 }
 0x1c4   : > { %v2509_v43 = vsel %vm8195_vm2, %v2501_v58, %v2508_v51  ;;  %v5249_v52 = vrot.slane %v5247_v28, 5  ;;  %v2511_v12 = vshrl.u32 %v2215_v48, 16  ;;  %v2516_v46 = vshrl.u32 %v9419_v4, 16 }
 0x1c5   : > { %7319 = vmatmul.mubr.bf16.gmra.mrb[4].mxu0 %v6509_v2  ;;  %v6382_v18 = vcombine.low %v2500_v56, %v2509_v43  ;;  %v5235_v32 = vrot.slane %v5234_v61, 4  ;;  %v5244_v22 = vor.u32 %v5243_v21, %v5239_v57  ;;  %v2519_v17 = vshll.u32 %v9419_v4, 16  ;;  %v5101_v56 = vld [vmem:[#allocation2 + $0xa8] sm:$0xf] }
 0x1c6   : > { %v6367_v33 = vrot.slane %v2511_v12, 11  ;;  %v2518_v16 = vrot.slane %v2516_v46, 7  ;;  %v2525_v39 = vshrl.u32 %v9425_v5, 16  ;;  %v2528_v45 = vshll.u32 %v9425_v5, 16 }
 0x1c7   : > { %7098 = vmatprep.mubr.bf16.mxu1 %v6382_v18  ;;  %v5240_v6 = vsel %vm8561_vm7, %v5235_v32, %v5239_v57  ;;  %v5245_v37 = vrot.slane %v5244_v22, 4  ;;  %v5252_v54 = vshrl.u32 %v5098_v31, 16  ;;  %v5255_v59 = vshll.u32 %v5098_v31, 16  ;;  %v5102_v57 = vld [vmem:[#allocation2 + $0xac] sm:$0xf] }
 0x1c8   : > { %v2521_v63 = vor.u32 %v2519_v17, %v2518_v16  ;;  %v2523_v26 = vrot.slane %v2518_v16, 4  ;;  %v2527_v7 = vrot.slane %v2525_v39, 7  ;;  %v5261_v49 = vshll.u32 %v5099_v8, 16  ;;  %v5103_v18 = vld [vmem:[#allocation2 + $0xb0] sm:$0x1] }
 0x1c9   : > { %v5250_v53 = vsel %vm8561_vm7, %v5245_v37, %v5249_v52  ;;  %v5254_v44 = vrot.slane %v5252_v54, 4  ;;  %v5257_v40 = vrot.slane %v5255_v59, 5  ;;  %v5265_v36 = vshrl.u32 %v5099_v8, 16  ;;  %v2221_v39 = vld [vmem:[#allocation2 + $0x144] sm:$0x8] }
 0x1ca   : > { %v6510_v47 = vcombine.low %v5240_v6, %v5250_v53  ;;  %v2522_v0 = vsel %vm8195_vm2, %v6367_v33, %v2521_v63  ;;  %v2530_v15 = vor.u32 %v2528_v45, %v2527_v7  ;;  %v5263_v24 = vrot.slane %v5261_v49, 5  ;;  %v9451_v45 = vld [vmem:[#allocation2 + $0x148] sm:$0xf]  ;;  %v9455_v59 = vld [vmem:[#allocation2 + $0x14c] sm:$0xf] }
 0x1cb   : > { %v5258_v58 = vor.u32 %v5257_v40, %v5254_v44  ;;  %v5267_v35 = vrot.slane %v5265_v36, 4  ;;  %v5271_v48 = vshll.u32 %v5100_v10, 16  ;;  %v2533_v11 = vshrl.u32 %v2218_v62, 16  ;;  %v5104_v36 = vld [vmem:[#allocation2 + $0xbc] sm:$0xf] }
 0x1cc   : > { %7322 = vmatprep.mubr.bf16.mxu0 %v6510_v47  ;;  %v2531_v30 = vsel %vm8195_vm2, %v2523_v26, %v2530_v15  ;;  %v2538_v34 = vshrl.u32 %v9435_v29, 16  ;;  %v2541_v41 = vshll.u32 %v9435_v29, 16  ;;  %v2547_v60 = vshrl.u32 %v9439_v1, 16 }
 0x1cd   : > { %v6383_v51 = vcombine.low %v2522_v0, %v2531_v30  ;;  %v5259_v28 = vrot.slane %v5258_v58, 4  ;;  %v5268_v2 = vor.u32 %v5267_v35, %v5263_v24  ;;  %v5273_v61 = vrot.slane %v5271_v48, 5  ;;  %v5105_v58 = vld [vmem:[#allocation2 + $0xc0] sm:$0xf] }
 0x1ce   : > { %v6368_v21 = vrot.slane %v2533_v11, 11  ;;  %v2540_v43 = vrot.slane %v2538_v34, 7  ;;  %v2549_v52 = vrot.slane %v2547_v60, 7  ;;  %v2550_v12 = vshll.u32 %v9439_v1, 16 }
 0x1cf   : > { %7099 = vmatmul.mubr.bf16.gmra.mrb[24].mxu1 %v6383_v51  ;;  %v5264_v46 = vsel %vm8561_vm7, %v5259_v28, %v5263_v24  ;;  %v5269_v31 = vrot.slane %v5268_v2, 4  ;;  %v5276_v32 = vshrl.u32 %v5101_v56, 16  ;;  %v5279_v22 = vshll.u32 %v5101_v56, 16  ;;  %v5106_v2 = vld [vmem:[#allocation2 + $0xc4] sm:$0x1] }
 0x1d0   : > { %v2543_v17 = vor.u32 %v2541_v41, %v2540_v43  ;;  %v2545_v8 = vrot.slane %v2540_v43, 4  ;;  %v2552_v33 = vor.u32 %v2550_v12, %v2549_v52  ;;  %v5285_v16 = vshll.u32 %v5102_v57, 16 }
 0x1d1   : > { %v5274_v10 = vsel %vm8561_vm7, %v5269_v31, %v5273_v61  ;;  %v5278_v6 = vrot.slane %v5276_v32, 4  ;;  %v5281_v37 = vrot.slane %v5279_v22, 5  ;;  %v5289_v54 = vshrl.u32 %v5102_v57, 16 }
 0x1d2   : > { %v6511_v62 = vcombine.low %v5264_v46, %v5274_v10  ;;  %v2544_v63 = vsel %vm8195_vm2, %v6368_v21, %v2543_v17  ;;  %v2553_v26 = vsel %vm8195_vm2, %v2545_v8, %v2552_v33  ;;  %v5287_v7 = vrot.slane %v5285_v16, 5  ;;  %v5107_v46 = vld [vmem:[#allocation2 + $0xd0] sm:$0xf]  ;;  %v5108_v17 = vld [vmem:[#allocation2 + $0xd4] sm:$0xf] }
 0x1d3   : > { %v6384_v49 = vcombine.low %v2544_v63, %v2553_v26  ;;  %v5282_v53 = vor.u32 %v5281_v37, %v5278_v6  ;;  %v5291_v44 = vrot.slane %v5289_v54, 4  ;;  %v5295_v40 = vshll.u32 %v5103_v18, 16  ;;  %v5109_v10 = vld [vmem:[#allocation2 + $0xd8] sm:$0x1] }
 0x1d4   : > { %7323 = vmatmul.mubr.bf16.gmra.mrb[8].mxu0 %v6511_v62  ;;  %v2555_v47 = vshrl.u32 %v2221_v39, 16  ;;  %v2560_v0 = vshrl.u32 %v9451_v45, 16  ;;  %v2563_v15 = vshll.u32 %v9451_v45, 16  ;;  %v2569_v24 = vshrl.u32 %v9455_v59, 16 }
 0x1d5   : > { %7102 = vmatprep.mubr.bf16.mxu1 %v6384_v49  ;;  %v5283_v35 = vrot.slane %v5282_v53, 4  ;;  %v5292_v48 = vor.u32 %v5291_v44, %v5287_v7  ;;  %v5297_v11 = vrot.slane %v5295_v40, 5  ;;  %v2572_v30 = vshll.u32 %v9455_v59, 16  ;;  %v5110_v53 = vld [vmem:[#allocation2 + $0xe4] sm:$0xf] }
 0x1d6   : > { %v6369_v34 = vrot.slane %v2555_v47, 11  ;;  %v2562_v41 = vrot.slane %v2560_v0, 7  ;;  %v2571_v60 = vrot.slane %v2569_v24, 7  ;;  %v5300_v56 = vshrl.u32 %v5104_v36, 16  ;;  %v5111_v47 = vld [vmem:[#allocation2 + $0xe8] sm:$0xf] }
 0x1d7   : > { %v5288_v51 = vsel %vm8561_vm7, %v5283_v35, %v5287_v7  ;;  %v5293_v28 = vrot.slane %v5292_v48, 4  ;;  %v5303_v61 = vshll.u32 %v5104_v36, 16  ;;  %v5309_v57 = vshll.u32 %v5105_v58, 16 }
 0x1d8   : > { %v2565_v21 = vor.u32 %v2563_v15, %v2562_v41  ;;  %v2567_v43 = vrot.slane %v2562_v41, 4  ;;  %v2574_v52 = vor.u32 %v2572_v30, %v2571_v60  ;;  %v5302_v12 = vrot.slane %v5300_v56, 4 }
 0x1d9   : > { %v5298_v31 = vsel %vm8561_vm7, %v5293_v28, %v5297_v11  ;;  %v5305_v18 = vrot.slane %v5303_v61, 5  ;;  %v5311_v32 = vrot.slane %v5309_v57, 5  ;;  %v5313_v22 = vshrl.u32 %v5105_v58, 16  ;;  %v5113_v61 = vld [vmem:[#allocation2 + $0xf8] sm:$0xf] }
 0x1da   : > { %v6512_v8 = vcombine.low %v5288_v51, %v5298_v31  ;;  %v2566_v33 = vsel %vm8195_vm2, %v6369_v34, %v2565_v21  ;;  %v2575_v16 = vsel %vm8195_vm2, %v2567_v43, %v2574_v52  ;;  %v5319_v39 = vshll.u32 %v5106_v2, 16  ;;  %v5114_v43 = vld [vmem:[#allocation2 + $0xfc] sm:$0xf] }
 0x1db   : > { %v6385_v6 = vcombine.low %v2566_v33, %v2575_v16  ;;  %v5306_v37 = vor.u32 %v5305_v18, %v5302_v12  ;;  %v5315_v54 = vrot.slane %v5313_v22, 4  ;;  %v6402_v62 = vcombine.low %v9296_v20, %v9306_v13  ;;  %v5112_v20 = vld [vmem:[#allocation2 + $0xec] sm:$0x1] }
 0x1dc   : > { %7326 = vmatprep.mubr.bf16.mxu0 %v6512_v8  ;;  %v5321_v63 = vrot.slane %v5319_v39, 5  ;;  %v5324_v26 = vshrl.u32 %v5107_v46, 16  ;;  %v5327_v7 = vshll.u32 %v5107_v46, 16  ;;  %v5333_v49 = vshll.u32 %v5108_v17, 16 }
 0x1dd   : > { %7103 = vmatmul.mubr.bf16.gmra.mrb[28].mxu1 %v6385_v6  ;;  %v5307_v44 = vrot.slane %v5306_v37, 4  ;;  %v5316_v40 = vor.u32 %v5315_v54, %v5311_v32  ;;  %v5337_v36 = vshrl.u32 %v5108_v17, 16  ;;  %v5343_v23 = vshll.u32 %v5109_v10, 16  ;;  %v5115_v17 = vld [vmem:[#allocation2 + $0x100] sm:$0x1] }
 0x1de   : > { %7138 = vmatprep.mubr.bf16.mxu1 %v6402_v62  ;;  %v5326_v0 = vrot.slane %v5324_v26, 4  ;;  %v5329_v15 = vrot.slane %v5327_v7, 5  ;;  %v5335_v24 = vrot.slane %v5333_v49, 5  ;;  %v6403_v58 = vcombine.low %v9331_v19, %v9338_v9  ;;  %v5116_v6 = vld [vmem:[#allocation2 + $0x10c] sm:$0xf] }
 0x1df   : > { %v5312_v13 = vsel %vm8561_vm7, %v5307_v44, %v5311_v32  ;;  %v5317_v35 = vrot.slane %v5316_v40, 4  ;;  %v5339_v48 = vrot.slane %v5337_v36, 4  ;;  %v5345_v11 = vrot.slane %v5343_v23, 5  ;;  %v5118_v36 = vld [vmem:[#allocation2 + $0x114] sm:$0x1] }
 0x1e0   : > { %v5330_v30 = vor.u32 %v5329_v15, %v5326_v0  ;;  %v5348_v34 = vshrl.u32 %v5110_v53, 16  ;;  %v5351_v41 = vshll.u32 %v5110_v53, 16  ;;  %v5357_v60 = vshll.u32 %v5111_v47, 16 }
 0x1e1   : > { %v5322_v56 = vsel %vm8561_vm7, %v5317_v35, %v5321_v63  ;;  %v5340_v51 = vor.u32 %v5339_v48, %v5335_v24  ;;  %v5361_v28 = vshrl.u32 %v5111_v47, 16  ;;  %v5367_v2 = vshll.u32 %v5112_v20, 16 }
 0x1e2   : > { %v6513_v57 = vcombine.low %v5312_v13, %v5322_v56  ;;  %v5331_v19 = vrot.slane %v5330_v30, 4  ;;  %v5350_v9 = vrot.slane %v5348_v34, 4  ;;  %v5353_v21 = vrot.slane %v5351_v41, 5 }
 0x1e3   : > { %v5341_v52 = vrot.slane %v5340_v51, 4  ;;  %v5359_v12 = vrot.slane %v5357_v60, 5  ;;  %v5363_v46 = vrot.slane %v5361_v28, 4  ;;  %v5369_v31 = vrot.slane %v5367_v2, 5  ;;  %v5120_v60 = vld [vmem:[#allocation2 + $0x124] sm:$0xf] }
 0x1e4   : > { %7327 = vmatmul.mubr.bf16.gmra.mrb[12].mxu0 %v6513_v57  ;;  %v5336_v18 = vsel %vm8561_vm7, %v5331_v19, %v5335_v24  ;;  %v5354_v32 = vor.u32 %v5353_v21, %v5350_v9  ;;  %v6404_v22 = vcombine.low %v9355_v42, %v9359_v3  ;;  %v5372_v8 = vshrl.u32 %v5113_v61, 16  ;;  %v5117_v42 = vld [vmem:[#allocation2 + $0x110] sm:$0xf]  ;;  %v5121_v19 = vld [vmem:[#allocation2 + $0x128] sm:$0x1] }
 0x1e5   : > { %v5346_v33 = vsel %vm8561_vm7, %v5341_v52, %v5345_v11  ;;  %7139 = vmatmul.mubr.bf16.vlgmr.msra.gmra.mrb[16].mxu1 %v6403_v58  ;;  %v5364_v16 = vor.u32 %v5363_v46, %v5359_v12  ;;  %v5375_v39 = vshll.u32 %v5113_v61, 16  ;;  %v5381_v10 = vshll.u32 %v5114_v43, 16  ;;  %v5119_v58 = vld [vmem:[#allocation2 + $0x120] sm:$0xf] }
 0x1e6   : > { %v6514_v37 = vcombine.low %v5336_v18, %v5346_v33  ;;  %v5355_v54 = vrot.slane %v5354_v32, 4  ;;  %7142 = vmatprep.mubr.bf16.mxu1 %v6404_v22  ;;  %v5374_v62 = vrot.slane %v5372_v8, 4  ;;  %v5385_v63 = vshrl.u32 %v5114_v43, 16  ;;  %v5123_v18 = vld [vmem:[#allocation2 + $0x138] sm:$0xf] }
 0x1e7   : > { %v5365_v26 = vrot.slane %v5364_v16, 4  ;;  %v5377_v7 = vrot.slane %v5375_v39, 5  ;;  %v5383_v49 = vrot.slane %v5381_v10, 5  ;;  %v5391_v53 = vshll.u32 %v5115_v17, 16 }
 0x1e8   : > { %7330 = vmatprep.mubr.bf16.mxu0 %v6514_v37  ;;  %v5360_v3 = vsel %vm8561_vm7, %v5355_v54, %v5359_v12  ;;  %v5387_v44 = vrot.slane %v5385_v63, 4  ;;  %v6405_v40 = vcombine.low %v9381_v38, %v9389_v50  ;;  %v5396_v23 = vshrl.u32 %v5116_v6, 16  ;;  %v5122_v12 = vld [vmem:[#allocation2 + $0x134] sm:$0xf]  ;;  %v5124_v54 = vld [vmem:[#allocation2 + $0x13c] sm:$0x1] }
 0x1e9   : > { %v5370_v47 = vsel %vm8561_vm7, %v5365_v26, %v5369_v31  ;;  %v5378_v0 = vor.u32 %v5377_v7, %v5374_v62  ;;  %v5393_v15 = vrot.slane %v5391_v53, 5  ;;  %v5399_v24 = vshll.u32 %v5116_v6, 16 }
 0x1ea   : > { %v6515_v20 = vcombine.low %v5360_v3, %v5370_v47  ;;  %v5388_v13 = vor.u32 %v5387_v44, %v5383_v49  ;;  %v5398_v35 = vrot.slane %v5396_v23, 4  ;;  %v5405_v48 = vshll.u32 %v5117_v42, 16 }
 0x1eb   : > { %v5379_v11 = vrot.slane %v5378_v0, 4  ;;  %v5401_v30 = vrot.slane %v5399_v24, 5  ;;  %v5409_v34 = vshrl.u32 %v5117_v42, 16  ;;  %v5415_v41 = vshll.u32 %v5118_v36, 16  ;;  %v5125_v42 = vld [vmem:[#allocation2 + $0x148] sm:$0xf] }
 0x1ec   : > { %7331 = vmatmul.mubr.bf16.gmra.mrb[16].mxu0 %v6515_v20  ;;  %v5389_v38 = vrot.slane %v5388_v13, 4  ;;  %v5407_v50 = vrot.slane %v5405_v48, 5  ;;  %v6406_v56 = vcombine.low %v9402_v14, %v9408_v25  ;;  %v5420_v51 = vshrl.u32 %v5119_v58, 16 }
 0x1ed   : > { %v5384_v28 = vsel %vm8561_vm7, %v5379_v11, %v5383_v49  ;;  %7143 = vmatmul.mubr.bf16.gmra.mrb[20].mxu1 %v6405_v40  ;;  %v5402_v2 = vor.u32 %v5401_v30, %v5398_v35  ;;  %v5411_v61 = vrot.slane %v5409_v34, 4  ;;  %v5417_v57 = vrot.slane %v5415_v41, 5  ;;  %v5126_v40 = vld [vmem:[#allocation2 + $0x14c] sm:$0xf]  ;;  %v338_v34 = vld [vmem:[#allocation2 + $0x164] sm:$0x1] }
 0x1ee   : > { %v5394_v9 = vsel %vm8561_vm7, %v5389_v38, %v5393_v15  ;;  %7146 = vmatprep.mubr.bf16.mxu1 %v6406_v56  ;;  %v5422_v21 = vrot.slane %v5420_v51, 4  ;;  %v5423_v43 = vshll.u32 %v5119_v58, 16  ;;  %v5429_v52 = vshll.u32 %v5120_v60, 16  ;;  %v5127_v58 = vld [vmem:[#allocation2 + $0x150] sm:$0x1] }
 0x1ef   : > { %v6516_v46 = vcombine.low %v5384_v28, %v5394_v9  ;;  %v5403_v31 = vrot.slane %v5402_v2, 4  ;;  %v5412_v14 = vor.u32 %v5411_v61, %v5407_v50  ;;  %v5433_v25 = vshrl.u32 %v5120_v60, 16  ;;  %v5129_v2 = vld [vmem:[#allocation2 + $0x160] sm:$0xf] }
 0x1f0   : > { %v5425_v32 = vrot.slane %v5423_v43, 5  ;;  %v5431_v22 = vrot.slane %v5429_v52, 5  ;;  %v5439_v17 = vshll.u32 %v5121_v19, 16  ;;  %v6407_v8 = vcombine.low %v9419_v4, %v9425_v5 }
 0x1f1   : > { %7334 = vmatprep.mubr.bf16.mxu0 %v6516_v46  ;;  %v5408_v33 = vsel %vm8561_vm7, %v5403_v31, %v5407_v50  ;;  %v5413_v16 = vrot.slane %v5412_v14, 4  ;;  %v5435_v39 = vrot.slane %v5433_v25, 4  ;;  %v5444_v10 = vshrl.u32 %v5122_v12, 16 }
 0x1f2   : > { %v5426_v6 = vor.u32 %v5425_v32, %v5422_v21  ;;  %v5441_v37 = vrot.slane %v5439_v17, 5  ;;  %v5447_v62 = vshll.u32 %v5122_v12, 16  ;;  %v5453_v63 = vshll.u32 %v5123_v18, 16 }
 0x1f3   : > { %v5418_v26 = vsel %vm8561_vm7, %v5413_v16, %v5417_v57  ;;  %v5436_v7 = vor.u32 %v5435_v39, %v5431_v22  ;;  %v5446_v49 = vrot.slane %v5444_v10, 4  ;;  %v5457_v53 = vshrl.u32 %v5123_v18, 16 }
 0x1f4   : > { %v6517_v4 = vcombine.low %v5408_v33, %v5418_v26  ;;  %v5427_v5 = vrot.slane %v5426_v6, 4  ;;  %v5449_v3 = vrot.slane %v5447_v62, 5  ;;  %v5455_v44 = vrot.slane %v5453_v63, 5 }
 0x1f5   : > { %v5437_v36 = vrot.slane %v5436_v7, 4  ;;  %7147 = vmatmul.mubr.bf16.gmra.mrb[24].mxu1 %v6407_v8  ;;  %v5459_v23 = vrot.slane %v5457_v53, 4  ;;  %v5463_v47 = vshll.u32 %v5124_v54, 16  ;;  %v6408_v0 = vcombine.low %v9435_v29, %v9439_v1  ;;  %v5128_v1 = vld [vmem:[#allocation2 + $0x15c] sm:$0xf] }
 0x1f6   : > { %7335 = vmatmul.mubr.bf16.gmra.mrb[20].mxu0 %v6517_v4  ;;  %v5432_v15 = vsel %vm8561_vm7, %v5427_v5, %v5431_v22  ;;  %v5450_v24 = vor.u32 %v5449_v3, %v5446_v49  ;;  %v5468_v20 = vshrl.u32 %v5125_v42, 16  ;;  %v5471_v13 = vshll.u32 %v5125_v42, 16 }
 0x1f7   : > { %v5442_v35 = vsel %vm8561_vm7, %v5437_v36, %v5441_v37  ;;  %v5460_v48 = vor.u32 %v5459_v23, %v5455_v44  ;;  %v5465_v11 = vrot.slane %v5463_v47, 5  ;;  %7150 = vmatprep.mubr.bf16.mxu1 %v6408_v0  ;;  %v5477_v30 = vshll.u32 %v5126_v40, 16 }
 0x1f8   : > { %v6518_v41 = vcombine.low %v5432_v15, %v5442_v35  ;;  %v5451_v60 = vrot.slane %v5450_v24, 4  ;;  %v5470_v38 = vrot.slane %v5468_v20, 4  ;;  %v5473_v29 = vrot.slane %v5471_v13, 5 }
 0x1f9   : > { %v5461_v50 = vrot.slane %v5460_v48, 4  ;;  %v5479_v56 = vrot.slane %v5477_v30, 5  ;;  %v5481_v51 = vshrl.u32 %v5126_v40, 16  ;;  %v5487_v28 = vshll.u32 %v5127_v58, 16 }
 0x1fa   : > { %7338 = vmatprep.mubr.bf16.mxu0 %v6518_v41  ;;  %v5456_v61 = vsel %vm8561_vm7, %v5451_v60, %v5455_v44  ;;  %v5474_v57 = vor.u32 %v5473_v29, %v5470_v38  ;;  %v6409_v19 = vcombine.low %v9451_v45, %v9455_v59  ;;  %v339_v9 = vsel %vm8483_vm6, 0, %v338_v34 }
 0x1fb   : > { %v5466_v21 = vsel %vm8561_vm7, %v5461_v50, %v5465_v11  ;;  %v5483_v43 = vrot.slane %v5481_v51, 4  ;;  %340 = vst [vmem:[#allocation2 + $0x164] sm:$0x1] %v339_v9  ;;  %v5492_v52 = vshrl.u32 %v5128_v1, 16  ;;  %v5495_v31 = vshll.u32 %v5128_v1, 16 }
 0x1fc   : > { %v6519_v12 = vcombine.low %v5456_v61, %v5466_v21  ;;  %v5475_v46 = vrot.slane %v5474_v57, 4  ;;  %v5501_v14 = vshll.u32 %v5129_v2, 16  ;;  %v5489_v18 = vrot.slane %v5487_v28, 5 }
 0x1fd   : > { %v5484_v25 = vor.u32 %v5483_v43, %v5479_v56  ;;  %7151 = vmatmul.mubr.bf16.gmra.mrb[28].mxu1 %v6409_v19  ;;  %v5494_v32 = vrot.slane %v5492_v52, 4  ;;  %v5505_v22 = vshrl.u32 %v5129_v2, 16  ;;  %v5497_v45 = vrot.slane %v5495_v31, 5 }
 0x1fe   : > { %7339 = vmatmul.mubr.bf16.gmra.mrb[24].mxu0 %v6519_v12  ;;  %v5503_v59 = vrot.slane %v5501_v14, 5  ;;  %v5480_v55 = vsel %vm8561_vm7, %v5475_v46, %v5479_v56 }
 0x1ff   : > { %v5485_v17 = vrot.slane %v5484_v25, 4  ;;  %v5507_v8 = vrot.slane %v5505_v22, 4  ;;  %v5498_v33 = vor.u32 %v5497_v45, %v5494_v32 }
 0x201   : > { %v5490_v16 = vsel %vm8561_vm7, %v5485_v17, %v5489_v18  ;;  %v5508_v39 = vor.u32 %v5507_v8, %v5503_v59  ;;  %v5499_v37 = vrot.slane %v5498_v33, 4 }
 0x202   : > { %v6520_v10 = vcombine.low %v5480_v55, %v5490_v16  ;;  %v5130_v6 = vld [vmem:[#allocation2 + $0x164] sm:$0x1] }
 0x203   : > { %v5509_v54 = vrot.slane %v5508_v39, 4  ;;  %v5511_v62 = vshll.u32 %v5130_v6, 16  ;;  %v5504_v63 = vsel %vm8561_vm7, %v5499_v37, %v5503_v59 }
 0x204   : > { %7342 = vmatprep.mubr.bf16.mxu0 %v6520_v10 }
 0x205   : > { %v5513_v26 = vrot.slane %v5511_v62, 5 }
 0x207   : > { %v5514_v7 = vsel %vm8561_vm7, %v5509_v54, %v5513_v26 }
 0x208   : > { %v6521_v49 = vcombine.low %v5504_v63, %v5514_v7 }
 0x20a   : > { %7343 = vmatmul.mubr.bf16.gmra.mrb[28].mxu0 %v6521_v49 }
 0x26d   : > { %v7076_v53 = vpop.f32.mrb[0].mxu1 }
 0x26e   : > { %v2739_v42 = vpop.f32.mrb[1].mxu1 }
 0x26f   : > { %v7077_v4 = vpop.f32.mrb[2].mxu1 }
 0x270   : > { %v2742_v5 = vpop.f32.mrb[3].mxu1 }
 0x275   : > { %v7080_v3 = vpop.f32.mrb[4].mxu1 }
 0x276   : > { %v2755_v44 = vpop.f32.mrb[5].mxu1 }
 0x277   : > { %v7081_v40 = vpop.f32.mrb[6].mxu1 }
 0x278   : > { %v2758_v36 = vpop.f32.mrb[7].mxu1 }
 0x27d   : > { %v7084_v23 = vpop.f32.mrb[8].mxu1 }
 0x27e   : > { %v2771_v47 = vpop.f32.mrb[9].mxu1 }
 0x27f   : > { %v7085_v0 = vpop.f32.mrb[10].mxu1 }
 0x280   : > { %v2774_v15 = vpop.f32.mrb[11].mxu1 }
 0x285   : > { %v9527_v24 = vpop.f32.mrb[12].mxu1 }
 0x286   : > { %v9529_v58 = vpop.f32.mrb[13].mxu1 }
 0x287   : > { %v9531_v27 = vpop.f32.mrb[14].mxu1 }
 0x288   : > { %v9533_v20 = vpop.f32.mrb[15].mxu1 }
 0x28b   : > { %v7316_v13 = vpop.f32.mrb[0].mxu0 }
 0x28c   : > { %v7362_v35 = vadd.f32 %v7316_v13, %v7076_v53  ;;  %v5678_v48 = vpop.f32.mrb[1].mxu0 }
 0x28d   : > { %v7363_v11 = vadd.f32 %v5678_v48, %v2739_v42  ;;  %v7317_v30 = vpop.f32.mrb[2].mxu0 }
 0x28e   : > { %v7364_v34 = vadd.f32 %v7317_v30, %v7077_v4  ;;  %v5681_v41 = vpop.f32.mrb[3].mxu0  ;;  %v6036_v51 = vmul.f32 %v7362_v35, %v7362_v35 }
 0x28f   : > { %v7365_v60 = vadd.f32 %v5681_v41, %v2742_v5  ;;  %v6034_v29 = vmul.f32 %v7363_v11, %v7363_v11 }
 0x290   : > { %v6611_v38 = vpack.c.bf16 %v7364_v34, %v7362_v35  ;;  %v6037_v57 = vmul.f32 %v7364_v34, %v7364_v34 }
 0x291   : > { %v6606_v1 = vpack.c.bf16 %v7365_v60, %v7363_v11  ;;  %v5997_v50 = vadd.f32 %v7365_v60, %v7363_v11  ;;  %v6035_v56 = vmul.f32 %v7365_v60, %v7365_v60 }
 0x292   : > { %6683 = vst [vmem:[%s9537_s18 + $0x8] sm:$0xff] %v6611_v38  }
 0x293   : > { %6607 = vst [vmem:[%s9537_s18] sm:$0xff] %v6606_v1   ;;  %v5998_v28 = vadd.f32 %v7362_v35, %v5997_v50  ;;  %v6066_v2 = vadd.f32 %v6035_v56, %v6034_v29 }
 0x295   : > { %v6067_v19 = vadd.f32 %v6066_v2, %v6036_v51  ;;  %v5999_v43 = vadd.f32 %v7364_v34, %v5998_v28 }
 0x297   : > { %v6068_v46 = vadd.f32 %v6067_v19, %v6037_v57 }
 0x298   : > { %v7320_v61 = vpop.f32.mrb[4].mxu0 }
 0x299   : > { %v7366_v9 = vadd.f32 %v7320_v61, %v7080_v3  ;;  %v5694_v21 = vpop.f32.mrb[5].mxu0 }
 0x29a   : > { %v7367_v52 = vadd.f32 %v5694_v21, %v2755_v44  ;;  %v7321_v12 = vpop.f32.mrb[6].mxu0 }
 0x29b   : > { %v7368_v31 = vadd.f32 %v7321_v12, %v7081_v40  ;;  %v5697_v14 = vpop.f32.mrb[7].mxu0  ;;  %v6040_v8 = vmul.f32 %v7366_v9, %v7366_v9 }
 0x29c   : > { %v6000_v25 = vadd.f32 %v7367_v52, %v5999_v43  ;;  %v6038_v18 = vmul.f32 %v7367_v52, %v7367_v52  ;;  %v7369_v32 = vadd.f32 %v5697_v14, %v2758_v36 }
 0x29d   : > { %v6621_v22 = vpack.c.bf16 %v7368_v31, %v7366_v9  ;;  %v6041_v39 = vmul.f32 %v7368_v31, %v7368_v31 }
 0x29e   : > { %v6069_v45 = vadd.f32 %v6068_v46, %v6038_v18  ;;  %v6616_v59 = vpack.c.bf16 %v7369_v32, %v7367_v52  ;;  %v6001_v55 = vadd.f32 %v7369_v32, %v6000_v25  ;;  %v6039_v17 = vmul.f32 %v7369_v32, %v7369_v32 }
 0x29f   : > { %6685 = vst [vmem:[%s9537_s18 + $0x18] sm:$0xff] %v6621_v22  }
 0x2a0   : > { %6684 = vst [vmem:[%s9537_s18 + $0x10] sm:$0xff] %v6616_v59   ;;  %v6002_v33 = vadd.f32 %v7366_v9, %v6001_v55  ;;  %v6070_v16 = vadd.f32 %v6069_v45, %v6039_v17 }
 0x2a2   : > { %v6071_v10 = vadd.f32 %v6070_v16, %v6040_v8  ;;  %v6003_v6 = vadd.f32 %v7368_v31, %v6002_v33 }
 0x2a4   : > { %v6072_v37 = vadd.f32 %v6071_v10, %v6041_v39 }
 0x2a7   : > { %v7324_v54 = vpop.f32.mrb[8].mxu0 }
 0x2a8   : > { %v7370_v62 = vadd.f32 %v7324_v54, %v7084_v23  ;;  %v5710_v63 = vpop.f32.mrb[9].mxu0 }
 0x2a9   : > { %v7371_v26 = vadd.f32 %v5710_v63, %v2771_v47  ;;  %v7325_v7 = vpop.f32.mrb[10].mxu0 }
 0x2aa   : > { %v7372_v49 = vadd.f32 %v7325_v7, %v7085_v0  ;;  %v5713_v53 = vpop.f32.mrb[11].mxu0  ;;  %v6044_v35 = vmul.f32 %v7370_v62, %v7370_v62 }
 0x2ab   : > { %v6004_v42 = vadd.f32 %v7371_v26, %v6003_v6  ;;  %v6042_v4 = vmul.f32 %v7371_v26, %v7371_v26  ;;  %v7373_v5 = vadd.f32 %v5713_v53, %v2774_v15 }
 0x2ac   : > { %v6631_v3 = vpack.c.bf16 %v7372_v49, %v7370_v62  ;;  %v6045_v23 = vmul.f32 %v7372_v49, %v7372_v49 }
 0x2ad   : > { %v6073_v44 = vadd.f32 %v6072_v37, %v6042_v4  ;;  %v6626_v40 = vpack.c.bf16 %v7373_v5, %v7371_v26  ;;  %v6005_v36 = vadd.f32 %v7373_v5, %v6004_v42  ;;  %v6043_v13 = vmul.f32 %v7373_v5, %v7373_v5 }
 0x2ae   : > { %6687 = vst [vmem:[%s9537_s18 + $0x28] sm:$0xff] %v6631_v3  }
 0x2af   : > { %6686 = vst [vmem:[%s9537_s18 + $0x20] sm:$0xff] %v6626_v40   ;;  %v6006_v48 = vadd.f32 %v7370_v62, %v6005_v36  ;;  %v6074_v11 = vadd.f32 %v6073_v44, %v6043_v13 }
 0x2b1   : > { %v6075_v30 = vadd.f32 %v6074_v11, %v6044_v35  ;;  %v6007_v34 = vadd.f32 %v7372_v49, %v6006_v48 }
 0x2b3   : > { %v6076_v47 = vadd.f32 %v6075_v30, %v6045_v23 }
 0x2b7   : > { %v7328_v41 = vpop.f32.mrb[12].mxu0 }
 0x2b8   : > { %v7374_v0 = vadd.f32 %v7328_v41, %v9527_v24  ;;  %v5726_v60 = vpop.f32.mrb[13].mxu0  ;;  %v7140_v38 = vpop.f32.mrb[16].mxu1 }
 0x2b9   : > { %v7375_v15 = vadd.f32 %v5726_v60, %v9529_v58  ;;  %v7329_v29 = vpop.f32.mrb[14].mxu0  ;;  %v3157_v1 = vpop.f32.mrb[17].mxu1 }
 0x2ba   : > { %v7376_v50 = vadd.f32 %v7329_v29, %v9531_v27  ;;  %v5729_v56 = vpop.f32.mrb[15].mxu0  ;;  %v7141_v51 = vpop.f32.mrb[18].mxu1  ;;  %v6048_v52 = vmul.f32 %v7374_v0, %v7374_v0 }
 0x2bb   : > { %v6008_v28 = vadd.f32 %v7375_v15, %v6007_v34  ;;  %v6046_v2 = vmul.f32 %v7375_v15, %v7375_v15  ;;  %v7377_v61 = vadd.f32 %v5729_v56, %v9533_v20  ;;  %v3160_v57 = vpop.f32.mrb[19].mxu1 }
 0x2bc   : > { %v6641_v19 = vpack.c.bf16 %v7376_v50, %v7374_v0  ;;  %v6049_v25 = vmul.f32 %v7376_v50, %v7376_v50 }
 0x2bd   : > { %v6077_v9 = vadd.f32 %v6076_v47, %v6046_v2  ;;  %v6636_v24 = vpack.c.bf16 %v7377_v61, %v7375_v15  ;;  %v6009_v21 = vadd.f32 %v7377_v61, %v6008_v28  ;;  %v6047_v43 = vmul.f32 %v7377_v61, %v7377_v61 }
 0x2be   : > { %6689 = vst [vmem:[%s9537_s18 + $0x38] sm:$0xff] %v6641_v19  }
 0x2bf   : > { %6688 = vst [vmem:[%s9537_s18 + $0x30] sm:$0xff] %v6636_v24   ;;  %v6010_v58 = vadd.f32 %v7374_v0, %v6009_v21  ;;  %v6078_v12 = vadd.f32 %v6077_v9, %v6047_v43  ;;  %v7332_v46 = vpop.f32.mrb[16].mxu0 }
 0x2c0   : > { %v7378_v31 = vadd.f32 %v7332_v46, %v7140_v38  ;;  %v5742_v27 = vpop.f32.mrb[17].mxu0  ;;  %v7144_v14 = vpop.f32.mrb[20].mxu1 }
 0x2c1   : > { %v6079_v18 = vadd.f32 %v6078_v12, %v6048_v52  ;;  %v7379_v32 = vadd.f32 %v5742_v27, %v3157_v1  ;;  %v6011_v22 = vadd.f32 %v7376_v50, %v6010_v58  ;;  %v7333_v20 = vpop.f32.mrb[18].mxu0  ;;  %v3173_v45 = vpop.f32.mrb[21].mxu1 }
 0x2c2   : > { %v7380_v59 = vadd.f32 %v7333_v20, %v7141_v51  ;;  %v5745_v55 = vpop.f32.mrb[19].mxu0  ;;  %v7145_v17 = vpop.f32.mrb[22].mxu1  ;;  %v6052_v26 = vmul.f32 %v7378_v31, %v7378_v31 }
 0x2c3   : > { %v6012_v8 = vadd.f32 %v7379_v32, %v6011_v22  ;;  %v6050_v33 = vmul.f32 %v7379_v32, %v7379_v32  ;;  %v6080_v16 = vadd.f32 %v6079_v18, %v6049_v25  ;;  %v7381_v39 = vadd.f32 %v5745_v55, %v3160_v57  ;;  %v3176_v10 = vpop.f32.mrb[23].mxu1 }
 0x2c4   : > { %v6651_v6 = vpack.c.bf16 %v7380_v59, %v7378_v31  ;;  %v6053_v42 = vmul.f32 %v7380_v59, %v7380_v59 }
 0x2c5   : > { %v6081_v37 = vadd.f32 %v6080_v16, %v6050_v33  ;;  %v6646_v54 = vpack.c.bf16 %v7381_v39, %v7379_v32  ;;  %v6013_v62 = vadd.f32 %v7381_v39, %v6012_v8  ;;  %v6051_v63 = vmul.f32 %v7381_v39, %v7381_v39 }
 0x2c6   : > { %6691 = vst [vmem:[%s9537_s18 + $0x48] sm:$0xff] %v6651_v6  }
 0x2c7   : > { %6690 = vst [vmem:[%s9537_s18 + $0x40] sm:$0xff] %v6646_v54   ;;  %v6014_v7 = vadd.f32 %v7378_v31, %v6013_v62  ;;  %v6082_v49 = vadd.f32 %v6081_v37, %v6051_v63 }
 0x2c8   : > { %v7148_v53 = vpop.f32.mrb[24].mxu1 }
 0x2c9   : > { %v6083_v4 = vadd.f32 %v6082_v49, %v6052_v26  ;;  %v7336_v5 = vpop.f32.mrb[20].mxu0  ;;  %v6015_v3 = vadd.f32 %v7380_v59, %v6014_v7  ;;  %v3189_v44 = vpop.f32.mrb[25].mxu1 }
 0x2ca   : > { %v7382_v40 = vadd.f32 %v7336_v5, %v7144_v14  ;;  %v5758_v36 = vpop.f32.mrb[21].mxu0  ;;  %v7149_v13 = vpop.f32.mrb[26].mxu1 }
 0x2cb   : > { %v7383_v35 = vadd.f32 %v5758_v36, %v3173_v45  ;;  %v6084_v48 = vadd.f32 %v6083_v4, %v6053_v42  ;;  %v7337_v11 = vpop.f32.mrb[22].mxu0  ;;  %v3192_v23 = vpop.f32.mrb[27].mxu1 }
 0x2cc   : > { %v7384_v30 = vadd.f32 %v7337_v11, %v7145_v17  ;;  %v5761_v34 = vpop.f32.mrb[23].mxu0  ;;  %v6056_v56 = vmul.f32 %v7382_v40, %v7382_v40 }
 0x2cd   : > { %v6016_v47 = vadd.f32 %v7383_v35, %v6015_v3  ;;  %v6054_v41 = vmul.f32 %v7383_v35, %v7383_v35  ;;  %v7385_v0 = vadd.f32 %v5761_v34, %v3176_v10 }
 0x2ce   : > { %v6661_v60 = vpack.c.bf16 %v7384_v30, %v7382_v40  ;;  %v6057_v24 = vmul.f32 %v7384_v30, %v7384_v30 }
 0x2cf   : > { %v6085_v38 = vadd.f32 %v6084_v48, %v6054_v41  ;;  %v6656_v15 = vpack.c.bf16 %v7385_v0, %v7383_v35  ;;  %v6017_v29 = vadd.f32 %v7385_v0, %v6016_v47  ;;  %v6055_v1 = vmul.f32 %v7385_v0, %v7385_v0 }
 0x2d0   : > { %6693 = vst [vmem:[%s9537_s18 + $0x58] sm:$0xff] %v6661_v60   ;;  %v7152_v50 = vpop.f32.mrb[28].mxu1 }
 0x2d1   : > { %6692 = vst [vmem:[%s9537_s18 + $0x50] sm:$0xff] %v6656_v15   ;;  %v6018_v51 = vadd.f32 %v7382_v40, %v6017_v29  ;;  %v6086_v28 = vadd.f32 %v6085_v38, %v6055_v1  ;;  %v7340_v2 = vpop.f32.mrb[24].mxu0  ;;  %v3205_v61 = vpop.f32.mrb[29].mxu1 }
 0x2d2   : > { %v7386_v57 = vadd.f32 %v7340_v2, %v7148_v53  ;;  %v5774_v19 = vpop.f32.mrb[25].mxu0  ;;  %v7153_v9 = vpop.f32.mrb[30].mxu1 }
 0x2d3   : > { %v6087_v21 = vadd.f32 %v6086_v28, %v6056_v56  ;;  %v7387_v43 = vadd.f32 %v5774_v19, %v3189_v44  ;;  %v6019_v52 = vadd.f32 %v7384_v30, %v6018_v51  ;;  %v7341_v58 = vpop.f32.mrb[26].mxu0  ;;  %v3208_v12 = vpop.f32.mrb[31].mxu1 }
 0x2d4   : > { %v7388_v46 = vadd.f32 %v7341_v58, %v7149_v13  ;;  %v5777_v31 = vpop.f32.mrb[27].mxu0  ;;  %v6060_v55 = vmul.f32 %v7386_v57, %v7386_v57 }
 0x2d5   : > { %v6020_v27 = vadd.f32 %v7387_v43, %v6019_v52  ;;  %v6058_v14 = vmul.f32 %v7387_v43, %v7387_v43  ;;  %v6088_v25 = vadd.f32 %v6087_v21, %v6057_v24  ;;  %v7389_v18 = vadd.f32 %v5777_v31, %v3192_v23 }
 0x2d6   : > { %v6671_v32 = vpack.c.bf16 %v7388_v46, %v7386_v57  ;;  %v6061_v33 = vmul.f32 %v7388_v46, %v7388_v46 }
 0x2d7   : > { %v6089_v22 = vadd.f32 %v6088_v25, %v6058_v14  ;;  %v6666_v20 = vpack.c.bf16 %v7389_v18, %v7387_v43  ;;  %v6021_v45 = vadd.f32 %v7389_v18, %v6020_v27  ;;  %v6059_v59 = vmul.f32 %v7389_v18, %v7389_v18 }
 0x2d8   : > { %6695 = vst [vmem:[%s9537_s18 + $0x68] sm:$0xff] %v6671_v32  }
 0x2d9   : > { %6694 = vst [vmem:[%s9537_s18 + $0x60] sm:$0xff] %v6666_v20   ;;  %v6022_v17 = vadd.f32 %v7386_v57, %v6021_v45  ;;  %v6090_v8 = vadd.f32 %v6089_v22, %v6059_v59 }
 0x2db   : > { %v6091_v16 = vadd.f32 %v6090_v8, %v6060_v55  ;;  %v6023_v39 = vadd.f32 %v7388_v46, %v6022_v17 }
 0x2dd   : > { %v7344_v10 = vpop.f32.mrb[28].mxu0  ;;  %v6092_v6 = vadd.f32 %v6091_v16, %v6061_v33 }
 0x2de   : > { %v7390_v37 = vadd.f32 %v7344_v10, %v7152_v50  ;;  %v5790_v54 = vpop.f32.mrb[29].mxu0 }
 0x2df   : > { %v7391_v62 = vadd.f32 %v5790_v54, %v3205_v61  ;;  %v7345_v63 = vpop.f32.mrb[30].mxu0 }
 0x2e0   : > { %v7392_v26 = vadd.f32 %v7345_v63, %v7153_v9  ;;  %v5793_v7 = vpop.f32.mrb[31].mxu0  ;;  %v6064_v36 = vmul.f32 %v7390_v37, %v7390_v37 }
 0x2e1   : > { %v6024_v49 = vadd.f32 %v7391_v62, %v6023_v39  ;;  %v6062_v53 = vmul.f32 %v7391_v62, %v7391_v62  ;;  %v7393_v42 = vadd.f32 %v5793_v7, %v3208_v12 }
 0x2e2   : > { %v6681_v4 = vpack.c.bf16 %v7392_v26, %v7390_v37 }
 0x2e3   : > { %v6093_v5 = vadd.f32 %v6092_v6, %v6062_v53  ;;  %v6676_v3 = vpack.c.bf16 %v7393_v42, %v7391_v62  ;;  %v6025_v44 = vadd.f32 %v7393_v42, %v6024_v49  ;;  %v6063_v40 = vmul.f32 %v7393_v42, %v7393_v42 }
 0x2e4   : > { %6697 = vst [vmem:[%s9537_s18 + $0x78] sm:$0xff] %v6681_v4  }
 0x2e5   : > { %6696 = vst [vmem:[%s9537_s18 + $0x70] sm:$0xff] %v6676_v3   ;;  %v6026_v13 = vadd.f32 %v7390_v37, %v6025_v44  ;;  %v6094_v35 = vadd.f32 %v6093_v5, %v6063_v40 }
 0x2e6   : > { %7904 = shalt.err (!%p7901_p7)
}
 0x2e7   : > { %s7905_s29 = scalar_lea.hbm %s9562_s25, 2048  ;;  %s7909_s7 = scalar_lea.hbm %s9643_s2, 4096 }
 0x2e8   : > { %p7906_p9 = scmp.ne.s32.totalorder %s9562_s25, %s7905_s29  ;;  %p7910_p5 = scmp.lt.u32.totalorder %s9562_s25, %s9643_s2 }
 0x2e9   : > { %p7911_p11 = scmp.lt.u32.totalorder %s7909_s7, %s7905_s29  ;;  %p7913_p4 = scmp.lt.u32.totalorder %s7905_s29, %s9562_s25 }
 0x2ea   : > { %p7907_p1 = pnand %p7906_p9, %p8118_p12 }
 0x2eb   : > { %p7912_p2 = por %p7911_p11, %p7910_p5 }
 0x2ec   : > { %p7908_p0 = pneg %p7907_p1 }
 0x2ed   : > { %p7914_p6 = por %p7913_p4, %p7912_p2 }
 0x2ef   : > { %p7915_p8 = pnand %p7914_p6, %p7908_p0 }
 0x2f1   : > { %7918 = shalt.err (!%p7915_p8)
}
 0x2f2   : > { %s8001_s18 = smov 64   ;;  %s8002_s20 = smov 4   ;;  %v6065_v48 = vmul.f32 %v7392_v26, %v7392_v26  ;;  %v6027_v11 = vadd.f32 %v7392_v26, %v6026_v13  ;;  %v6095_v23 = vadd.f32 %v6094_v35, %v6064_v36 }
 0x2f3   : > { %7624 = dma.vmem_to_hbm [thread:$0]  (%p8118_p12), %s9564_s8, 2048, %s9562_s25, %s6108_s5, %s8001_s18, %s8001_s18, %s8002_s20  }
 0x2f4   : > { %v6028_v30 = vrot.slane %v6027_v11, 4  ;;  %v6096_v34 = vadd.f32 %v6095_v23, %v6065_v48  ;;  %s6265_s9 = sshll.u32 %s8169_s6, 1  ;;  %s6566_s4 = sshll.u32 %s8045_s16, 5 }
 0x2f5   : > { %s214_s11 = scalar_lea.vmem [#allocation9], %s6265_s9  ;;  %s9597_s5 = scalar_lea.hbm %s9644_s3, %s6566_s4 }
 0x2f6   : > { %v6029_v47 = vadd.f32 %v6028_v30, %v6027_v11  ;;  %v6097_v41 = vrot.slane %v6096_v34, 4  ;;  %s6142_s27 = sshll.u32 %s214_s11, 4  ;;  %s6113_s28 = scalar_lea.sflag [#allocation10], %s8169_s6  ;;  %s9599_s27 = int_to_ptr.vmem [resolvable:$true] %s6142_s27 }
 0x2f7   : > { %s7919_s23 = scalar_lea.vmem %s9599_s27, 32  ;;  %s8003_s16 = smov [#allocation9]  }
 0x2f8   : > { %v6030_v0 = vrot.slane %v6029_v47, 2  ;;  %v6098_v60 = vadd.f32 %v6097_v41, %v6096_v34  ;;  %p7920_p10 = scmp.ne.s32.totalorder %s9599_s27, %s7919_s23  ;;  %s7923_s29 = sshll.u32 %s8003_s16, 4  ;;  %s7924_s29 = int_to_ptr.vmem [resolvable:$false] %s7923_s29 }
 0x2f9   : > { %s7925_s30 = scalar_lea.vmem %s7924_s29, 64  ;;  %p7926_p7 = scmp.lt.s32.totalorder %s9599_s27, %s7924_s29 }
 0x2fa   : > { %v6031_v38 = vadd.f32 %v6030_v0, %v6029_v47  ;;  %v6099_v15 = vrot.slane %v6098_v60, 2  ;;  %p7921_p13 = pnand %p7920_p10, %p8118_p12  ;;  %p7927_p9 = scmp.lt.s32.totalorder %s7925_s30, %s7919_s23 }
 0x2fc   : > { %v6032_v29 = vrot.slane %v6031_v38, 1  ;;  %v6100_v1 = vadd.f32 %v6099_v15, %v6098_v60  ;;  %p7922_p3 = pneg %p7921_p13  ;;  %p7928_p1 = por %p7927_p9, %p7926_p7 }
 0x2fe   : > { %v6033_v50 = vadd.f32 %v6032_v29, %v6031_v38  ;;  %v6101_v56 = vrot.slane %v6100_v1, 1  ;;  %p7929_p0 = pnand %p7928_p1, %p7922_p3 }
 0x300   : > { %v6102_v51 = vadd.f32 %v6101_v56, %v6100_v1  ;;  %6105 = vst [vmem:[%s214_s11] sm:$0x1] %v6033_v50 }
 0x302   : > { %6106 = vst [vmem:[%s214_s11 + $0x1] sm:$0x1] %v6102_v51 }
 0x303   : > { %7932 = shalt.err (!%p7929_p0)
}
 0x304   : > { %s7933_s6 = scalar_lea.hbm %s9597_s5, 32  ;;  %s7937_s10 = scalar_lea.hbm %s9644_s3, 64 }
 0x305   : > { %p7934_p5 = scmp.ne.s32.totalorder %s9597_s5, %s7933_s6  ;;  %p7938_p4 = scmp.lt.u32.totalorder %s9597_s5, %s9644_s3 }
 0x306   : > { %p7939_p6 = scmp.lt.u32.totalorder %s7937_s10, %s7933_s6  ;;  %p7941_p10 = scmp.lt.u32.totalorder %s7933_s6, %s9597_s5 }
 0x307   : > { %p7935_p11 = pnand %p7934_p5, %p8118_p12 }
 0x308   : > { %p7940_p8 = por %p7939_p6, %p7938_p4 }
 0x309   : > { %p7936_p2 = pneg %p7935_p11 }
 0x30a   : > { %p7942_p13 = por %p7941_p10, %p7940_p8 }
 0x30c   : > { %p7943_p3 = pnand %p7942_p13, %p7936_p2 }
 0x30e   : > { %7946 = shalt.err (!%p7943_p3)
}
 0x30f   : > { %7625 = dma.vmem_to_hbm [thread:$0]  (%p8118_p12), %s9599_s27, 32, %s9597_s5, %s6113_s28  }
 0x310 PF: > { %s6154_s20 = sand.u32 1, %s7981_s12   ;;  %p9834_p7 = scmp.ne.s32.totalorder %s9679_s19, 0 }
 0x311   : > { %p9835_p9 = scmp.ge.s32.totalorder %s7993_s15, 2  ;;  %s6155_s9 = scalar_lea.sflag [#allocation5], %s6154_s20 }
 0x313   : > { %p7637_p1 = pnand %p9835_p9, %p9834_p7 }
 0x315   : > { %7972 = dma.done.wait (!%p7637_p1), %s6155_s9, 2048  }
 0x316   : > { %7974 = vsyncadd (!%p7637_p1), %s6155_s9, 4294965248  ;;  %s6164_s4 = scalar_lea.sflag [#allocation10], %s6154_s20 }
 0x317   : > { %7976 = dma.done.wait (!%p7637_p1), %s6164_s4, 32  }
 0x318   : > { %7978 = vsyncadd (!%p7637_p1), %s6164_s4, 4294967264  ;;  %p21_p12 = scmp.ge.s32.totalorder %s8080_s24, 4   ;;  %s9836_s12 = smov %s7985_s13 }
 0x319   : > { %s9837_s13 = smov %s7989_s14  ;;  %s9838_s14 = smov %s8114_s17 }
 0x31a   : > { %s9839_s15 = smov %s8080_s24  ;;  %23 = sbr.rel (!%p21_p12) target bundleno = 8 (0x8), region = 105 }
 0x321   :  { %6169 = vsyncpa [#allocation4], 1 }
 0x322   :  { %6171 = vsyncpa [#allocation4 + $0x1], 1 }
 0x323   :  { %6172 = vsyncpa [#allocation7], 1 }
 0x324   :  { %6173 = vsyncpa [#allocation5], 1 }
 0x325   :  { %6175 = vsyncpa [#allocation5 + $0x1], 1 }
 0x326   :  { %6176 = vsyncpa [#allocation10], 1 }
 0x327   :  { %6178 = vsyncpa [#allocation10 + $0x1], 1 }

</bundles_post_ra>
